<compile_context>
chip_gen: v5e
topology: v5e:2x2
jax: 0.10.0
libtpu: 0.0.40
codegen_flags: <defaults>
</compile_context>

<pallas_src>
import numpy as np
import jax
import jax.numpy as jnp
from jax.experimental import pallas as pl
from jax.experimental.pallas import tpu as pltpu

# VGG16 features[:28]: 12 convs (3x3, pad 1) + 4 maxpools, channels scaled /16.
CFG = [4, 4, "M", 8, 8, "M", 16, 16, 16, "M", 32, 32, 32, "M", 32, 32]
HIDDEN = 128          # scaled stand-in for 4096
NUM_CLASSES = 5
POOL_OUT = 7


# ----------------------------- Pallas kernels ------------------------------

def conv3x3_kernel(x_ref, w_ref, b_ref, o_ref, acc_ref):
    """Fused 3x3 conv (pad=1) + bias + ReLU for one image.

    x_ref:   (1, H, W*Cin)         bf16 folded activation
    w_ref:   (1, 3, W*Cin, W*Cout) bf16 banded weight (one matrix per kh tap)
    b_ref:   (1, 1, W*Cout)        f32 bias tiled over W
    o_ref:   (1, H, W*Cout)        bf16
    acc_ref: (H, W*Cout)           f32 VMEM scratch
    """
    H = x_ref.shape[1]
    x = x_ref[0]
    # kh = 1 (same row); width taps + width zero-padding live inside the banded matrix.
    acc_ref[...] = jnp.dot(x, w_ref[0, 1], preferred_element_type=jnp.float32)
    # kh = 0 (row above): contributes to output rows 1..H-1 (top row is zero pad).
    acc_ref[1:H, :] = acc_ref[1:H, :] + jnp.dot(
        x[0:H - 1, :], w_ref[0, 0], preferred_element_type=jnp.float32)
    # kh = 2 (row below): contributes to output rows 0..H-2 (bottom row is zero pad).
    acc_ref[0:H - 1, :] = acc_ref[0:H - 1, :] + jnp.dot(
        x[1:H, :], w_ref[0, 2], preferred_element_type=jnp.float32)
    y = jnp.maximum(acc_ref[...] + b_ref[0], 0.0)          # bias + ReLU in f32
    o_ref[0] = y.astype(o_ref.dtype)


def maxpool2x2_kernel(x_ref, o_ref):
    """Single-pass nn.MaxPool2d(2,2) for one image.
    x_ref: (1, H, W/2, 2*C)  -- width pairs folded onto the lane axis
    o_ref: (1, H/2, W/2, C)
    """
    Ho = o_ref.shape[1]
    C = o_ref.shape[3]
    for ho in range(Ho):
        r0 = x_ref[0, 2 * ho]
        r1 = x_ref[0, 2 * ho + 1]
        m = jnp.maximum(r0, r1)                             # max over the 2 rows
        o_ref[0, ho] = jnp.maximum(m[:, :C], m[:, C:])      # max over the 2 cols


def classifier_kernel(f_ref, w1_ref, b1_ref, w2_ref, b2_ref, w3_ref, b3_ref, o_ref):
    """Fused (avgpool folded into fc1) + ReLU + fc2 + ReLU + fc3."""
    h = jnp.dot(f_ref[...], w1_ref[...], preferred_element_type=jnp.float32) + b1_ref[...]
    h = jnp.maximum(h, 0.0)
    # TODO(synk): nn.Dropout() is stochastic in train mode; eval-mode identity is used here.
    h = jnp.dot(h.astype(w2_ref.dtype), w2_ref[...],
                preferred_element_type=jnp.float32) + b2_ref[...]
    h = jnp.maximum(h, 0.0)
    o = jnp.dot(h.astype(w3_ref.dtype), w3_ref[...],
                preferred_element_type=jnp.float32) + b3_ref[...]
    o_ref[...] = o.astype(o_ref.dtype)


# ------------------------------- wrappers -----------------------------------

def conv3x3_relu(a, wm, bm, n_img):
    """a: (2*n_img, H, W*Cin) bf16; wm: (2, 3, W*Cin, W*Cout); bm: (2, 1, W*Cout)."""
    GN, H, K = a.shape
    Nw = wm.shape[-1]
    return pl.pallas_call(
        conv3x3_kernel,
        out_shape=jax.ShapeDtypeStruct((GN, H, Nw), jnp.bfloat16),
        grid=(2, n_img),
        in_specs=[pl.BlockSpec((1, H, K), lambda g, n: (g * n_img + n, 0, 0)),
                  pl.BlockSpec((1, 3, K, Nw), lambda g, n: (g, 0, 0, 0)),
                  pl.BlockSpec((1, 1, Nw), lambda g, n: (g, 0, 0))],
        out_specs=pl.BlockSpec((1, H, Nw), lambda g, n: (g * n_img + n, 0, 0)),
        scratch_shapes=[pltpu.VMEM((H, Nw), jnp.float32)],
        compiler_params=pltpu.CompilerParams(
            dimension_semantics=("parallel", "parallel")),
    )(a, wm, bm)


def maxpool2x2(a, H, W, C):
    """a: (GN, H, W*C) -> (GN, H//2, (W//2)*C); one read, one write, no HBM gathers."""
    assert H % 2 == 0 and W % 2 == 0
    GN = a.shape[0]
    Ho, Wo = H // 2, W // 2
    a4 = a.reshape(GN, H, Wo, 2 * C)      # free reshape: width pairs -> lane axis
    out = pl.pallas_call(
        maxpool2x2_kernel,
        out_shape=jax.ShapeDtypeStruct((GN, Ho, Wo, C), a.dtype),
        grid=(GN,),
        in_specs=[pl.BlockSpec((1, H, Wo, 2 * C), lambda i: (i, 0, 0, 0))],
        out_specs=pl.BlockSpec((1, Ho, Wo, C), lambda i: (i, 0, 0, 0)),
        compiler_params=pltpu.CompilerParams(dimension_semantics=("parallel",)),
    )(a4)
    return out.reshape(GN, Ho, Wo * C)


def classifier(params, feat):
    n, k1 = feat.shape
    w1, b1 = params["fc1"]
    w2, b2 = params["fc2"]
    w3, b3 = params["fc3"]
    return pl.pallas_call(
        classifier_kernel,
        out_shape=jax.ShapeDtypeStruct((n, NUM_CLASSES), jnp.float32),
        grid=(1,),
        in_specs=[pl.BlockSpec((n, k1), lambda i: (0, 0)),
                  pl.BlockSpec(w1.shape, lambda i: (0, 0)),
                  pl.BlockSpec(b1.shape, lambda i: (0, 0)),
                  pl.BlockSpec(w2.shape, lambda i: (0, 0)),
                  pl.BlockSpec(b2.shape, lambda i: (0, 0)),
                  pl.BlockSpec(w3.shape, lambda i: (0, 0)),
                  pl.BlockSpec(b3.shape, lambda i: (0, 0))],
        out_specs=pl.BlockSpec((n, NUM_CLASSES), lambda i: (0, 0)),
    )(feat, w1, b1, w2, b2, w3, b3)


# --------------------------------- forward ----------------------------------

def _fold_input(a_nchw):
    a = jnp.transpose(a_nchw, (0, 2, 3, 1)).astype(jnp.bfloat16)   # NCHW -> NHWC
    n, h, w, c = a.shape
    return a.reshape(n, h, w * c)


def run_features(conv_params, a, H, W, C, n_img):
    li = 0
    for v in CFG:
        if v == "M":
            a = maxpool2x2(a, H, W, C)
            H //= 2
            W //= 2
        else:
            wm, bm = conv_params[li]
            li += 1
            a = conv3x3_relu(a, wm, bm, n_img)
            C = v
    return a, H, W, C


def vgg_forward(params, x_nchw, y_nchw):
    n_img, cin, s = x_nchw.shape[0], x_nchw.shape[1], x_nchw.shape[2]
    # both branches in one stack: rows [0..N) = branch X, [N..2N) = branch Y
    a = jnp.concatenate([_fold_input(x_nchw), _fold_input(y_nchw)], axis=0)
    a, hf, wf, cf = run_features(params["conv"], a, s, s, cin, n_img)

    # torch.cat((x, y), dim=1) in NCHW == channel concat in NHWC
    z = a.reshape(2, n_img, hf, wf, cf)
    z = jnp.concatenate([z[0], z[1]], axis=-1)                    # (N, hf, wf, 2*cf)
    # NCHW flatten order (c, h, w); AdaptiveAvgPool2d((7,7)) is folded into fc1's weight.
    feat = jnp.transpose(z, (0, 3, 1, 2)).reshape(n_img, 2 * cf * hf * wf)
    return classifier(params, feat)


# ------------------------------- param init ---------------------------------

def adaptive_pool_matrix(hin, win, hout=POOL_OUT, wout=POOL_OUT):
    """(hin*win, hout*wout) matrix with nn.AdaptiveAvgPool2d bin semantics."""
    P = np.zeros((hin * win, hout * wout), np.float32)
    for i in range(hout):
        h0 = (i * hin) // hout
        h1 = -((-(i + 1) * hin) // hout)
        for j in range(wout):
            w0 = (j * win) // wout
            w1 = -((-(j + 1) * win) // wout)
            area = float((h1 - h0) * (w1 - w0))
            for h in range(h0, h1):
                for w in range(w0, w1):
                    P[h * win + w, i * wout + j] = 1.0 / area
    return P


def fold_conv3x3(w_hwio, bias, width):
    """Fold a (3,3,Cin,Cout) conv weight into 3 banded matrices (one per kh tap) acting
    on the folded (H, W*Cin) layout; zero padding along W is absorbed into the band."""
    w = np.asarray(w_hwio, np.float32)
    cin, cout = w.shape[2], w.shape[3]
    m = np.zeros((3, width * cin, width * cout), np.float32)
    for kh in range(3):
        for kw in range(3):
            for wp in range(width):
                src = wp + kw - 1
                if 0 <= src < width:
                    m[kh, src * cin:(src + 1) * cin, wp * cout:(wp + 1) * cout] = w[kh, kw]
    bt = np.tile(np.asarray(bias, np.float32), width).reshape(1, width * cout)
    return jnp.asarray(m, jnp.bfloat16), jnp.asarray(bt, jnp.float32)


def init_params(key, in_ch, spatial):
    assert spatial % 16 == 0, "features[:28] has four 2x2 maxpools"
    kx, ky, k1, k2, k3 = jax.random.split(key, 5)

    def branch_raw(k):
        # conv weights come from pretrained vggX/vggY in the reference module
        # (its conv re-init is commented out); random stand-ins here.
        ws, c = [], in_ch
        for v in CFG:
            if v == "M":
                continue
            k, wk = jax.random.split(k)
            w = jax.random.normal(wk, (3, 3, c, v), jnp.float32) * np.sqrt(2.0 / (9 * c))
            ws.append((np.asarray(w), np.zeros((v,), np.float32)))
            c = v
        return ws, c

    wx, cx = branch_raw(kx)
    wy, cy = branch_raw(ky)

    conv_layers, width, li = [], spatial, 0
    for v in CFG:
        if v == "M":
            width //= 2
            continue
        mx, bx = fold_conv3x3(*wx[li], width)
        my, by = fold_conv3x3(*wy[li], width)
        conv_layers.append((jnp.stack([mx, my]), jnp.stack([bx, by])))
        li += 1

    cz = cx + cy
    sf = spatial // 16                               # feature spatial after 4 pools
    feat_dim = cz * POOL_OUT * POOL_OUT              # torch Linear in_features

    def lin(k, fin, fout):                           # nn.init.normal_(w, 0, 0.01); b = 0
        return (np.asarray(jax.random.normal(k, (fin, fout), jnp.float32)) * 0.01,
                np.zeros((fout,), np.float32))

    w1, b1 = lin(k1, feat_dim, HIDDEN)
    w2, b2 = lin(k2, HIDDEN, HIDDEN)
    w3, b3 = lin(k3, HIDDEN, NUM_CLASSES)

    # AdaptiveAvgPool2d((7,7)) is linear -> fold it into fc1's weight (exact).
    P = adaptive_pool_matrix(sf, sf)                              # (sf*sf, 49)
    w1eff = np.einsum("qp,cph->cqh", P,
                      w1.reshape(cz, POOL_OUT * POOL_OUT, HIDDEN))
    w1eff = w1eff.reshape(cz * sf * sf, HIDDEN)

    bf16 = lambda m: jnp.asarray(m, jnp.bfloat16)
    f32row = lambda b: jnp.asarray(b, jnp.float32).reshape(1, -1)
    return {
        "conv": conv_layers,
        "fc1": (bf16(w1eff), f32row(b1)),
        "fc2": (bf16(w2), f32row(b2)),
        "fc3": (bf16(w3), f32row(b3)),
    }


if __name__ == "__main__":
    key = jax.random.PRNGKey(0)
    kx, ky, kp = jax.random.split(key, 3)
    N, Cin, S = 2, 3, 32                     # NCHW inputs, PyTorch convention
    x = jax.random.normal(kx, (N, Cin, S, S), jnp.float32)
    y = jax.random.normal(ky, (N, Cin, S, S), jnp.float32)
    params = init_params(kp, Cin, S)

    fwd = jax.jit(vgg_forward)
    out = fwd(params, x, y)
    jax.block_until_ready(out)
    assert out.shape == (N, NUM_CLASSES), out.shape
    print("KERNEL_OK")
</pallas_src>

<mosaic_0001>
module attributes {stable_mosaic.version = 11 : i64} {
  func.func @conv3x3_kernel(%arg0: i32, %arg1: i32, %arg2: memref<1x32x96xbf16, #tpu.memory_space<vmem>>, %arg3: memref<1x3x96x128xbf16, #tpu.memory_space<vmem>>, %arg4: memref<1x1x128xf32, #tpu.memory_space<vmem>>, %arg5: memref<1x32x128xbf16, #tpu.memory_space<vmem>>, %arg6: memref<32x128xf32, #tpu.memory_space<vmem>>) attributes {dimension_semantics = [#tpu.dimension_semantics<parallel>, #tpu.dimension_semantics<parallel>], iteration_bounds = array<i64: 2, 2>, scalar_prefetch = 0 : i64, scratch_operands = 1 : i64, tpu.core_type = #tpu.core_type<tc>, window_params = [{transform_indices = @transform_0, window_bounds = array<i64: 1, 32, 96>}, {transform_indices = @transform_1, window_bounds = array<i64: 1, 3, 96, 128>}, {transform_indices = @transform_2, window_bounds = array<i64: 1, 1, 128>}, {transform_indices = @transform_3, window_bounds = array<i64: 1, 32, 128>}]} {
    %c0 = arith.constant 0 : index
    %c0_0 = arith.constant 0 : index
    %c0_1 = arith.constant 0 : index
    %0 = vector.load %arg2[%c0, %c0_0, %c0_1] : memref<1x32x96xbf16, #tpu.memory_space<vmem>>, vector<1x32x96xbf16>
    %1 = vector.shape_cast %0 : vector<1x32x96xbf16> to vector<32x96xbf16>
    %c0_2 = arith.constant 0 : index
    %c1 = arith.constant 1 : index
    %c0_3 = arith.constant 0 : index
    %c0_4 = arith.constant 0 : index
    %2 = vector.load %arg3[%c0_2, %c1, %c0_3, %c0_4] : memref<1x3x96x128xbf16, #tpu.memory_space<vmem>>, vector<1x1x96x128xbf16>
    %3 = vector.shape_cast %2 : vector<1x1x96x128xbf16> to vector<96x128xbf16>
    %cst = arith.constant dense<0.000000e+00> : vector<32x128xf32>
    %4 = tpu.matmul %1, %3, %cst {dimension_numbers = #tpu.dot_dimension_numbers<[1], [0], [0], [1], [0, 0, 1, 1], [], []>} : vector<32x96xbf16>, vector<96x128xbf16>, vector<32x128xf32> -> vector<32x128xf32>
    %c0_5 = arith.constant 0 : index
    %c0_6 = arith.constant 0 : index
    %5 = vector.load %arg6[%c0_5, %c0_6] : memref<32x128xf32, #tpu.memory_space<vmem>>, vector<32x128xf32>
    tpu.vector_store %arg6[%c0_5, %c0_6], %4 {strides = array<i32>} : memref<32x128xf32, #tpu.memory_space<vmem>>, vector<32x128xf32>,
    %c1_7 = arith.constant 1 : index
    %c0_8 = arith.constant 0 : index
    %6 = vector.load %arg6[%c1_7, %c0_8] : memref<32x128xf32, #tpu.memory_space<vmem>>, vector<31x128xf32>
    %7 = vector.extract_strided_slice %1 {offsets = [0, 0], sizes = [31, 96], strides = [1, 1]} : vector<32x96xbf16> to vector<31x96xbf16>
    %c0_9 = arith.constant 0 : index
    %c0_10 = arith.constant 0 : index
    %c0_11 = arith.constant 0 : index
    %c0_12 = arith.constant 0 : index
    %8 = vector.load %arg3[%c0_9, %c0_10, %c0_11, %c0_12] : memref<1x3x96x128xbf16, #tpu.memory_space<vmem>>, vector<1x1x96x128xbf16>
    %9 = vector.shape_cast %8 : vector<1x1x96x128xbf16> to vector<96x128xbf16>
    %cst_13 = arith.constant dense<0.000000e+00> : vector<31x128xf32>
    %10 = tpu.matmul %7, %9, %cst_13 {dimension_numbers = #tpu.dot_dimension_numbers<[1], [0], [0], [1], [0, 0, 1, 1], [], []>} : vector<31x96xbf16>, vector<96x128xbf16>, vector<31x128xf32> -> vector<31x128xf32>
    %11 = arith.addf %6, %10 : vector<31x128xf32>
    %c1_14 = arith.constant 1 : index
    %c0_15 = arith.constant 0 : index
    %12 = vector.load %arg6[%c1_14, %c0_15] : memref<32x128xf32, #tpu.memory_space<vmem>>, vector<31x128xf32>
    tpu.vector_store %arg6[%c1_14, %c0_15], %11 {strides = array<i32>} : memref<32x128xf32, #tpu.memory_space<vmem>>, vector<31x128xf32>,
    %c0_16 = arith.constant 0 : index
    %c0_17 = arith.constant 0 : index
    %13 = vector.load %arg6[%c0_16, %c0_17] : memref<32x128xf32, #tpu.memory_space<vmem>>, vector<31x128xf32>
    %14 = vector.extract_strided_slice %1 {offsets = [1, 0], sizes = [31, 96], strides = [1, 1]} : vector<32x96xbf16> to vector<31x96xbf16>
    %c0_18 = arith.constant 0 : index
    %c2 = arith.constant 2 : index
    %c0_19 = arith.constant 0 : index
    %c0_20 = arith.constant 0 : index
    %15 = vector.load %arg3[%c0_18, %c2, %c0_19, %c0_20] : memref<1x3x96x128xbf16, #tpu.memory_space<vmem>>, vector<1x1x96x128xbf16>
    %16 = vector.shape_cast %15 : vector<1x1x96x128xbf16> to vector<96x128xbf16>
    %cst_21 = arith.constant dense<0.000000e+00> : vector<31x128xf32>
    %17 = tpu.matmul %14, %16, %cst_21 {dimension_numbers = #tpu.dot_dimension_numbers<[1], [0], [0], [1], [0, 0, 1, 1], [], []>} : vector<31x96xbf16>, vector<96x128xbf16>, vector<31x128xf32> -> vector<31x128xf32>
    %18 = arith.addf %13, %17 : vector<31x128xf32>
    %c0_22 = arith.constant 0 : index
    %c0_23 = arith.constant 0 : index
    %19 = vector.load %arg6[%c0_22, %c0_23] : memref<32x128xf32, #tpu.memory_space<vmem>>, vector<31x128xf32>
    tpu.vector_store %arg6[%c0_22, %c0_23], %18 {strides = array<i32>} : memref<32x128xf32, #tpu.memory_space<vmem>>, vector<31x128xf32>,
    %c0_24 = arith.constant 0 : index
    %c0_25 = arith.constant 0 : index
    %20 = vector.load %arg6[%c0_24, %c0_25] : memref<32x128xf32, #tpu.memory_space<vmem>>, vector<32x128xf32>
    %c0_26 = arith.constant 0 : index
    %c0_27 = arith.constant 0 : index
    %c0_28 = arith.constant 0 : index
    %21 = vector.load %arg4[%c0_26, %c0_27, %c0_28] : memref<1x1x128xf32, #tpu.memory_space<vmem>>, vector<1x1x128xf32>
    %22 = vector.shape_cast %21 : vector<1x1x128xf32> to vector<1x128xf32>
    %23 = vector.broadcast %22 : vector<1x128xf32> to vector<32x128xf32>
    %24 = arith.addf %20, %23 : vector<32x128xf32>
    %cst_29 = arith.constant 0.000000e+00 : f32
    %25 = vector.broadcast %cst_29 : f32 to vector<32x128xf32>
    %26 = arith.maximumf %24, %25 : vector<32x128xf32>
    %27 = arith.truncf %26 : vector<32x128xf32> to vector<32x128xbf16>
    %c0_30 = arith.constant 0 : index
    %c0_31 = arith.constant 0 : index
    %c0_32 = arith.constant 0 : index
    %28 = vector.load %arg5[%c0_30, %c0_31, %c0_32] : memref<1x32x128xbf16, #tpu.memory_space<vmem>>, vector<1x32x128xbf16>
    %29 = vector.shape_cast %28 : vector<1x32x128xbf16> to vector<32x128xbf16>
    %30 = vector.shape_cast %27 : vector<32x128xbf16> to vector<1x32x128xbf16>
    tpu.vector_store %arg5[%c0_30, %c0_31, %c0_32], %30 {strides = array<i32>} : memref<1x32x128xbf16, #tpu.memory_space<vmem>>, vector<1x32x128xbf16>,
    return
  }
  func.func @transform_0(%arg0: i32, %arg1: i32) -> (i32, i32, i32) {
    %c2_i32 = arith.constant 2 : i32
    %0 = arith.muli %arg0, %c2_i32 : i32
    %1 = arith.addi %0, %arg1 : i32
    %c0_i32 = arith.constant 0 : i32
    %c0_i32_0 = arith.constant 0 : i32
    %c0_i32_1 = arith.constant 0 : i32
    return %1, %c0_i32, %c0_i32_0 : i32, i32, i32
  }
  func.func @transform_1(%arg0: i32, %arg1: i32) -> (i32, i32, i32, i32) {
    %c0_i32 = arith.constant 0 : i32
    %c0_i32_0 = arith.constant 0 : i32
    %c0_i32_1 = arith.constant 0 : i32
    %c0_i32_2 = arith.constant 0 : i32
    return %arg0, %c0_i32, %c0_i32_0, %c0_i32_1 : i32, i32, i32, i32
  }
  func.func @transform_2(%arg0: i32, %arg1: i32) -> (i32, i32, i32) {
    %c0_i32 = arith.constant 0 : i32
    %c0_i32_0 = arith.constant 0 : i32
    %c0_i32_1 = arith.constant 0 : i32
    return %arg0, %c0_i32, %c0_i32_0 : i32, i32, i32
  }
  func.func @transform_3(%arg0: i32, %arg1: i32) -> (i32, i32, i32) {
    %c2_i32 = arith.constant 2 : i32
    %0 = arith.muli %arg0, %c2_i32 : i32
    %1 = arith.addi %0, %arg1 : i32
    %c0_i32 = arith.constant 0 : i32
    %c0_i32_0 = arith.constant 0 : i32
    %c0_i32_1 = arith.constant 0 : i32
    return %1, %c0_i32, %c0_i32_0 : i32, i32, i32
  }
}

module attributes {stable_mosaic.version = 11 : i64} {
  func.func @conv3x3_kernel(%arg0: i32, %arg1: i32, %arg2: memref<1x32x128xbf16, #tpu.memory_space<vmem>>, %arg3: memref<1x3x128x128xbf16, #tpu.memory_space<vmem>>, %arg4: memref<1x1x128xf32, #tpu.memory_space<vmem>>, %arg5: memref<1x32x128xbf16, #tpu.memory_space<vmem>>, %arg6: memref<32x128xf32, #tpu.memory_space<vmem>>) attributes {dimension_semantics = [#tpu.dimension_semantics<parallel>, #tpu.dimension_semantics<parallel>], iteration_bounds = array<i64: 2, 2>, scalar_prefetch = 0 : i64, scratch_operands = 1 : i64, tpu.core_type = #tpu.core_type<tc>, window_params = [{transform_indices = @transform_0, window_bounds = array<i64: 1, 32, 128>}, {transform_indices = @transform_1, window_bounds = array<i64: 1, 3, 128, 128>}, {transform_indices = @transform_2, window_bounds = array<i64: 1, 1, 128>}, {transform_indices = @transform_3, window_bounds = array<i64: 1, 32, 128>}]} {
    %c0 = arith.constant 0 : index
    %c0_0 = arith.constant 0 : index
    %c0_1 = arith.constant 0 : index
    %0 = vector.load %arg2[%c0, %c0_0, %c0_1] : memref<1x32x128xbf16, #tpu.memory_space<vmem>>, vector<1x32x128xbf16>
    %1 = vector.shape_cast %0 : vector<1x32x128xbf16> to vector<32x128xbf16>
    %c0_2 = arith.constant 0 : index
    %c1 = arith.constant 1 : index
    %c0_3 = arith.constant 0 : index
    %c0_4 = arith.constant 0 : index
    %2 = vector.load %arg3[%c0_2, %c1, %c0_3, %c0_4] : memref<1x3x128x128xbf16, #tpu.memory_space<vmem>>, vector<1x1x128x128xbf16>
    %3 = vector.shape_cast %2 : vector<1x1x128x128xbf16> to vector<128x128xbf16>
    %cst = arith.constant dense<0.000000e+00> : vector<32x128xf32>
    %4 = tpu.matmul %1, %3, %cst {dimension_numbers = #tpu.dot_dimension_numbers<[1], [0], [0], [1], [0, 0, 1, 1], [], []>} : vector<32x128xbf16>, vector<128x128xbf16>, vector<32x128xf32> -> vector<32x128xf32>
    %c0_5 = arith.constant 0 : index
    %c0_6 = arith.constant 0 : index
    %5 = vector.load %arg6[%c0_5, %c0_6] : memref<32x128xf32, #tpu.memory_space<vmem>>, vector<32x128xf32>
    tpu.vector_store %arg6[%c0_5, %c0_6], %4 {strides = array<i32>} : memref<32x128xf32, #tpu.memory_space<vmem>>, vector<32x128xf32>,
    %c1_7 = arith.constant 1 : index
    %c0_8 = arith.constant 0 : index
    %6 = vector.load %arg6[%c1_7, %c0_8] : memref<32x128xf32, #tpu.memory_space<vmem>>, vector<31x128xf32>
    %7 = vector.extract_strided_slice %1 {offsets = [0, 0], sizes = [31, 128], strides = [1, 1]} : vector<32x128xbf16> to vector<31x128xbf16>
    %c0_9 = arith.constant 0 : index
    %c0_10 = arith.constant 0 : index
    %c0_11 = arith.constant 0 : index
    %c0_12 = arith.constant 0 : index
    %8 = vector.load %arg3[%c0_9, %c0_10, %c0_11, %c0_12] : memref<1x3x128x128xbf16, #tpu.memory_space<vmem>>, vector<1x1x128x128xbf16>
    %9 = vector.shape_cast %8 : vector<1x1x128x128xbf16> to vector<128x128xbf16>
    %cst_13 = arith.constant dense<0.000000e+00> : vector<31x128xf32>
    %10 = tpu.matmul %7, %9, %cst_13 {dimension_numbers = #tpu.dot_dimension_numbers<[1], [0], [0], [1], [0, 0, 1, 1], [], []>} : vector<31x128xbf16>, vector<128x128xbf16>, vector<31x128xf32> -> vector<31x128xf32>
    %11 = arith.addf %6, %10 : vector<31x128xf32>
    %c1_14 = arith.constant 1 : index
    %c0_15 = arith.constant 0 : index
    %12 = vector.load %arg6[%c1_14, %c0_15] : memref<32x128xf32, #tpu.memory_space<vmem>>, vector<31x128xf32>
    tpu.vector_store %arg6[%c1_14, %c0_15], %11 {strides = array<i32>} : memref<32x128xf32, #tpu.memory_space<vmem>>, vector<31x128xf32>,
    %c0_16 = arith.constant 0 : index
    %c0_17 = arith.constant 0 : index
    %13 = vector.load %arg6[%c0_16, %c0_17] : memref<32x128xf32, #tpu.memory_space<vmem>>, vector<31x128xf32>
    %14 = vector.extract_strided_slice %1 {offsets = [1, 0], sizes = [31, 128], strides = [1, 1]} : vector<32x128xbf16> to vector<31x128xbf16>
    %c0_18 = arith.constant 0 : index
    %c2 = arith.constant 2 : index
    %c0_19 = arith.constant 0 : index
    %c0_20 = arith.constant 0 : index
    %15 = vector.load %arg3[%c0_18, %c2, %c0_19, %c0_20] : memref<1x3x128x128xbf16, #tpu.memory_space<vmem>>, vector<1x1x128x128xbf16>
    %16 = vector.shape_cast %15 : vector<1x1x128x128xbf16> to vector<128x128xbf16>
    %cst_21 = arith.constant dense<0.000000e+00> : vector<31x128xf32>
    %17 = tpu.matmul %14, %16, %cst_21 {dimension_numbers = #tpu.dot_dimension_numbers<[1], [0], [0], [1], [0, 0, 1, 1], [], []>} : vector<31x128xbf16>, vector<128x128xbf16>, vector<31x128xf32> -> vector<31x128xf32>
    %18 = arith.addf %13, %17 : vector<31x128xf32>
    %c0_22 = arith.constant 0 : index
    %c0_23 = arith.constant 0 : index
    %19 = vector.load %arg6[%c0_22, %c0_23] : memref<32x128xf32, #tpu.memory_space<vmem>>, vector<31x128xf32>
    tpu.vector_store %arg6[%c0_22, %c0_23], %18 {strides = array<i32>} : memref<32x128xf32, #tpu.memory_space<vmem>>, vector<31x128xf32>,
    %c0_24 = arith.constant 0 : index
    %c0_25 = arith.constant 0 : index
    %20 = vector.load %arg6[%c0_24, %c0_25] : memref<32x128xf32, #tpu.memory_space<vmem>>, vector<32x128xf32>
    %c0_26 = arith.constant 0 : index
    %c0_27 = arith.constant 0 : index
    %c0_28 = arith.constant 0 : index
    %21 = vector.load %arg4[%c0_26, %c0_27, %c0_28] : memref<1x1x128xf32, #tpu.memory_space<vmem>>, vector<1x1x128xf32>
    %22 = vector.shape_cast %21 : vector<1x1x128xf32> to vector<1x128xf32>
    %23 = vector.broadcast %22 : vector<1x128xf32> to vector<32x128xf32>
    %24 = arith.addf %20, %23 : vector<32x128xf32>
    %cst_29 = arith.constant 0.000000e+00 : f32
    %25 = vector.broadcast %cst_29 : f32 to vector<32x128xf32>
    %26 = arith.maximumf %24, %25 : vector<32x128xf32>
    %27 = arith.truncf %26 : vector<32x128xf32> to vector<32x128xbf16>
    %c0_30 = arith.constant 0 : index
    %c0_31 = arith.constant 0 : index
    %c0_32 = arith.constant 0 : index
    %28 = vector.load %arg5[%c0_30, %c0_31, %c0_32] : memref<1x32x128xbf16, #tpu.memory_space<vmem>>, vector<1x32x128xbf16>
    %29 = vector.shape_cast %28 : vector<1x32x128xbf16> to vector<32x128xbf16>
    %30 = vector.shape_cast %27 : vector<32x128xbf16> to vector<1x32x128xbf16>
    tpu.vector_store %arg5[%c0_30, %c0_31, %c0_32], %30 {strides = array<i32>} : memref<1x32x128xbf16, #tpu.memory_space<vmem>>, vector<1x32x128xbf16>,
    return
  }
  func.func @transform_0(%arg0: i32, %arg1: i32) -> (i32, i32, i32) {
    %c2_i32 = arith.constant 2 : i32
    %0 = arith.muli %arg0, %c2_i32 : i32
    %1 = arith.addi %0, %arg1 : i32
    %c0_i32 = arith.constant 0 : i32
    %c0_i32_0 = arith.constant 0 : i32
    %c0_i32_1 = arith.constant 0 : i32
    return %1, %c0_i32, %c0_i32_0 : i32, i32, i32
  }
  func.func @transform_1(%arg0: i32, %arg1: i32) -> (i32, i32, i32, i32) {
    %c0_i32 = arith.constant 0 : i32
    %c0_i32_0 = arith.constant 0 : i32
    %c0_i32_1 = arith.constant 0 : i32
    %c0_i32_2 = arith.constant 0 : i32
    return %arg0, %c0_i32, %c0_i32_0, %c0_i32_1 : i32, i32, i32, i32
  }
  func.func @transform_2(%arg0: i32, %arg1: i32) -> (i32, i32, i32) {
    %c0_i32 = arith.constant 0 : i32
    %c0_i32_0 = arith.constant 0 : i32
    %c0_i32_1 = arith.constant 0 : i32
    return %arg0, %c0_i32, %c0_i32_0 : i32, i32, i32
  }
  func.func @transform_3(%arg0: i32, %arg1: i32) -> (i32, i32, i32) {
    %c2_i32 = arith.constant 2 : i32
    %0 = arith.muli %arg0, %c2_i32 : i32
    %1 = arith.addi %0, %arg1 : i32
    %c0_i32 = arith.constant 0 : i32
    %c0_i32_0 = arith.constant 0 : i32
    %c0_i32_1 = arith.constant 0 : i32
    return %1, %c0_i32, %c0_i32_0 : i32, i32, i32
  }
}

module attributes {stable_mosaic.version = 11 : i64} {
  func.func @maxpool2x2_kernel(%arg0: i32, %arg1: memref<1x32x16x8xbf16, #tpu.memory_space<vmem>>, %arg2: memref<1x16x16x4xbf16, #tpu.memory_space<vmem>>) attributes {dimension_semantics = [#tpu.dimension_semantics<parallel>], iteration_bounds = array<i64: 4>, scalar_prefetch = 0 : i64, scratch_operands = 0 : i64, tpu.core_type = #tpu.core_type<tc>, window_params = [{transform_indices = @transform_0, window_bounds = array<i64: 1, 32, 16, 8>}, {transform_indices = @transform_1, window_bounds = array<i64: 1, 16, 16, 4>}]} {
    %c0 = arith.constant 0 : index
    %c0_0 = arith.constant 0 : index
    %c0_1 = arith.constant 0 : index
    %c0_2 = arith.constant 0 : index
    %0 = vector.load %arg1[%c0, %c0_0, %c0_1, %c0_2] : memref<1x32x16x8xbf16, #tpu.memory_space<vmem>>, vector<1x1x16x8xbf16>
    %1 = vector.shape_cast %0 : vector<1x1x16x8xbf16> to vector<16x8xbf16>
    %c0_3 = arith.constant 0 : index
    %c1 = arith.constant 1 : index
    %c0_4 = arith.constant 0 : index
    %c0_5 = arith.constant 0 : index
    %2 = vector.load %arg1[%c0_3, %c1, %c0_4, %c0_5] : memref<1x32x16x8xbf16, #tpu.memory_space<vmem>>, vector<1x1x16x8xbf16>
    %3 = vector.shape_cast %2 : vector<1x1x16x8xbf16> to vector<16x8xbf16>
    %4 = arith.maximumf %1, %3 : vector<16x8xbf16>
    %5 = vector.extract_strided_slice %4 {offsets = [0, 0], sizes = [16, 4], strides = [1, 1]} : vector<16x8xbf16> to vector<16x4xbf16>
    %6 = vector.extract_strided_slice %4 {offsets = [0, 4], sizes = [16, 4], strides = [1, 1]} : vector<16x8xbf16> to vector<16x4xbf16>
    %7 = arith.maximumf %5, %6 : vector<16x4xbf16>
    %c0_6 = arith.constant 0 : index
    %c0_7 = arith.constant 0 : index
    %c0_8 = arith.constant 0 : index
    %c0_9 = arith.constant 0 : index
    %8 = vector.load %arg2[%c0_6, %c0_7, %c0_8, %c0_9] : memref<1x16x16x4xbf16, #tpu.memory_space<vmem>>, vector<1x1x16x4xbf16>
    %9 = vector.shape_cast %8 : vector<1x1x16x4xbf16> to vector<16x4xbf16>
    %10 = vector.shape_cast %7 : vector<16x4xbf16> to vector<1x1x16x4xbf16>
    tpu.vector_store %arg2[%c0_6, %c0_7, %c0_8, %c0_9], %10 {strides = array<i32>} : memref<1x16x16x4xbf16, #tpu.memory_space<vmem>>, vector<1x1x16x4xbf16>,
    %c0_10 = arith.constant 0 : index
    %c2 = arith.constant 2 : index
    %c0_11 = arith.constant 0 : index
    %c0_12 = arith.constant 0 : index
    %11 = vector.load %arg1[%c0_10, %c2, %c0_11, %c0_12] : memref<1x32x16x8xbf16, #tpu.memory_space<vmem>>, vector<1x1x16x8xbf16>
    %12 = vector.shape_cast %11 : vector<1x1x16x8xbf16> to vector<16x8xbf16>
    %c0_13 = arith.constant 0 : index
    %c3 = arith.constant 3 : index
    %c0_14 = arith.constant 0 : index
    %c0_15 = arith.constant 0 : index
    %13 = vector.load %arg1[%c0_13, %c3, %c0_14, %c0_15] : memref<1x32x16x8xbf16, #tpu.memory_space<vmem>>, vector<1x1x16x8xbf16>
    %14 = vector.shape_cast %13 : vector<1x1x16x8xbf16> to vector<16x8xbf16>
    %15 = arith.maximumf %12, %14 : vector<16x8xbf16>
    %16 = vector.extract_strided_slice %15 {offsets = [0, 0], sizes = [16, 4], strides = [1, 1]} : vector<16x8xbf16> to vector<16x4xbf16>
    %17 = vector.extract_strided_slice %15 {offsets = [0, 4], sizes = [16, 4], strides = [1, 1]} : vector<16x8xbf16> to vector<16x4xbf16>
    %18 = arith.maximumf %16, %17 : vector<16x4xbf16>
    %c0_16 = arith.constant 0 : index
    %c1_17 = arith.constant 1 : index
    %c0_18 = arith.constant 0 : index
    %c0_19 = arith.constant 0 : index
    %19 = vector.load %arg2[%c0_16, %c1_17, %c0_18, %c0_19] : memref<1x16x16x4xbf16, #tpu.memory_space<vmem>>, vector<1x1x16x4xbf16>
    %20 = vector.shape_cast %19 : vector<1x1x16x4xbf16> to vector<16x4xbf16>
    %21 = vector.shape_cast %18 : vector<16x4xbf16> to vector<1x1x16x4xbf16>
    tpu.vector_store %arg2[%c0_16, %c1_17, %c0_18, %c0_19], %21 {strides = array<i32>} : memref<1x16x16x4xbf16, #tpu.memory_space<vmem>>, vector<1x1x16x4xbf16>,
    %c0_20 = arith.constant 0 : index
    %c4 = arith.constant 4 : index
    %c0_21 = arith.constant 0 : index
    %c0_22 = arith.constant 0 : index
    %22 = vector.load %arg1[%c0_20, %c4, %c0_21, %c0_22] : memref<1x32x16x8xbf16, #tpu.memory_space<vmem>>, vector<1x1x16x8xbf16>
    %23 = vector.shape_cast %22 : vector<1x1x16x8xbf16> to vector<16x8xbf16>
    %c0_23 = arith.constant 0 : index
    %c5 = arith.constant 5 : index
    %c0_24 = arith.constant 0 : index
    %c0_25 = arith.constant 0 : index
    %24 = vector.load %arg1[%c0_23, %c5, %c0_24, %c0_25] : memref<1x32x16x8xbf16, #tpu.memory_space<vmem>>, vector<1x1x16x8xbf16>
    %25 = vector.shape_cast %24 : vector<1x1x16x8xbf16> to vector<16x8xbf16>
    %26 = arith.maximumf %23, %25 : vector<16x8xbf16>
    %27 = vector.extract_strided_slice %26 {offsets = [0, 0], sizes = [16, 4], strides = [1, 1]} : vector<16x8xbf16> to vector<16x4xbf16>
    %28 = vector.extract_strided_slice %26 {offsets = [0, 4], sizes = [16, 4], strides = [1, 1]} : vector<16x8xbf16> to vector<16x4xbf16>
    %29 = arith.maximumf %27, %28 : vector<16x4xbf16>
    %c0_26 = arith.constant 0 : index
    %c2_27 = arith.constant 2 : index
    %c0_28 = arith.constant 0 : index
    %c0_29 = arith.constant 0 : index
    %30 = vector.load %arg2[%c0_26, %c2_27, %c0_28, %c0_29] : memref<1x16x16x4xbf16, #tpu.memory_space<vmem>>, vector<1x1x16x4xbf16>
    %31 = vector.shape_cast %30 : vector<1x1x16x4xbf16> to vector<16x4xbf16>
    %32 = vector.shape_cast %29 : vector<16x4xbf16> to vector<1x1x16x4xbf16>
    tpu.vector_store %arg2[%c0_26, %c2_27, %c0_28, %c0_29], %32 {strides = array<i32>} : memref<1x16x16x4xbf16, #tpu.memory_space<vmem>>, vector<1x1x16x4xbf16>,
    %c0_30 = arith.constant 0 : index
    %c6 = arith.constant 6 : index
    %c0_31 = arith.constant 0 : index
    %c0_32 = arith.constant 0 : index
    %33 = vector.load %arg1[%c0_30, %c6, %c0_31, %c0_32] : memref<1x32x16x8xbf16, #tpu.memory_space<vmem>>, vector<1x1x16x8xbf16>
    %34 = vector.shape_cast %33 : vector<1x1x16x8xbf16> to vector<16x8xbf16>
    %c0_33 = arith.constant 0 : index
    %c7 = arith.constant 7 : index
    %c0_34 = arith.constant 0 : index
    %c0_35 = arith.constant 0 : index
    %35 = vector.load %arg1[%c0_33, %c7, %c0_34, %c0_35] : memref<1x32x16x8xbf16, #tpu.memory_space<vmem>>, vector<1x1x16x8xbf16>
    %36 = vector.shape_cast %35 : vector<1x1x16x8xbf16> to vector<16x8xbf16>
    %37 = arith.maximumf %34, %36 : vector<16x8xbf16>
    %38 = vector.extract_strided_slice %37 {offsets = [0, 0], sizes = [16, 4], strides = [1, 1]} : vector<16x8xbf16> to vector<16x4xbf16>
    %39 = vector.extract_strided_slice %37 {offsets = [0, 4], sizes = [16, 4], strides = [1, 1]} : vector<16x8xbf16> to vector<16x4xbf16>
    %40 = arith.maximumf %38, %39 : vector<16x4xbf16>
    %c0_36 = arith.constant 0 : index
    %c3_37 = arith.constant 3 : index
    %c0_38 = arith.constant 0 : index
    %c0_39 = arith.constant 0 : index
    %41 = vector.load %arg2[%c0_36, %c3_37, %c0_38, %c0_39] : memref<1x16x16x4xbf16, #tpu.memory_space<vmem>>, vector<1x1x16x4xbf16>
    %42 = vector.shape_cast %41 : vector<1x1x16x4xbf16> to vector<16x4xbf16>
    %43 = vector.shape_cast %40 : vector<16x4xbf16> to vector<1x1x16x4xbf16>
    tpu.vector_store %arg2[%c0_36, %c3_37, %c0_38, %c0_39], %43 {strides = array<i32>} : memref<1x16x16x4xbf16, #tpu.memory_space<vmem>>, vector<1x1x16x4xbf16>,
    %c0_40 = arith.constant 0 : index
    %c8 = arith.constant 8 : index
    %c0_41 = arith.constant 0 : index
    %c0_42 = arith.constant 0 : index
    %44 = vector.load %arg1[%c0_40, %c8, %c0_41, %c0_42] : memref<1x32x16x8xbf16, #tpu.memory_space<vmem>>, vector<1x1x16x8xbf16>
    %45 = vector.shape_cast %44 : vector<1x1x16x8xbf16> to vector<16x8xbf16>
    %c0_43 = arith.constant 0 : index
    %c9 = arith.constant 9 : index
    %c0_44 = arith.constant 0 : index
    %c0_45 = arith.constant 0 : index
    %46 = vector.load %arg1[%c0_43, %c9, %c0_44, %c0_45] : memref<1x32x16x8xbf16, #tpu.memory_space<vmem>>, vector<1x1x16x8xbf16>
    %47 = vector.shape_cast %46 : vector<1x1x16x8xbf16> to vector<16x8xbf16>
    %48 = arith.maximumf %45, %47 : vector<16x8xbf16>
    %49 = vector.extract_strided_slice %48 {offsets = [0, 0], sizes = [16, 4], strides = [1, 1]} : vector<16x8xbf16> to vector<16x4xbf16>
    %50 = vector.extract_strided_slice %48 {offsets = [0, 4], sizes = [16, 4], strides = [1, 1]} : vector<16x8xbf16> to vector<16x4xbf16>
    %51 = arith.maximumf %49, %50 : vector<16x4xbf16>
    %c0_46 = arith.constant 0 : index
    %c4_47 = arith.constant 4 : index
    %c0_48 = arith.constant 0 : index
    %c0_49 = arith.constant 0 : index
    %52 = vector.load %arg2[%c0_46, %c4_47, %c0_48, %c0_49] : memref<1x16x16x4xbf16, #tpu.memory_space<vmem>>, vector<1x1x16x4xbf16>
    %53 = vector.shape_cast %52 : vector<1x1x16x4xbf16> to vector<16x4xbf16>
    %54 = vector.shape_cast %51 : vector<16x4xbf16> to vector<1x1x16x4xbf16>
    tpu.vector_store %arg2[%c0_46, %c4_47, %c0_48, %c0_49], %54 {strides = array<i32>} : memref<1x16x16x4xbf16, #tpu.memory_space<vmem>>, vector<1x1x16x4xbf16>,
    %c0_50 = arith.constant 0 : index
    %c10 = arith.constant 10 : index
    %c0_51 = arith.constant 0 : index
    %c0_52 = arith.constant 0 : index
    %55 = vector.load %arg1[%c0_50, %c10, %c0_51, %c0_52] : memref<1x32x16x8xbf16, #tpu.memory_space<vmem>>, vector<1x1x16x8xbf16>
    %56 = vector.shape_cast %55 : vector<1x1x16x8xbf16> to vector<16x8xbf16>
    %c0_53 = arith.constant 0 : index
    %c11 = arith.constant 11 : index
    %c0_54 = arith.constant 0 : index
    %c0_55 = arith.constant 0 : index
    %57 = vector.load %arg1[%c0_53, %c11, %c0_54, %c0_55] : memref<1x32x16x8xbf16, #tpu.memory_space<vmem>>, vector<1x1x16x8xbf16>
    %58 = vector.shape_cast %57 : vector<1x1x16x8xbf16> to vector<16x8xbf16>
    %59 = arith.maximumf %56, %58 : vector<16x8xbf16>
    %60 = vector.extract_strided_slice %59 {offsets = [0, 0], sizes = [16, 4], strides = [1, 1]} : vector<16x8xbf16> to vector<16x4xbf16>
    %61 = vector.extract_strided_slice %59 {offsets = [0, 4], sizes = [16, 4], strides = [1, 1]} : vector<16x8xbf16> to vector<16x4xbf16>
    %62 = arith.maximumf %60, %61 : vector<16x4xbf16>
    %c0_56 = arith.constant 0 : index
    %c5_57 = arith.constant 5 : index
    %c0_58 = arith.constant 0 : index
    %c0_59 = arith.constant 0 : index
    %63 = vector.load %arg2[%c0_56, %c5_57, %c0_58, %c0_59] : memref<1x16x16x4xbf16, #tpu.memory_space<vmem>>, vector<1x1x16x4xbf16>
    %64 = vector.shape_cast %63 : vector<1x1x16x4xbf16> to vector<16x4xbf16>
    %65 = vector.shape_cast %62 : vector<16x4xbf16> to vector<1x1x16x4xbf16>
    tpu.vector_store %arg2[%c0_56, %c5_57, %c0_58, %c0_59], %65 {strides = array<i32>} : memref<1x16x16x4xbf16, #tpu.memory_space<vmem>>, vector<1x1x16x4xbf16>,
    %c0_60 = arith.constant 0 : index
    %c12 = arith.constant 12 : index
    %c0_61 = arith.constant 0 : index
    %c0_62 = arith.constant 0 : index
    %66 = vector.load %arg1[%c0_60, %c12, %c0_61, %c0_62] : memref<1x32x16x8xbf16, #tpu.memory_space<vmem>>, vector<1x1x16x8xbf16>
    %67 = vector.shape_cast %66 : vector<1x1x16x8xbf16> to vector<16x8xbf16>
    %c0_63 = arith.constant 0 : index
    %c13 = arith.constant 13 : index
    %c0_64 = arith.constant 0 : index
    %c0_65 = arith.constant 0 : index
    %68 = vector.load %arg1[%c0_63, %c13, %c0_64, %c0_65] : memref<1x32x16x8xbf16, #tpu.memory_space<vmem>>, vector<1x1x16x8xbf16>
    %69 = vector.shape_cast %68 : vector<1x1x16x8xbf16> to vector<16x8xbf16>
    %70 = arith.maximumf %67, %69 : vector<16x8xbf16>
    %71 = vector.extract_strided_slice %70 {offsets = [0, 0], sizes = [16, 4], strides = [1, 1]} : vector<16x8xbf16> to vector<16x4xbf16>
    %72 = vector.extract_strided_slice %70 {offsets = [0, 4], sizes = [16, 4], strides = [1, 1]} : vector<16x8xbf16> to vector<16x4xbf16>
    %73 = arith.maximumf %71, %72 : vector<16x4xbf16>
    %c0_66 = arith.constant 0 : index
    %c6_67 = arith.constant 6 : index
    %c0_68 = arith.constant 0 : index
    %c0_69 = arith.constant 0 : index
    %74 = vector.load %arg2[%c0_66, %c6_67, %c0_68, %c0_69] : memref<1x16x16x4xbf16, #tpu.memory_space<vmem>>, vector<1x1x16x4xbf16>
    %75 = vector.shape_cast %74 : vector<1x1x16x4xbf16> to vector<16x4xbf16>
    %76 = vector.shape_cast %73 : vector<16x4xbf16> to vector<1x1x16x4xbf16>
    tpu.vector_store %arg2[%c0_66, %c6_67, %c0_68, %c0_69], %76 {strides = array<i32>} : memref<1x16x16x4xbf16, #tpu.memory_space<vmem>>, vector<1x1x16x4xbf16>,
    %c0_70 = arith.constant 0 : index
    %c14 = arith.constant 14 : index
    %c0_71 = arith.constant 0 : index
    %c0_72 = arith.constant 0 : index
    %77 = vector.load %arg1[%c0_70, %c14, %c0_71, %c0_72] : memref<1x32x16x8xbf16, #tpu.memory_space<vmem>>, vector<1x1x16x8xbf16>
    %78 = vector.shape_cast %77 : vector<1x1x16x8xbf16> to vector<16x8xbf16>
    %c0_73 = arith.constant 0 : index
    %c15 = arith.constant 15 : index
    %c0_74 = arith.constant 0 : index
    %c0_75 = arith.constant 0 : index
    %79 = vector.load %arg1[%c0_73, %c15, %c0_74, %c0_75] : memref<1x32x16x8xbf16, #tpu.memory_space<vmem>>, vector<1x1x16x8xbf16>
    %80 = vector.shape_cast %79 : vector<1x1x16x8xbf16> to vector<16x8xbf16>
    %81 = arith.maximumf %78, %80 : vector<16x8xbf16>
    %82 = vector.extract_strided_slice %81 {offsets = [0, 0], sizes = [16, 4], strides = [1, 1]} : vector<16x8xbf16> to vector<16x4xbf16>
    %83 = vector.extract_strided_slice %81 {offsets = [0, 4], sizes = [16, 4], strides = [1, 1]} : vector<16x8xbf16> to vector<16x4xbf16>
    %84 = arith.maximumf %82, %83 : vector<16x4xbf16>
    %c0_76 = arith.constant 0 : index
    %c7_77 = arith.constant 7 : index
    %c0_78 = arith.constant 0 : index
    %c0_79 = arith.constant 0 : index
    %85 = vector.load %arg2[%c0_76, %c7_77, %c0_78, %c0_79] : memref<1x16x16x4xbf16, #tpu.memory_space<vmem>>, vector<1x1x16x4xbf16>
    %86 = vector.shape_cast %85 : vector<1x1x16x4xbf16> to vector<16x4xbf16>
    %87 = vector.shape_cast %84 : vector<16x4xbf16> to vector<1x1x16x4xbf16>
    tpu.vector_store %arg2[%c0_76, %c7_77, %c0_78, %c0_79], %87 {strides = array<i32>} : memref<1x16x16x4xbf16, #tpu.memory_space<vmem>>, vector<1x1x16x4xbf16>,
    %c0_80 = arith.constant 0 : index
    %c16 = arith.constant 16 : index
    %c0_81 = arith.constant 0 : index
    %c0_82 = arith.constant 0 : index
    %88 = vector.load %arg1[%c0_80, %c16, %c0_81, %c0_82] : memref<1x32x16x8xbf16, #tpu.memory_space<vmem>>, vector<1x1x16x8xbf16>
    %89 = vector.shape_cast %88 : vector<1x1x16x8xbf16> to vector<16x8xbf16>
    %c0_83 = arith.constant 0 : index
    %c17 = arith.constant 17 : index
    %c0_84 = arith.constant 0 : index
    %c0_85 = arith.constant 0 : index
    %90 = vector.load %arg1[%c0_83, %c17, %c0_84, %c0_85] : memref<1x32x16x8xbf16, #tpu.memory_space<vmem>>, vector<1x1x16x8xbf16>
    %91 = vector.shape_cast %90 : vector<1x1x16x8xbf16> to vector<16x8xbf16>
    %92 = arith.maximumf %89, %91 : vector<16x8xbf16>
    %93 = vector.extract_strided_slice %92 {offsets = [0, 0], sizes = [16, 4], strides = [1, 1]} : vector<16x8xbf16> to vector<16x4xbf16>
    %94 = vector.extract_strided_slice %92 {offsets = [0, 4], sizes = [16, 4], strides = [1, 1]} : vector<16x8xbf16> to vector<16x4xbf16>
    %95 = arith.maximumf %93, %94 : vector<16x4xbf16>
    %c0_86 = arith.constant 0 : index
    %c8_87 = arith.constant 8 : index
    %c0_88 = arith.constant 0 : index
    %c0_89 = arith.constant 0 : index
    %96 = vector.load %arg2[%c0_86, %c8_87, %c0_88, %c0_89] : memref<1x16x16x4xbf16, #tpu.memory_space<vmem>>, vector<1x1x16x4xbf16>
    %97 = vector.shape_cast %96 : vector<1x1x16x4xbf16> to vector<16x4xbf16>
    %98 = vector.shape_cast %95 : vector<16x4xbf16> to vector<1x1x16x4xbf16>
    tpu.vector_store %arg2[%c0_86, %c8_87, %c0_88, %c0_89], %98 {strides = array<i32>} : memref<1x16x16x4xbf16, #tpu.memory_space<vmem>>, vector<1x1x16x4xbf16>,
    %c0_90 = arith.constant 0 : index
    %c18 = arith.constant 18 : index
    %c0_91 = arith.constant 0 : index
    %c0_92 = arith.constant 0 : index
    %99 = vector.load %arg1[%c0_90, %c18, %c0_91, %c0_92] : memref<1x32x16x8xbf16, #tpu.memory_space<vmem>>, vector<1x1x16x8xbf16>
    %100 = vector.shape_cast %99 : vector<1x1x16x8xbf16> to vector<16x8xbf16>
    %c0_93 = arith.constant 0 : index
    %c19 = arith.constant 19 : index
    %c0_94 = arith.constant 0 : index
    %c0_95 = arith.constant 0 : index
    %101 = vector.load %arg1[%c0_93, %c19, %c0_94, %c0_95] : memref<1x32x16x8xbf16, #tpu.memory_space<vmem>>, vector<1x1x16x8xbf16>
    %102 = vector.shape_cast %101 : vector<1x1x16x8xbf16> to vector<16x8xbf16>
    %103 = arith.maximumf %100, %102 : vector<16x8xbf16>
    %104 = vector.extract_strided_slice %103 {offsets = [0, 0], sizes = [16, 4], strides = [1, 1]} : vector<16x8xbf16> to vector<16x4xbf16>
    %105 = vector.extract_strided_slice %103 {offsets = [0, 4], sizes = [16, 4], strides = [1, 1]} : vector<16x8xbf16> to vector<16x4xbf16>
    %106 = arith.maximumf %104, %105 : vector<16x4xbf16>
    %c0_96 = arith.constant 0 : index
    %c9_97 = arith.constant 9 : index
    %c0_98 = arith.constant 0 : index
    %c0_99 = arith.constant 0 : index
    %107 = vector.load %arg2[%c0_96, %c9_97, %c0_98, %c0_99] : memref<1x16x16x4xbf16, #tpu.memory_space<vmem>>, vector<1x1x16x4xbf16>
    %108 = vector.shape_cast %107 : vector<1x1x16x4xbf16> to vector<16x4xbf16>
    %109 = vector.shape_cast %106 : vector<16x4xbf16> to vector<1x1x16x4xbf16>
    tpu.vector_store %arg2[%c0_96, %c9_97, %c0_98, %c0_99], %109 {strides = array<i32>} : memref<1x16x16x4xbf16, #tpu.memory_space<vmem>>, vector<1x1x16x4xbf16>,
    %c0_100 = arith.constant 0 : index
    %c20 = arith.constant 20 : index
    %c0_101 = arith.constant 0 : index
    %c0_102 = arith.constant 0 : index
    %110 = vector.load %arg1[%c0_100, %c20, %c0_101, %c0_102] : memref<1x32x16x8xbf16, #tpu.memory_space<vmem>>, vector<1x1x16x8xbf16>
    %111 = vector.shape_cast %110 : vector<1x1x16x8xbf16> to vector<16x8xbf16>
    %c0_103 = arith.constant 0 : index
    %c21 = arith.constant 21 : index
    %c0_104 = arith.constant 0 : index
    %c0_105 = arith.constant 0 : index
    %112 = vector.load %arg1[%c0_103, %c21, %c0_104, %c0_105] : memref<1x32x16x8xbf16, #tpu.memory_space<vmem>>, vector<1x1x16x8xbf16>
    %113 = vector.shape_cast %112 : vector<1x1x16x8xbf16> to vector<16x8xbf16>
    %114 = arith.maximumf %111, %113 : vector<16x8xbf16>
    %115 = vector.extract_strided_slice %114 {offsets = [0, 0], sizes = [16, 4], strides = [1, 1]} : vector<16x8xbf16> to vector<16x4xbf16>
    %116 = vector.extract_strided_slice %114 {offsets = [0, 4], sizes = [16, 4], strides = [1, 1]} : vector<16x8xbf16> to vector<16x4xbf16>
    %117 = arith.maximumf %115, %116 : vector<16x4xbf16>
    %c0_106 = arith.constant 0 : index
    %c10_107 = arith.constant 10 : index
    %c0_108 = arith.constant 0 : index
    %c0_109 = arith.constant 0 : index
    %118 = vector.load %arg2[%c0_106, %c10_107, %c0_108, %c0_109] : memref<1x16x16x4xbf16, #tpu.memory_space<vmem>>, vector<1x1x16x4xbf16>
    %119 = vector.shape_cast %118 : vector<1x1x16x4xbf16> to vector<16x4xbf16>
    %120 = vector.shape_cast %117 : vector<16x4xbf16> to vector<1x1x16x4xbf16>
    tpu.vector_store %arg2[%c0_106, %c10_107, %c0_108, %c0_109], %120 {strides = array<i32>} : memref<1x16x16x4xbf16, #tpu.memory_space<vmem>>, vector<1x1x16x4xbf16>,
    %c0_110 = arith.constant 0 : index
    %c22 = arith.constant 22 : index
    %c0_111 = arith.constant 0 : index
    %c0_112 = arith.constant 0 : index
    %121 = vector.load %arg1[%c0_110, %c22, %c0_111, %c0_112] : memref<1x32x16x8xbf16, #tpu.memory_space<vmem>>, vector<1x1x16x8xbf16>
    %122 = vector.shape_cast %121 : vector<1x1x16x8xbf16> to vector<16x8xbf16>
    %c0_113 = arith.constant 0 : index
    %c23 = arith.constant 23 : index
    %c0_114 = arith.constant 0 : index
    %c0_115 = arith.constant 0 : index
    %123 = vector.load %arg1[%c0_113, %c23, %c0_114, %c0_115] : memref<1x32x16x8xbf16, #tpu.memory_space<vmem>>, vector<1x1x16x8xbf16>
    %124 = vector.shape_cast %123 : vector<1x1x16x8xbf16> to vector<16x8xbf16>
    %125 = arith.maximumf %122, %124 : vector<16x8xbf16>
    %126 = vector.extract_strided_slice %125 {offsets = [0, 0], sizes = [16, 4], strides = [1, 1]} : vector<16x8xbf16> to vector<16x4xbf16>
    %127 = vector.extract_strided_slice %125 {offsets = [0, 4], sizes = [16, 4], strides = [1, 1]} : vector<16x8xbf16> to vector<16x4xbf16>
    %128 = arith.maximumf %126, %127 : vector<16x4xbf16>
    %c0_116 = arith.constant 0 : index
    %c11_117 = arith.constant 11 : index
    %c0_118 = arith.constant 0 : index
    %c0_119 = arith.constant 0 : index
    %129 = vector.load %arg2[%c0_116, %c11_117, %c0_118, %c0_119] : memref<1x16x16x4xbf16, #tpu.memory_space<vmem>>, vector<1x1x16x4xbf16>
    %130 = vector.shape_cast %129 : vector<1x1x16x4xbf16> to vector<16x4xbf16>
    %131 = vector.shape_cast %128 : vector<16x4xbf16> to vector<1x1x16x4xbf16>
    tpu.vector_store %arg2[%c0_116, %c11_117, %c0_118, %c0_119], %131 {strides = array<i32>} : memref<1x16x16x4xbf16, #tpu.memory_space<vmem>>, vector<1x1x16x4xbf16>,
    %c0_120 = arith.constant 0 : index
    %c24 = arith.constant 24 : index
    %c0_121 = arith.constant 0 : index
    %c0_122 = arith.constant 0 : index
    %132 = vector.load %arg1[%c0_120, %c24, %c0_121, %c0_122] : memref<1x32x16x8xbf16, #tpu.memory_space<vmem>>, vector<1x1x16x8xbf16>
    %133 = vector.shape_cast %132 : vector<1x1x16x8xbf16> to vector<16x8xbf16>
    %c0_123 = arith.constant 0 : index
    %c25 = arith.constant 25 : index
    %c0_124 = arith.constant 0 : index
    %c0_125 = arith.constant 0 : index
    %134 = vector.load %arg1[%c0_123, %c25, %c0_124, %c0_125] : memref<1x32x16x8xbf16, #tpu.memory_space<vmem>>, vector<1x1x16x8xbf16>
    %135 = vector.shape_cast %134 : vector<1x1x16x8xbf16> to vector<16x8xbf16>
    %136 = arith.maximumf %133, %135 : vector<16x8xbf16>
    %137 = vector.extract_strided_slice %136 {offsets = [0, 0], sizes = [16, 4], strides = [1, 1]} : vector<16x8xbf16> to vector<16x4xbf16>
    %138 = vector.extract_strided_slice %136 {offsets = [0, 4], sizes = [16, 4], strides = [1, 1]} : vector<16x8xbf16> to vector<16x4xbf16>
    %139 = arith.maximumf %137, %138 : vector<16x4xbf16>
    %c0_126 = arith.constant 0 : index
    %c12_127 = arith.constant 12 : index
    %c0_128 = arith.constant 0 : index
    %c0_129 = arith.constant 0 : index
    %140 = vector.load %arg2[%c0_126, %c12_127, %c0_128, %c0_129] : memref<1x16x16x4xbf16, #tpu.memory_space<vmem>>, vector<1x1x16x4xbf16>
    %141 = vector.shape_cast %140 : vector<1x1x16x4xbf16> to vector<16x4xbf16>
    %142 = vector.shape_cast %139 : vector<16x4xbf16> to vector<1x1x16x4xbf16>
    tpu.vector_store %arg2[%c0_126, %c12_127, %c0_128, %c0_129], %142 {strides = array<i32>} : memref<1x16x16x4xbf16, #tpu.memory_space<vmem>>, vector<1x1x16x4xbf16>,
    %c0_130 = arith.constant 0 : index
    %c26 = arith.constant 26 : index
    %c0_131 = arith.constant 0 : index
    %c0_132 = arith.constant 0 : index
    %143 = vector.load %arg1[%c0_130, %c26, %c0_131, %c0_132] : memref<1x32x16x8xbf16, #tpu.memory_space<vmem>>, vector<1x1x16x8xbf16>
    %144 = vector.shape_cast %143 : vector<1x1x16x8xbf16> to vector<16x8xbf16>
    %c0_133 = arith.constant 0 : index
    %c27 = arith.constant 27 : index
    %c0_134 = arith.constant 0 : index
    %c0_135 = arith.constant 0 : index
    %145 = vector.load %arg1[%c0_133, %c27, %c0_134, %c0_135] : memref<1x32x16x8xbf16, #tpu.memory_space<vmem>>, vector<1x1x16x8xbf16>
    %146 = vector.shape_cast %145 : vector<1x1x16x8xbf16> to vector<16x8xbf16>
    %147 = arith.maximumf %144, %146 : vector<16x8xbf16>
    %148 = vector.extract_strided_slice %147 {offsets = [0, 0], sizes = [16, 4], strides = [1, 1]} : vector<16x8xbf16> to vector<16x4xbf16>
    %149 = vector.extract_strided_slice %147 {offsets = [0, 4], sizes = [16, 4], strides = [1, 1]} : vector<16x8xbf16> to vector<16x4xbf16>
    %150 = arith.maximumf %148, %149 : vector<16x4xbf16>
    %c0_136 = arith.constant 0 : index
    %c13_137 = arith.constant 13 : index
    %c0_138 = arith.constant 0 : index
    %c0_139 = arith.constant 0 : index
    %151 = vector.load %arg2[%c0_136, %c13_137, %c0_138, %c0_139] : memref<1x16x16x4xbf16, #tpu.memory_space<vmem>>, vector<1x1x16x4xbf16>
    %152 = vector.shape_cast %151 : vector<1x1x16x4xbf16> to vector<16x4xbf16>
    %153 = vector.shape_cast %150 : vector<16x4xbf16> to vector<1x1x16x4xbf16>
    tpu.vector_store %arg2[%c0_136, %c13_137, %c0_138, %c0_139], %153 {strides = array<i32>} : memref<1x16x16x4xbf16, #tpu.memory_space<vmem>>, vector<1x1x16x4xbf16>,
    %c0_140 = arith.constant 0 : index
    %c28 = arith.constant 28 : index
    %c0_141 = arith.constant 0 : index
    %c0_142 = arith.constant 0 : index
    %154 = vector.load %arg1[%c0_140, %c28, %c0_141, %c0_142] : memref<1x32x16x8xbf16, #tpu.memory_space<vmem>>, vector<1x1x16x8xbf16>
    %155 = vector.shape_cast %154 : vector<1x1x16x8xbf16> to vector<16x8xbf16>
    %c0_143 = arith.constant 0 : index
    %c29 = arith.constant 29 : index
    %c0_144 = arith.constant 0 : index
    %c0_145 = arith.constant 0 : index
    %156 = vector.load %arg1[%c0_143, %c29, %c0_144, %c0_145] : memref<1x32x16x8xbf16, #tpu.memory_space<vmem>>, vector<1x1x16x8xbf16>
    %157 = vector.shape_cast %156 : vector<1x1x16x8xbf16> to vector<16x8xbf16>
    %158 = arith.maximumf %155, %157 : vector<16x8xbf16>
    %159 = vector.extract_strided_slice %158 {offsets = [0, 0], sizes = [16, 4], strides = [1, 1]} : vector<16x8xbf16> to vector<16x4xbf16>
    %160 = vector.extract_strided_slice %158 {offsets = [0, 4], sizes = [16, 4], strides = [1, 1]} : vector<16x8xbf16> to vector<16x4xbf16>
    %161 = arith.maximumf %159, %160 : vector<16x4xbf16>
    %c0_146 = arith.constant 0 : index
    %c14_147 = arith.constant 14 : index
    %c0_148 = arith.constant 0 : index
    %c0_149 = arith.constant 0 : index
    %162 = vector.load %arg2[%c0_146, %c14_147, %c0_148, %c0_149] : memref<1x16x16x4xbf16, #tpu.memory_space<vmem>>, vector<1x1x16x4xbf16>
    %163 = vector.shape_cast %162 : vector<1x1x16x4xbf16> to vector<16x4xbf16>
    %164 = vector.shape_cast %161 : vector<16x4xbf16> to vector<1x1x16x4xbf16>
    tpu.vector_store %arg2[%c0_146, %c14_147, %c0_148, %c0_149], %164 {strides = array<i32>} : memref<1x16x16x4xbf16, #tpu.memory_space<vmem>>, vector<1x1x16x4xbf16>,
    %c0_150 = arith.constant 0 : index
    %c30 = arith.constant 30 : index
    %c0_151 = arith.constant 0 : index
    %c0_152 = arith.constant 0 : index
    %165 = vector.load %arg1[%c0_150, %c30, %c0_151, %c0_152] : memref<1x32x16x8xbf16, #tpu.memory_space<vmem>>, vector<1x1x16x8xbf16>
    %166 = vector.shape_cast %165 : vector<1x1x16x8xbf16> to vector<16x8xbf16>
    %c0_153 = arith.constant 0 : index
    %c31 = arith.constant 31 : index
    %c0_154 = arith.constant 0 : index
    %c0_155 = arith.constant 0 : index
    %167 = vector.load %arg1[%c0_153, %c31, %c0_154, %c0_155] : memref<1x32x16x8xbf16, #tpu.memory_space<vmem>>, vector<1x1x16x8xbf16>
    %168 = vector.shape_cast %167 : vector<1x1x16x8xbf16> to vector<16x8xbf16>
    %169 = arith.maximumf %166, %168 : vector<16x8xbf16>
    %170 = vector.extract_strided_slice %169 {offsets = [0, 0], sizes = [16, 4], strides = [1, 1]} : vector<16x8xbf16> to vector<16x4xbf16>
    %171 = vector.extract_strided_slice %169 {offsets = [0, 4], sizes = [16, 4], strides = [1, 1]} : vector<16x8xbf16> to vector<16x4xbf16>
    %172 = arith.maximumf %170, %171 : vector<16x4xbf16>
    %c0_156 = arith.constant 0 : index
    %c15_157 = arith.constant 15 : index
    %c0_158 = arith.constant 0 : index
    %c0_159 = arith.constant 0 : index
    %173 = vector.load %arg2[%c0_156, %c15_157, %c0_158, %c0_159] : memref<1x16x16x4xbf16, #tpu.memory_space<vmem>>, vector<1x1x16x4xbf16>
    %174 = vector.shape_cast %173 : vector<1x1x16x4xbf16> to vector<16x4xbf16>
    %175 = vector.shape_cast %172 : vector<16x4xbf16> to vector<1x1x16x4xbf16>
    tpu.vector_store %arg2[%c0_156, %c15_157, %c0_158, %c0_159], %175 {strides = array<i32>} : memref<1x16x16x4xbf16, #tpu.memory_space<vmem>>, vector<1x1x16x4xbf16>,
    return
  }
  func.func @transform_0(%arg0: i32) -> (i32, i32, i32, i32) {
    %c0_i32 = arith.constant 0 : i32
    %c0_i32_0 = arith.constant 0 : i32
    %c0_i32_1 = arith.constant 0 : i32
    %c0_i32_2 = arith.constant 0 : i32
    return %arg0, %c0_i32, %c0_i32_0, %c0_i32_1 : i32, i32, i32, i32
  }
  func.func @transform_1(%arg0: i32) -> (i32, i32, i32, i32) {
    %c0_i32 = arith.constant 0 : i32
    %c0_i32_0 = arith.constant 0 : i32
    %c0_i32_1 = arith.constant 0 : i32
    %c0_i32_2 = arith.constant 0 : i32
    return %arg0, %c0_i32, %c0_i32_0, %c0_i32_1 : i32, i32, i32, i32
  }
}

module attributes {stable_mosaic.version = 11 : i64} {
  func.func @conv3x3_kernel(%arg0: i32, %arg1: i32, %arg2: memref<1x16x64xbf16, #tpu.memory_space<vmem>>, %arg3: memref<1x3x64x128xbf16, #tpu.memory_space<vmem>>, %arg4: memref<1x1x128xf32, #tpu.memory_space<vmem>>, %arg5: memref<1x16x128xbf16, #tpu.memory_space<vmem>>, %arg6: memref<16x128xf32, #tpu.memory_space<vmem>>) attributes {dimension_semantics = [#tpu.dimension_semantics<parallel>, #tpu.dimension_semantics<parallel>], iteration_bounds = array<i64: 2, 2>, scalar_prefetch = 0 : i64, scratch_operands = 1 : i64, tpu.core_type = #tpu.core_type<tc>, window_params = [{transform_indices = @transform_0, window_bounds = array<i64: 1, 16, 64>}, {transform_indices = @transform_1, window_bounds = array<i64: 1, 3, 64, 128>}, {transform_indices = @transform_2, window_bounds = array<i64: 1, 1, 128>}, {transform_indices = @transform_3, window_bounds = array<i64: 1, 16, 128>}]} {
    %c0 = arith.constant 0 : index
    %c0_0 = arith.constant 0 : index
    %c0_1 = arith.constant 0 : index
    %0 = vector.load %arg2[%c0, %c0_0, %c0_1] : memref<1x16x64xbf16, #tpu.memory_space<vmem>>, vector<1x16x64xbf16>
    %1 = vector.shape_cast %0 : vector<1x16x64xbf16> to vector<16x64xbf16>
    %c0_2 = arith.constant 0 : index
    %c1 = arith.constant 1 : index
    %c0_3 = arith.constant 0 : index
    %c0_4 = arith.constant 0 : index
    %2 = vector.load %arg3[%c0_2, %c1, %c0_3, %c0_4] : memref<1x3x64x128xbf16, #tpu.memory_space<vmem>>, vector<1x1x64x128xbf16>
    %3 = vector.shape_cast %2 : vector<1x1x64x128xbf16> to vector<64x128xbf16>
    %cst = arith.constant dense<0.000000e+00> : vector<16x128xf32>
    %4 = tpu.matmul %1, %3, %cst {dimension_numbers = #tpu.dot_dimension_numbers<[1], [0], [0], [1], [0, 0, 1, 1], [], []>} : vector<16x64xbf16>, vector<64x128xbf16>, vector<16x128xf32> -> vector<16x128xf32>
    %c0_5 = arith.constant 0 : index
    %c0_6 = arith.constant 0 : index
    %5 = vector.load %arg6[%c0_5, %c0_6] : memref<16x128xf32, #tpu.memory_space<vmem>>, vector<16x128xf32>
    tpu.vector_store %arg6[%c0_5, %c0_6], %4 {strides = array<i32>} : memref<16x128xf32, #tpu.memory_space<vmem>>, vector<16x128xf32>,
    %c1_7 = arith.constant 1 : index
    %c0_8 = arith.constant 0 : index
    %6 = vector.load %arg6[%c1_7, %c0_8] : memref<16x128xf32, #tpu.memory_space<vmem>>, vector<15x128xf32>
    %7 = vector.extract_strided_slice %1 {offsets = [0, 0], sizes = [15, 64], strides = [1, 1]} : vector<16x64xbf16> to vector<15x64xbf16>
    %c0_9 = arith.constant 0 : index
    %c0_10 = arith.constant 0 : index
    %c0_11 = arith.constant 0 : index
    %c0_12 = arith.constant 0 : index
    %8 = vector.load %arg3[%c0_9, %c0_10, %c0_11, %c0_12] : memref<1x3x64x128xbf16, #tpu.memory_space<vmem>>, vector<1x1x64x128xbf16>
    %9 = vector.shape_cast %8 : vector<1x1x64x128xbf16> to vector<64x128xbf16>
    %cst_13 = arith.constant dense<0.000000e+00> : vector<15x128xf32>
    %10 = tpu.matmul %7, %9, %cst_13 {dimension_numbers = #tpu.dot_dimension_numbers<[1], [0], [0], [1], [0, 0, 1, 1], [], []>} : vector<15x64xbf16>, vector<64x128xbf16>, vector<15x128xf32> -> vector<15x128xf32>
    %11 = arith.addf %6, %10 : vector<15x128xf32>
    %c1_14 = arith.constant 1 : index
    %c0_15 = arith.constant 0 : index
    %12 = vector.load %arg6[%c1_14, %c0_15] : memref<16x128xf32, #tpu.memory_space<vmem>>, vector<15x128xf32>
    tpu.vector_store %arg6[%c1_14, %c0_15], %11 {strides = array<i32>} : memref<16x128xf32, #tpu.memory_space<vmem>>, vector<15x128xf32>,
    %c0_16 = arith.constant 0 : index
    %c0_17 = arith.constant 0 : index
    %13 = vector.load %arg6[%c0_16, %c0_17] : memref<16x128xf32, #tpu.memory_space<vmem>>, vector<15x128xf32>
    %14 = vector.extract_strided_slice %1 {offsets = [1, 0], sizes = [15, 64], strides = [1, 1]} : vector<16x64xbf16> to vector<15x64xbf16>
    %c0_18 = arith.constant 0 : index
    %c2 = arith.constant 2 : index
    %c0_19 = arith.constant 0 : index
    %c0_20 = arith.constant 0 : index
    %15 = vector.load %arg3[%c0_18, %c2, %c0_19, %c0_20] : memref<1x3x64x128xbf16, #tpu.memory_space<vmem>>, vector<1x1x64x128xbf16>
    %16 = vector.shape_cast %15 : vector<1x1x64x128xbf16> to vector<64x128xbf16>
    %cst_21 = arith.constant dense<0.000000e+00> : vector<15x128xf32>
    %17 = tpu.matmul %14, %16, %cst_21 {dimension_numbers = #tpu.dot_dimension_numbers<[1], [0], [0], [1], [0, 0, 1, 1], [], []>} : vector<15x64xbf16>, vector<64x128xbf16>, vector<15x128xf32> -> vector<15x128xf32>
    %18 = arith.addf %13, %17 : vector<15x128xf32>
    %c0_22 = arith.constant 0 : index
    %c0_23 = arith.constant 0 : index
    %19 = vector.load %arg6[%c0_22, %c0_23] : memref<16x128xf32, #tpu.memory_space<vmem>>, vector<15x128xf32>
    tpu.vector_store %arg6[%c0_22, %c0_23], %18 {strides = array<i32>} : memref<16x128xf32, #tpu.memory_space<vmem>>, vector<15x128xf32>,
    %c0_24 = arith.constant 0 : index
    %c0_25 = arith.constant 0 : index
    %20 = vector.load %arg6[%c0_24, %c0_25] : memref<16x128xf32, #tpu.memory_space<vmem>>, vector<16x128xf32>
    %c0_26 = arith.constant 0 : index
    %c0_27 = arith.constant 0 : index
    %c0_28 = arith.constant 0 : index
    %21 = vector.load %arg4[%c0_26, %c0_27, %c0_28] : memref<1x1x128xf32, #tpu.memory_space<vmem>>, vector<1x1x128xf32>
    %22 = vector.shape_cast %21 : vector<1x1x128xf32> to vector<1x128xf32>
    %23 = vector.broadcast %22 : vector<1x128xf32> to vector<16x128xf32>
    %24 = arith.addf %20, %23 : vector<16x128xf32>
    %cst_29 = arith.constant 0.000000e+00 : f32
    %25 = vector.broadcast %cst_29 : f32 to vector<16x128xf32>
    %26 = arith.maximumf %24, %25 : vector<16x128xf32>
    %27 = arith.truncf %26 : vector<16x128xf32> to vector<16x128xbf16>
    %c0_30 = arith.constant 0 : index
    %c0_31 = arith.constant 0 : index
    %c0_32 = arith.constant 0 : index
    %28 = vector.load %arg5[%c0_30, %c0_31, %c0_32] : memref<1x16x128xbf16, #tpu.memory_space<vmem>>, vector<1x16x128xbf16>
    %29 = vector.shape_cast %28 : vector<1x16x128xbf16> to vector<16x128xbf16>
    %30 = vector.shape_cast %27 : vector<16x128xbf16> to vector<1x16x128xbf16>
    tpu.vector_store %arg5[%c0_30, %c0_31, %c0_32], %30 {strides = array<i32>} : memref<1x16x128xbf16, #tpu.memory_space<vmem>>, vector<1x16x128xbf16>,
    return
  }
  func.func @transform_0(%arg0: i32, %arg1: i32) -> (i32, i32, i32) {
    %c2_i32 = arith.constant 2 : i32
    %0 = arith.muli %arg0, %c2_i32 : i32
    %1 = arith.addi %0, %arg1 : i32
    %c0_i32 = arith.constant 0 : i32
    %c0_i32_0 = arith.constant 0 : i32
    %c0_i32_1 = arith.constant 0 : i32
    return %1, %c0_i32, %c0_i32_0 : i32, i32, i32
  }
  func.func @transform_1(%arg0: i32, %arg1: i32) -> (i32, i32, i32, i32) {
    %c0_i32 = arith.constant 0 : i32
    %c0_i32_0 = arith.constant 0 : i32
    %c0_i32_1 = arith.constant 0 : i32
    %c0_i32_2 = arith.constant 0 : i32
    return %arg0, %c0_i32, %c0_i32_0, %c0_i32_1 : i32, i32, i32, i32
  }
  func.func @transform_2(%arg0: i32, %arg1: i32) -> (i32, i32, i32) {
    %c0_i32 = arith.constant 0 : i32
    %c0_i32_0 = arith.constant 0 : i32
    %c0_i32_1 = arith.constant 0 : i32
    return %arg0, %c0_i32, %c0_i32_0 : i32, i32, i32
  }
  func.func @transform_3(%arg0: i32, %arg1: i32) -> (i32, i32, i32) {
    %c2_i32 = arith.constant 2 : i32
    %0 = arith.muli %arg0, %c2_i32 : i32
    %1 = arith.addi %0, %arg1 : i32
    %c0_i32 = arith.constant 0 : i32
    %c0_i32_0 = arith.constant 0 : i32
    %c0_i32_1 = arith.constant 0 : i32
    return %1, %c0_i32, %c0_i32_0 : i32, i32, i32
  }
}

module attributes {stable_mosaic.version = 11 : i64} {
  func.func @conv3x3_kernel(%arg0: i32, %arg1: i32, %arg2: memref<1x16x128xbf16, #tpu.memory_space<vmem>>, %arg3: memref<1x3x128x128xbf16, #tpu.memory_space<vmem>>, %arg4: memref<1x1x128xf32, #tpu.memory_space<vmem>>, %arg5: memref<1x16x128xbf16, #tpu.memory_space<vmem>>, %arg6: memref<16x128xf32, #tpu.memory_space<vmem>>) attributes {dimension_semantics = [#tpu.dimension_semantics<parallel>, #tpu.dimension_semantics<parallel>], iteration_bounds = array<i64: 2, 2>, scalar_prefetch = 0 : i64, scratch_operands = 1 : i64, tpu.core_type = #tpu.core_type<tc>, window_params = [{transform_indices = @transform_0, window_bounds = array<i64: 1, 16, 128>}, {transform_indices = @transform_1, window_bounds = array<i64: 1, 3, 128, 128>}, {transform_indices = @transform_2, window_bounds = array<i64: 1, 1, 128>}, {transform_indices = @transform_3, window_bounds = array<i64: 1, 16, 128>}]} {
    %c0 = arith.constant 0 : index
    %c0_0 = arith.constant 0 : index
    %c0_1 = arith.constant 0 : index
    %0 = vector.load %arg2[%c0, %c0_0, %c0_1] : memref<1x16x128xbf16, #tpu.memory_space<vmem>>, vector<1x16x128xbf16>
    %1 = vector.shape_cast %0 : vector<1x16x128xbf16> to vector<16x128xbf16>
    %c0_2 = arith.constant 0 : index
    %c1 = arith.constant 1 : index
    %c0_3 = arith.constant 0 : index
    %c0_4 = arith.constant 0 : index
    %2 = vector.load %arg3[%c0_2, %c1, %c0_3, %c0_4] : memref<1x3x128x128xbf16, #tpu.memory_space<vmem>>, vector<1x1x128x128xbf16>
    %3 = vector.shape_cast %2 : vector<1x1x128x128xbf16> to vector<128x128xbf16>
    %cst = arith.constant dense<0.000000e+00> : vector<16x128xf32>
    %4 = tpu.matmul %1, %3, %cst {dimension_numbers = #tpu.dot_dimension_numbers<[1], [0], [0], [1], [0, 0, 1, 1], [], []>} : vector<16x128xbf16>, vector<128x128xbf16>, vector<16x128xf32> -> vector<16x128xf32>
    %c0_5 = arith.constant 0 : index
    %c0_6 = arith.constant 0 : index
    %5 = vector.load %arg6[%c0_5, %c0_6] : memref<16x128xf32, #tpu.memory_space<vmem>>, vector<16x128xf32>
    tpu.vector_store %arg6[%c0_5, %c0_6], %4 {strides = array<i32>} : memref<16x128xf32, #tpu.memory_space<vmem>>, vector<16x128xf32>,
    %c1_7 = arith.constant 1 : index
    %c0_8 = arith.constant 0 : index
    %6 = vector.load %arg6[%c1_7, %c0_8] : memref<16x128xf32, #tpu.memory_space<vmem>>, vector<15x128xf32>
    %7 = vector.extract_strided_slice %1 {offsets = [0, 0], sizes = [15, 128], strides = [1, 1]} : vector<16x128xbf16> to vector<15x128xbf16>
    %c0_9 = arith.constant 0 : index
    %c0_10 = arith.constant 0 : index
    %c0_11 = arith.constant 0 : index
    %c0_12 = arith.constant 0 : index
    %8 = vector.load %arg3[%c0_9, %c0_10, %c0_11, %c0_12] : memref<1x3x128x128xbf16, #tpu.memory_space<vmem>>, vector<1x1x128x128xbf16>
    %9 = vector.shape_cast %8 : vector<1x1x128x128xbf16> to vector<128x128xbf16>
    %cst_13 = arith.constant dense<0.000000e+00> : vector<15x128xf32>
    %10 = tpu.matmul %7, %9, %cst_13 {dimension_numbers = #tpu.dot_dimension_numbers<[1], [0], [0], [1], [0, 0, 1, 1], [], []>} : vector<15x128xbf16>, vector<128x128xbf16>, vector<15x128xf32> -> vector<15x128xf32>
    %11 = arith.addf %6, %10 : vector<15x128xf32>
    %c1_14 = arith.constant 1 : index
    %c0_15 = arith.constant 0 : index
    %12 = vector.load %arg6[%c1_14, %c0_15] : memref<16x128xf32, #tpu.memory_space<vmem>>, vector<15x128xf32>
    tpu.vector_store %arg6[%c1_14, %c0_15], %11 {strides = array<i32>} : memref<16x128xf32, #tpu.memory_space<vmem>>, vector<15x128xf32>,
    %c0_16 = arith.constant 0 : index
    %c0_17 = arith.constant 0 : index
    %13 = vector.load %arg6[%c0_16, %c0_17] : memref<16x128xf32, #tpu.memory_space<vmem>>, vector<15x128xf32>
    %14 = vector.extract_strided_slice %1 {offsets = [1, 0], sizes = [15, 128], strides = [1, 1]} : vector<16x128xbf16> to vector<15x128xbf16>
    %c0_18 = arith.constant 0 : index
    %c2 = arith.constant 2 : index
    %c0_19 = arith.constant 0 : index
    %c0_20 = arith.constant 0 : index
    %15 = vector.load %arg3[%c0_18, %c2, %c0_19, %c0_20] : memref<1x3x128x128xbf16, #tpu.memory_space<vmem>>, vector<1x1x128x128xbf16>
    %16 = vector.shape_cast %15 : vector<1x1x128x128xbf16> to vector<128x128xbf16>
    %cst_21 = arith.constant dense<0.000000e+00> : vector<15x128xf32>
    %17 = tpu.matmul %14, %16, %cst_21 {dimension_numbers = #tpu.dot_dimension_numbers<[1], [0], [0], [1], [0, 0, 1, 1], [], []>} : vector<15x128xbf16>, vector<128x128xbf16>, vector<15x128xf32> -> vector<15x128xf32>
    %18 = arith.addf %13, %17 : vector<15x128xf32>
    %c0_22 = arith.constant 0 : index
    %c0_23 = arith.constant 0 : index
    %19 = vector.load %arg6[%c0_22, %c0_23] : memref<16x128xf32, #tpu.memory_space<vmem>>, vector<15x128xf32>
    tpu.vector_store %arg6[%c0_22, %c0_23], %18 {strides = array<i32>} : memref<16x128xf32, #tpu.memory_space<vmem>>, vector<15x128xf32>,
    %c0_24 = arith.constant 0 : index
    %c0_25 = arith.constant 0 : index
    %20 = vector.load %arg6[%c0_24, %c0_25] : memref<16x128xf32, #tpu.memory_space<vmem>>, vector<16x128xf32>
    %c0_26 = arith.constant 0 : index
    %c0_27 = arith.constant 0 : index
    %c0_28 = arith.constant 0 : index
    %21 = vector.load %arg4[%c0_26, %c0_27, %c0_28] : memref<1x1x128xf32, #tpu.memory_space<vmem>>, vector<1x1x128xf32>
    %22 = vector.shape_cast %21 : vector<1x1x128xf32> to vector<1x128xf32>
    %23 = vector.broadcast %22 : vector<1x128xf32> to vector<16x128xf32>
    %24 = arith.addf %20, %23 : vector<16x128xf32>
    %cst_29 = arith.constant 0.000000e+00 : f32
    %25 = vector.broadcast %cst_29 : f32 to vector<16x128xf32>
    %26 = arith.maximumf %24, %25 : vector<16x128xf32>
    %27 = arith.truncf %26 : vector<16x128xf32> to vector<16x128xbf16>
    %c0_30 = arith.constant 0 : index
    %c0_31 = arith.constant 0 : index
    %c0_32 = arith.constant 0 : index
    %28 = vector.load %arg5[%c0_30, %c0_31, %c0_32] : memref<1x16x128xbf16, #tpu.memory_space<vmem>>, vector<1x16x128xbf16>
    %29 = vector.shape_cast %28 : vector<1x16x128xbf16> to vector<16x128xbf16>
    %30 = vector.shape_cast %27 : vector<16x128xbf16> to vector<1x16x128xbf16>
    tpu.vector_store %arg5[%c0_30, %c0_31, %c0_32], %30 {strides = array<i32>} : memref<1x16x128xbf16, #tpu.memory_space<vmem>>, vector<1x16x128xbf16>,
    return
  }
  func.func @transform_0(%arg0: i32, %arg1: i32) -> (i32, i32, i32) {
    %c2_i32 = arith.constant 2 : i32
    %0 = arith.muli %arg0, %c2_i32 : i32
    %1 = arith.addi %0, %arg1 : i32
    %c0_i32 = arith.constant 0 : i32
    %c0_i32_0 = arith.constant 0 : i32
    %c0_i32_1 = arith.constant 0 : i32
    return %1, %c0_i32, %c0_i32_0 : i32, i32, i32
  }
  func.func @transform_1(%arg0: i32, %arg1: i32) -> (i32, i32, i32, i32) {
    %c0_i32 = arith.constant 0 : i32
    %c0_i32_0 = arith.constant 0 : i32
    %c0_i32_1 = arith.constant 0 : i32
    %c0_i32_2 = arith.constant 0 : i32
    return %arg0, %c0_i32, %c0_i32_0, %c0_i32_1 : i32, i32, i32, i32
  }
  func.func @transform_2(%arg0: i32, %arg1: i32) -> (i32, i32, i32) {
    %c0_i32 = arith.constant 0 : i32
    %c0_i32_0 = arith.constant 0 : i32
    %c0_i32_1 = arith.constant 0 : i32
    return %arg0, %c0_i32, %c0_i32_0 : i32, i32, i32
  }
  func.func @transform_3(%arg0: i32, %arg1: i32) -> (i32, i32, i32) {
    %c2_i32 = arith.constant 2 : i32
    %0 = arith.muli %arg0, %c2_i32 : i32
    %1 = arith.addi %0, %arg1 : i32
    %c0_i32 = arith.constant 0 : i32
    %c0_i32_0 = arith.constant 0 : i32
    %c0_i32_1 = arith.constant 0 : i32
    return %1, %c0_i32, %c0_i32_0 : i32, i32, i32
  }
}

module attributes {stable_mosaic.version = 11 : i64} {
  func.func @maxpool2x2_kernel(%arg0: i32, %arg1: memref<1x16x8x16xbf16, #tpu.memory_space<vmem>>, %arg2: memref<1x8x8x8xbf16, #tpu.memory_space<vmem>>) attributes {dimension_semantics = [#tpu.dimension_semantics<parallel>], iteration_bounds = array<i64: 4>, scalar_prefetch = 0 : i64, scratch_operands = 0 : i64, tpu.core_type = #tpu.core_type<tc>, window_params = [{transform_indices = @transform_0, window_bounds = array<i64: 1, 16, 8, 16>}, {transform_indices = @transform_1, window_bounds = array<i64: 1, 8, 8, 8>}]} {
    %c0 = arith.constant 0 : index
    %c0_0 = arith.constant 0 : index
    %c0_1 = arith.constant 0 : index
    %c0_2 = arith.constant 0 : index
    %0 = vector.load %arg1[%c0, %c0_0, %c0_1, %c0_2] : memref<1x16x8x16xbf16, #tpu.memory_space<vmem>>, vector<1x1x8x16xbf16>
    %1 = vector.shape_cast %0 : vector<1x1x8x16xbf16> to vector<8x16xbf16>
    %c0_3 = arith.constant 0 : index
    %c1 = arith.constant 1 : index
    %c0_4 = arith.constant 0 : index
    %c0_5 = arith.constant 0 : index
    %2 = vector.load %arg1[%c0_3, %c1, %c0_4, %c0_5] : memref<1x16x8x16xbf16, #tpu.memory_space<vmem>>, vector<1x1x8x16xbf16>
    %3 = vector.shape_cast %2 : vector<1x1x8x16xbf16> to vector<8x16xbf16>
    %4 = arith.maximumf %1, %3 : vector<8x16xbf16>
    %5 = vector.extract_strided_slice %4 {offsets = [0, 0], sizes = [8, 8], strides = [1, 1]} : vector<8x16xbf16> to vector<8x8xbf16>
    %6 = vector.extract_strided_slice %4 {offsets = [0, 8], sizes = [8, 8], strides = [1, 1]} : vector<8x16xbf16> to vector<8x8xbf16>
    %7 = arith.maximumf %5, %6 : vector<8x8xbf16>
    %c0_6 = arith.constant 0 : index
    %c0_7 = arith.constant 0 : index
    %c0_8 = arith.constant 0 : index
    %c0_9 = arith.constant 0 : index
    %8 = vector.load %arg2[%c0_6, %c0_7, %c0_8, %c0_9] : memref<1x8x8x8xbf16, #tpu.memory_space<vmem>>, vector<1x1x8x8xbf16>
    %9 = vector.shape_cast %8 : vector<1x1x8x8xbf16> to vector<8x8xbf16>
    %10 = vector.shape_cast %7 : vector<8x8xbf16> to vector<1x1x8x8xbf16>
    tpu.vector_store %arg2[%c0_6, %c0_7, %c0_8, %c0_9], %10 {strides = array<i32>} : memref<1x8x8x8xbf16, #tpu.memory_space<vmem>>, vector<1x1x8x8xbf16>,
    %c0_10 = arith.constant 0 : index
    %c2 = arith.constant 2 : index
    %c0_11 = arith.constant 0 : index
    %c0_12 = arith.constant 0 : index
    %11 = vector.load %arg1[%c0_10, %c2, %c0_11, %c0_12] : memref<1x16x8x16xbf16, #tpu.memory_space<vmem>>, vector<1x1x8x16xbf16>
    %12 = vector.shape_cast %11 : vector<1x1x8x16xbf16> to vector<8x16xbf16>
    %c0_13 = arith.constant 0 : index
    %c3 = arith.constant 3 : index
    %c0_14 = arith.constant 0 : index
    %c0_15 = arith.constant 0 : index
    %13 = vector.load %arg1[%c0_13, %c3, %c0_14, %c0_15] : memref<1x16x8x16xbf16, #tpu.memory_space<vmem>>, vector<1x1x8x16xbf16>
    %14 = vector.shape_cast %13 : vector<1x1x8x16xbf16> to vector<8x16xbf16>
    %15 = arith.maximumf %12, %14 : vector<8x16xbf16>
    %16 = vector.extract_strided_slice %15 {offsets = [0, 0], sizes = [8, 8], strides = [1, 1]} : vector<8x16xbf16> to vector<8x8xbf16>
    %17 = vector.extract_strided_slice %15 {offsets = [0, 8], sizes = [8, 8], strides = [1, 1]} : vector<8x16xbf16> to vector<8x8xbf16>
    %18 = arith.maximumf %16, %17 : vector<8x8xbf16>
    %c0_16 = arith.constant 0 : index
    %c1_17 = arith.constant 1 : index
    %c0_18 = arith.constant 0 : index
    %c0_19 = arith.constant 0 : index
    %19 = vector.load %arg2[%c0_16, %c1_17, %c0_18, %c0_19] : memref<1x8x8x8xbf16, #tpu.memory_space<vmem>>, vector<1x1x8x8xbf16>
    %20 = vector.shape_cast %19 : vector<1x1x8x8xbf16> to vector<8x8xbf16>
    %21 = vector.shape_cast %18 : vector<8x8xbf16> to vector<1x1x8x8xbf16>
    tpu.vector_store %arg2[%c0_16, %c1_17, %c0_18, %c0_19], %21 {strides = array<i32>} : memref<1x8x8x8xbf16, #tpu.memory_space<vmem>>, vector<1x1x8x8xbf16>,
    %c0_20 = arith.constant 0 : index
    %c4 = arith.constant 4 : index
    %c0_21 = arith.constant 0 : index
    %c0_22 = arith.constant 0 : index
    %22 = vector.load %arg1[%c0_20, %c4, %c0_21, %c0_22] : memref<1x16x8x16xbf16, #tpu.memory_space<vmem>>, vector<1x1x8x16xbf16>
    %23 = vector.shape_cast %22 : vector<1x1x8x16xbf16> to vector<8x16xbf16>
    %c0_23 = arith.constant 0 : index
    %c5 = arith.constant 5 : index
    %c0_24 = arith.constant 0 : index
    %c0_25 = arith.constant 0 : index
    %24 = vector.load %arg1[%c0_23, %c5, %c0_24, %c0_25] : memref<1x16x8x16xbf16, #tpu.memory_space<vmem>>, vector<1x1x8x16xbf16>
    %25 = vector.shape_cast %24 : vector<1x1x8x16xbf16> to vector<8x16xbf16>
    %26 = arith.maximumf %23, %25 : vector<8x16xbf16>
    %27 = vector.extract_strided_slice %26 {offsets = [0, 0], sizes = [8, 8], strides = [1, 1]} : vector<8x16xbf16> to vector<8x8xbf16>
    %28 = vector.extract_strided_slice %26 {offsets = [0, 8], sizes = [8, 8], strides = [1, 1]} : vector<8x16xbf16> to vector<8x8xbf16>
    %29 = arith.maximumf %27, %28 : vector<8x8xbf16>
    %c0_26 = arith.constant 0 : index
    %c2_27 = arith.constant 2 : index
    %c0_28 = arith.constant 0 : index
    %c0_29 = arith.constant 0 : index
    %30 = vector.load %arg2[%c0_26, %c2_27, %c0_28, %c0_29] : memref<1x8x8x8xbf16, #tpu.memory_space<vmem>>, vector<1x1x8x8xbf16>
    %31 = vector.shape_cast %30 : vector<1x1x8x8xbf16> to vector<8x8xbf16>
    %32 = vector.shape_cast %29 : vector<8x8xbf16> to vector<1x1x8x8xbf16>
    tpu.vector_store %arg2[%c0_26, %c2_27, %c0_28, %c0_29], %32 {strides = array<i32>} : memref<1x8x8x8xbf16, #tpu.memory_space<vmem>>, vector<1x1x8x8xbf16>,
    %c0_30 = arith.constant 0 : index
    %c6 = arith.constant 6 : index
    %c0_31 = arith.constant 0 : index
    %c0_32 = arith.constant 0 : index
    %33 = vector.load %arg1[%c0_30, %c6, %c0_31, %c0_32] : memref<1x16x8x16xbf16, #tpu.memory_space<vmem>>, vector<1x1x8x16xbf16>
    %34 = vector.shape_cast %33 : vector<1x1x8x16xbf16> to vector<8x16xbf16>
    %c0_33 = arith.constant 0 : index
    %c7 = arith.constant 7 : index
    %c0_34 = arith.constant 0 : index
    %c0_35 = arith.constant 0 : index
    %35 = vector.load %arg1[%c0_33, %c7, %c0_34, %c0_35] : memref<1x16x8x16xbf16, #tpu.memory_space<vmem>>, vector<1x1x8x16xbf16>
    %36 = vector.shape_cast %35 : vector<1x1x8x16xbf16> to vector<8x16xbf16>
    %37 = arith.maximumf %34, %36 : vector<8x16xbf16>
    %38 = vector.extract_strided_slice %37 {offsets = [0, 0], sizes = [8, 8], strides = [1, 1]} : vector<8x16xbf16> to vector<8x8xbf16>
    %39 = vector.extract_strided_slice %37 {offsets = [0, 8], sizes = [8, 8], strides = [1, 1]} : vector<8x16xbf16> to vector<8x8xbf16>
    %40 = arith.maximumf %38, %39 : vector<8x8xbf16>
    %c0_36 = arith.constant 0 : index
    %c3_37 = arith.constant 3 : index
    %c0_38 = arith.constant 0 : index
    %c0_39 = arith.constant 0 : index
    %41 = vector.load %arg2[%c0_36, %c3_37, %c0_38, %c0_39] : memref<1x8x8x8xbf16, #tpu.memory_space<vmem>>, vector<1x1x8x8xbf16>
    %42 = vector.shape_cast %41 : vector<1x1x8x8xbf16> to vector<8x8xbf16>
    %43 = vector.shape_cast %40 : vector<8x8xbf16> to vector<1x1x8x8xbf16>
    tpu.vector_store %arg2[%c0_36, %c3_37, %c0_38, %c0_39], %43 {strides = array<i32>} : memref<1x8x8x8xbf16, #tpu.memory_space<vmem>>, vector<1x1x8x8xbf16>,
    %c0_40 = arith.constant 0 : index
    %c8 = arith.constant 8 : index
    %c0_41 = arith.constant 0 : index
    %c0_42 = arith.constant 0 : index
    %44 = vector.load %arg1[%c0_40, %c8, %c0_41, %c0_42] : memref<1x16x8x16xbf16, #tpu.memory_space<vmem>>, vector<1x1x8x16xbf16>
    %45 = vector.shape_cast %44 : vector<1x1x8x16xbf16> to vector<8x16xbf16>
    %c0_43 = arith.constant 0 : index
    %c9 = arith.constant 9 : index
    %c0_44 = arith.constant 0 : index
    %c0_45 = arith.constant 0 : index
    %46 = vector.load %arg1[%c0_43, %c9, %c0_44, %c0_45] : memref<1x16x8x16xbf16, #tpu.memory_space<vmem>>, vector<1x1x8x16xbf16>
    %47 = vector.shape_cast %46 : vector<1x1x8x16xbf16> to vector<8x16xbf16>
    %48 = arith.maximumf %45, %47 : vector<8x16xbf16>
    %49 = vector.extract_strided_slice %48 {offsets = [0, 0], sizes = [8, 8], strides = [1, 1]} : vector<8x16xbf16> to vector<8x8xbf16>
    %50 = vector.extract_strided_slice %48 {offsets = [0, 8], sizes = [8, 8], strides = [1, 1]} : vector<8x16xbf16> to vector<8x8xbf16>
    %51 = arith.maximumf %49, %50 : vector<8x8xbf16>
    %c0_46 = arith.constant 0 : index
    %c4_47 = arith.constant 4 : index
    %c0_48 = arith.constant 0 : index
    %c0_49 = arith.constant 0 : index
    %52 = vector.load %arg2[%c0_46, %c4_47, %c0_48, %c0_49] : memref<1x8x8x8xbf16, #tpu.memory_space<vmem>>, vector<1x1x8x8xbf16>
    %53 = vector.shape_cast %52 : vector<1x1x8x8xbf16> to vector<8x8xbf16>
    %54 = vector.shape_cast %51 : vector<8x8xbf16> to vector<1x1x8x8xbf16>
    tpu.vector_store %arg2[%c0_46, %c4_47, %c0_48, %c0_49], %54 {strides = array<i32>} : memref<1x8x8x8xbf16, #tpu.memory_space<vmem>>, vector<1x1x8x8xbf16>,
    %c0_50 = arith.constant 0 : index
    %c10 = arith.constant 10 : index
    %c0_51 = arith.constant 0 : index
    %c0_52 = arith.constant 0 : index
    %55 = vector.load %arg1[%c0_50, %c10, %c0_51, %c0_52] : memref<1x16x8x16xbf16, #tpu.memory_space<vmem>>, vector<1x1x8x16xbf16>
    %56 = vector.shape_cast %55 : vector<1x1x8x16xbf16> to vector<8x16xbf16>
    %c0_53 = arith.constant 0 : index
    %c11 = arith.constant 11 : index
    %c0_54 = arith.constant 0 : index
    %c0_55 = arith.constant 0 : index
    %57 = vector.load %arg1[%c0_53, %c11, %c0_54, %c0_55] : memref<1x16x8x16xbf16, #tpu.memory_space<vmem>>, vector<1x1x8x16xbf16>
    %58 = vector.shape_cast %57 : vector<1x1x8x16xbf16> to vector<8x16xbf16>
    %59 = arith.maximumf %56, %58 : vector<8x16xbf16>
    %60 = vector.extract_strided_slice %59 {offsets = [0, 0], sizes = [8, 8], strides = [1, 1]} : vector<8x16xbf16> to vector<8x8xbf16>
    %61 = vector.extract_strided_slice %59 {offsets = [0, 8], sizes = [8, 8], strides = [1, 1]} : vector<8x16xbf16> to vector<8x8xbf16>
    %62 = arith.maximumf %60, %61 : vector<8x8xbf16>
    %c0_56 = arith.constant 0 : index
    %c5_57 = arith.constant 5 : index
    %c0_58 = arith.constant 0 : index
    %c0_59 = arith.constant 0 : index
    %63 = vector.load %arg2[%c0_56, %c5_57, %c0_58, %c0_59] : memref<1x8x8x8xbf16, #tpu.memory_space<vmem>>, vector<1x1x8x8xbf16>
    %64 = vector.shape_cast %63 : vector<1x1x8x8xbf16> to vector<8x8xbf16>
    %65 = vector.shape_cast %62 : vector<8x8xbf16> to vector<1x1x8x8xbf16>
    tpu.vector_store %arg2[%c0_56, %c5_57, %c0_58, %c0_59], %65 {strides = array<i32>} : memref<1x8x8x8xbf16, #tpu.memory_space<vmem>>, vector<1x1x8x8xbf16>,
    %c0_60 = arith.constant 0 : index
    %c12 = arith.constant 12 : index
    %c0_61 = arith.constant 0 : index
    %c0_62 = arith.constant 0 : index
    %66 = vector.load %arg1[%c0_60, %c12, %c0_61, %c0_62] : memref<1x16x8x16xbf16, #tpu.memory_space<vmem>>, vector<1x1x8x16xbf16>
    %67 = vector.shape_cast %66 : vector<1x1x8x16xbf16> to vector<8x16xbf16>
    %c0_63 = arith.constant 0 : index
    %c13 = arith.constant 13 : index
    %c0_64 = arith.constant 0 : index
    %c0_65 = arith.constant 0 : index
    %68 = vector.load %arg1[%c0_63, %c13, %c0_64, %c0_65] : memref<1x16x8x16xbf16, #tpu.memory_space<vmem>>, vector<1x1x8x16xbf16>
    %69 = vector.shape_cast %68 : vector<1x1x8x16xbf16> to vector<8x16xbf16>
    %70 = arith.maximumf %67, %69 : vector<8x16xbf16>
    %71 = vector.extract_strided_slice %70 {offsets = [0, 0], sizes = [8, 8], strides = [1, 1]} : vector<8x16xbf16> to vector<8x8xbf16>
    %72 = vector.extract_strided_slice %70 {offsets = [0, 8], sizes = [8, 8], strides = [1, 1]} : vector<8x16xbf16> to vector<8x8xbf16>
    %73 = arith.maximumf %71, %72 : vector<8x8xbf16>
    %c0_66 = arith.constant 0 : index
    %c6_67 = arith.constant 6 : index
    %c0_68 = arith.constant 0 : index
    %c0_69 = arith.constant 0 : index
    %74 = vector.load %arg2[%c0_66, %c6_67, %c0_68, %c0_69] : memref<1x8x8x8xbf16, #tpu.memory_space<vmem>>, vector<1x1x8x8xbf16>
    %75 = vector.shape_cast %74 : vector<1x1x8x8xbf16> to vector<8x8xbf16>
    %76 = vector.shape_cast %73 : vector<8x8xbf16> to vector<1x1x8x8xbf16>
    tpu.vector_store %arg2[%c0_66, %c6_67, %c0_68, %c0_69], %76 {strides = array<i32>} : memref<1x8x8x8xbf16, #tpu.memory_space<vmem>>, vector<1x1x8x8xbf16>,
    %c0_70 = arith.constant 0 : index
    %c14 = arith.constant 14 : index
    %c0_71 = arith.constant 0 : index
    %c0_72 = arith.constant 0 : index
    %77 = vector.load %arg1[%c0_70, %c14, %c0_71, %c0_72] : memref<1x16x8x16xbf16, #tpu.memory_space<vmem>>, vector<1x1x8x16xbf16>
    %78 = vector.shape_cast %77 : vector<1x1x8x16xbf16> to vector<8x16xbf16>
    %c0_73 = arith.constant 0 : index
    %c15 = arith.constant 15 : index
    %c0_74 = arith.constant 0 : index
    %c0_75 = arith.constant 0 : index
    %79 = vector.load %arg1[%c0_73, %c15, %c0_74, %c0_75] : memref<1x16x8x16xbf16, #tpu.memory_space<vmem>>, vector<1x1x8x16xbf16>
    %80 = vector.shape_cast %79 : vector<1x1x8x16xbf16> to vector<8x16xbf16>
    %81 = arith.maximumf %78, %80 : vector<8x16xbf16>
    %82 = vector.extract_strided_slice %81 {offsets = [0, 0], sizes = [8, 8], strides = [1, 1]} : vector<8x16xbf16> to vector<8x8xbf16>
    %83 = vector.extract_strided_slice %81 {offsets = [0, 8], sizes = [8, 8], strides = [1, 1]} : vector<8x16xbf16> to vector<8x8xbf16>
    %84 = arith.maximumf %82, %83 : vector<8x8xbf16>
    %c0_76 = arith.constant 0 : index
    %c7_77 = arith.constant 7 : index
    %c0_78 = arith.constant 0 : index
    %c0_79 = arith.constant 0 : index
    %85 = vector.load %arg2[%c0_76, %c7_77, %c0_78, %c0_79] : memref<1x8x8x8xbf16, #tpu.memory_space<vmem>>, vector<1x1x8x8xbf16>
    %86 = vector.shape_cast %85 : vector<1x1x8x8xbf16> to vector<8x8xbf16>
    %87 = vector.shape_cast %84 : vector<8x8xbf16> to vector<1x1x8x8xbf16>
    tpu.vector_store %arg2[%c0_76, %c7_77, %c0_78, %c0_79], %87 {strides = array<i32>} : memref<1x8x8x8xbf16, #tpu.memory_space<vmem>>, vector<1x1x8x8xbf16>,
    return
  }
  func.func @transform_0(%arg0: i32) -> (i32, i32, i32, i32) {
    %c0_i32 = arith.constant 0 : i32
    %c0_i32_0 = arith.constant 0 : i32
    %c0_i32_1 = arith.constant 0 : i32
    %c0_i32_2 = arith.constant 0 : i32
    return %arg0, %c0_i32, %c0_i32_0, %c0_i32_1 : i32, i32, i32, i32
  }
  func.func @transform_1(%arg0: i32) -> (i32, i32, i32, i32) {
    %c0_i32 = arith.constant 0 : i32
    %c0_i32_0 = arith.constant 0 : i32
    %c0_i32_1 = arith.constant 0 : i32
    %c0_i32_2 = arith.constant 0 : i32
    return %arg0, %c0_i32, %c0_i32_0, %c0_i32_1 : i32, i32, i32, i32
  }
}

module attributes {stable_mosaic.version = 11 : i64} {
  func.func @conv3x3_kernel(%arg0: i32, %arg1: i32, %arg2: memref<1x8x64xbf16, #tpu.memory_space<vmem>>, %arg3: memref<1x3x64x128xbf16, #tpu.memory_space<vmem>>, %arg4: memref<1x1x128xf32, #tpu.memory_space<vmem>>, %arg5: memref<1x8x128xbf16, #tpu.memory_space<vmem>>, %arg6: memref<8x128xf32, #tpu.memory_space<vmem>>) attributes {dimension_semantics = [#tpu.dimension_semantics<parallel>, #tpu.dimension_semantics<parallel>], iteration_bounds = array<i64: 2, 2>, scalar_prefetch = 0 : i64, scratch_operands = 1 : i64, tpu.core_type = #tpu.core_type<tc>, window_params = [{transform_indices = @transform_0, window_bounds = array<i64: 1, 8, 64>}, {transform_indices = @transform_1, window_bounds = array<i64: 1, 3, 64, 128>}, {transform_indices = @transform_2, window_bounds = array<i64: 1, 1, 128>}, {transform_indices = @transform_3, window_bounds = array<i64: 1, 8, 128>}]} {
    %c0 = arith.constant 0 : index
    %c0_0 = arith.constant 0 : index
    %c0_1 = arith.constant 0 : index
    %0 = vector.load %arg2[%c0, %c0_0, %c0_1] : memref<1x8x64xbf16, #tpu.memory_space<vmem>>, vector<1x8x64xbf16>
    %1 = vector.shape_cast %0 : vector<1x8x64xbf16> to vector<8x64xbf16>
    %c0_2 = arith.constant 0 : index
    %c1 = arith.constant 1 : index
    %c0_3 = arith.constant 0 : index
    %c0_4 = arith.constant 0 : index
    %2 = vector.load %arg3[%c0_2, %c1, %c0_3, %c0_4] : memref<1x3x64x128xbf16, #tpu.memory_space<vmem>>, vector<1x1x64x128xbf16>
    %3 = vector.shape_cast %2 : vector<1x1x64x128xbf16> to vector<64x128xbf16>
    %cst = arith.constant dense<0.000000e+00> : vector<8x128xf32>
    %4 = tpu.matmul %1, %3, %cst {dimension_numbers = #tpu.dot_dimension_numbers<[1], [0], [0], [1], [0, 0, 1, 1], [], []>} : vector<8x64xbf16>, vector<64x128xbf16>, vector<8x128xf32> -> vector<8x128xf32>
    %c0_5 = arith.constant 0 : index
    %c0_6 = arith.constant 0 : index
    %5 = vector.load %arg6[%c0_5, %c0_6] : memref<8x128xf32, #tpu.memory_space<vmem>>, vector<8x128xf32>
    tpu.vector_store %arg6[%c0_5, %c0_6], %4 {strides = array<i32>} : memref<8x128xf32, #tpu.memory_space<vmem>>, vector<8x128xf32>,
    %c1_7 = arith.constant 1 : index
    %c0_8 = arith.constant 0 : index
    %6 = vector.load %arg6[%c1_7, %c0_8] : memref<8x128xf32, #tpu.memory_space<vmem>>, vector<7x128xf32>
    %7 = vector.extract_strided_slice %1 {offsets = [0, 0], sizes = [7, 64], strides = [1, 1]} : vector<8x64xbf16> to vector<7x64xbf16>
    %c0_9 = arith.constant 0 : index
    %c0_10 = arith.constant 0 : index
    %c0_11 = arith.constant 0 : index
    %c0_12 = arith.constant 0 : index
    %8 = vector.load %arg3[%c0_9, %c0_10, %c0_11, %c0_12] : memref<1x3x64x128xbf16, #tpu.memory_space<vmem>>, vector<1x1x64x128xbf16>
    %9 = vector.shape_cast %8 : vector<1x1x64x128xbf16> to vector<64x128xbf16>
    %cst_13 = arith.constant dense<0.000000e+00> : vector<7x128xf32>
    %10 = tpu.matmul %7, %9, %cst_13 {dimension_numbers = #tpu.dot_dimension_numbers<[1], [0], [0], [1], [0, 0, 1, 1], [], []>} : vector<7x64xbf16>, vector<64x128xbf16>, vector<7x128xf32> -> vector<7x128xf32>
    %11 = arith.addf %6, %10 : vector<7x128xf32>
    %c1_14 = arith.constant 1 : index
    %c0_15 = arith.constant 0 : index
    %12 = vector.load %arg6[%c1_14, %c0_15] : memref<8x128xf32, #tpu.memory_space<vmem>>, vector<7x128xf32>
    tpu.vector_store %arg6[%c1_14, %c0_15], %11 {strides = array<i32>} : memref<8x128xf32, #tpu.memory_space<vmem>>, vector<7x128xf32>,
    %c0_16 = arith.constant 0 : index
    %c0_17 = arith.constant 0 : index
    %13 = vector.load %arg6[%c0_16, %c0_17] : memref<8x128xf32, #tpu.memory_space<vmem>>, vector<7x128xf32>
    %14 = vector.extract_strided_slice %1 {offsets = [1, 0], sizes = [7, 64], strides = [1, 1]} : vector<8x64xbf16> to vector<7x64xbf16>
    %c0_18 = arith.constant 0 : index
    %c2 = arith.constant 2 : index
    %c0_19 = arith.constant 0 : index
    %c0_20 = arith.constant 0 : index
    %15 = vector.load %arg3[%c0_18, %c2, %c0_19, %c0_20] : memref<1x3x64x128xbf16, #tpu.memory_space<vmem>>, vector<1x1x64x128xbf16>
    %16 = vector.shape_cast %15 : vector<1x1x64x128xbf16> to vector<64x128xbf16>
    %cst_21 = arith.constant dense<0.000000e+00> : vector<7x128xf32>
    %17 = tpu.matmul %14, %16, %cst_21 {dimension_numbers = #tpu.dot_dimension_numbers<[1], [0], [0], [1], [0, 0, 1, 1], [], []>} : vector<7x64xbf16>, vector<64x128xbf16>, vector<7x128xf32> -> vector<7x128xf32>
    %18 = arith.addf %13, %17 : vector<7x128xf32>
    %c0_22 = arith.constant 0 : index
    %c0_23 = arith.constant 0 : index
    %19 = vector.load %arg6[%c0_22, %c0_23] : memref<8x128xf32, #tpu.memory_space<vmem>>, vector<7x128xf32>
    tpu.vector_store %arg6[%c0_22, %c0_23], %18 {strides = array<i32>} : memref<8x128xf32, #tpu.memory_space<vmem>>, vector<7x128xf32>,
    %c0_24 = arith.constant 0 : index
    %c0_25 = arith.constant 0 : index
    %20 = vector.load %arg6[%c0_24, %c0_25] : memref<8x128xf32, #tpu.memory_space<vmem>>, vector<8x128xf32>
    %c0_26 = arith.constant 0 : index
    %c0_27 = arith.constant 0 : index
    %c0_28 = arith.constant 0 : index
    %21 = vector.load %arg4[%c0_26, %c0_27, %c0_28] : memref<1x1x128xf32, #tpu.memory_space<vmem>>, vector<1x1x128xf32>
    %22 = vector.shape_cast %21 : vector<1x1x128xf32> to vector<1x128xf32>
    %23 = vector.broadcast %22 : vector<1x128xf32> to vector<8x128xf32>
    %24 = arith.addf %20, %23 : vector<8x128xf32>
    %cst_29 = arith.constant 0.000000e+00 : f32
    %25 = vector.broadcast %cst_29 : f32 to vector<8x128xf32>
    %26 = arith.maximumf %24, %25 : vector<8x128xf32>
    %27 = arith.truncf %26 : vector<8x128xf32> to vector<8x128xbf16>
    %c0_30 = arith.constant 0 : index
    %c0_31 = arith.constant 0 : index
    %c0_32 = arith.constant 0 : index
    %28 = vector.load %arg5[%c0_30, %c0_31, %c0_32] : memref<1x8x128xbf16, #tpu.memory_space<vmem>>, vector<1x8x128xbf16>
    %29 = vector.shape_cast %28 : vector<1x8x128xbf16> to vector<8x128xbf16>
    %30 = vector.shape_cast %27 : vector<8x128xbf16> to vector<1x8x128xbf16>
    tpu.vector_store %arg5[%c0_30, %c0_31, %c0_32], %30 {strides = array<i32>} : memref<1x8x128xbf16, #tpu.memory_space<vmem>>, vector<1x8x128xbf16>,
    return
  }
  func.func @transform_0(%arg0: i32, %arg1: i32) -> (i32, i32, i32) {
    %c2_i32 = arith.constant 2 : i32
    %0 = arith.muli %arg0, %c2_i32 : i32
    %1 = arith.addi %0, %arg1 : i32
    %c0_i32 = arith.constant 0 : i32
    %c0_i32_0 = arith.constant 0 : i32
    %c0_i32_1 = arith.constant 0 : i32
    return %1, %c0_i32, %c0_i32_0 : i32, i32, i32
  }
  func.func @transform_1(%arg0: i32, %arg1: i32) -> (i32, i32, i32, i32) {
    %c0_i32 = arith.constant 0 : i32
    %c0_i32_0 = arith.constant 0 : i32
    %c0_i32_1 = arith.constant 0 : i32
    %c0_i32_2 = arith.constant 0 : i32
    return %arg0, %c0_i32, %c0_i32_0, %c0_i32_1 : i32, i32, i32, i32
  }
  func.func @transform_2(%arg0: i32, %arg1: i32) -> (i32, i32, i32) {
    %c0_i32 = arith.constant 0 : i32
    %c0_i32_0 = arith.constant 0 : i32
    %c0_i32_1 = arith.constant 0 : i32
    return %arg0, %c0_i32, %c0_i32_0 : i32, i32, i32
  }
  func.func @transform_3(%arg0: i32, %arg1: i32) -> (i32, i32, i32) {
    %c2_i32 = arith.constant 2 : i32
    %0 = arith.muli %arg0, %c2_i32 : i32
    %1 = arith.addi %0, %arg1 : i32
    %c0_i32 = arith.constant 0 : i32
    %c0_i32_0 = arith.constant 0 : i32
    %c0_i32_1 = arith.constant 0 : i32
    return %1, %c0_i32, %c0_i32_0 : i32, i32, i32
  }
}

module attributes {stable_mosaic.version = 11 : i64} {
  func.func @conv3x3_kernel(%arg0: i32, %arg1: i32, %arg2: memref<1x8x128xbf16, #tpu.memory_space<vmem>>, %arg3: memref<1x3x128x128xbf16, #tpu.memory_space<vmem>>, %arg4: memref<1x1x128xf32, #tpu.memory_space<vmem>>, %arg5: memref<1x8x128xbf16, #tpu.memory_space<vmem>>, %arg6: memref<8x128xf32, #tpu.memory_space<vmem>>) attributes {dimension_semantics = [#tpu.dimension_semantics<parallel>, #tpu.dimension_semantics<parallel>], iteration_bounds = array<i64: 2, 2>, scalar_prefetch = 0 : i64, scratch_operands = 1 : i64, tpu.core_type = #tpu.core_type<tc>, window_params = [{transform_indices = @transform_0, window_bounds = array<i64: 1, 8, 128>}, {transform_indices = @transform_1, window_bounds = array<i64: 1, 3, 128, 128>}, {transform_indices = @transform_2, window_bounds = array<i64: 1, 1, 128>}, {transform_indices = @transform_3, window_bounds = array<i64: 1, 8, 128>}]} {
    %c0 = arith.constant 0 : index
    %c0_0 = arith.constant 0 : index
    %c0_1 = arith.constant 0 : index
    %0 = vector.load %arg2[%c0, %c0_0, %c0_1] : memref<1x8x128xbf16, #tpu.memory_space<vmem>>, vector<1x8x128xbf16>
    %1 = vector.shape_cast %0 : vector<1x8x128xbf16> to vector<8x128xbf16>
    %c0_2 = arith.constant 0 : index
    %c1 = arith.constant 1 : index
    %c0_3 = arith.constant 0 : index
    %c0_4 = arith.constant 0 : index
    %2 = vector.load %arg3[%c0_2, %c1, %c0_3, %c0_4] : memref<1x3x128x128xbf16, #tpu.memory_space<vmem>>, vector<1x1x128x128xbf16>
    %3 = vector.shape_cast %2 : vector<1x1x128x128xbf16> to vector<128x128xbf16>
    %cst = arith.constant dense<0.000000e+00> : vector<8x128xf32>
    %4 = tpu.matmul %1, %3, %cst {dimension_numbers = #tpu.dot_dimension_numbers<[1], [0], [0], [1], [0, 0, 1, 1], [], []>} : vector<8x128xbf16>, vector<128x128xbf16>, vector<8x128xf32> -> vector<8x128xf32>
    %c0_5 = arith.constant 0 : index
    %c0_6 = arith.constant 0 : index
    %5 = vector.load %arg6[%c0_5, %c0_6] : memref<8x128xf32, #tpu.memory_space<vmem>>, vector<8x128xf32>
    tpu.vector_store %arg6[%c0_5, %c0_6], %4 {strides = array<i32>} : memref<8x128xf32, #tpu.memory_space<vmem>>, vector<8x128xf32>,
    %c1_7 = arith.constant 1 : index
    %c0_8 = arith.constant 0 : index
    %6 = vector.load %arg6[%c1_7, %c0_8] : memref<8x128xf32, #tpu.memory_space<vmem>>, vector<7x128xf32>
    %7 = vector.extract_strided_slice %1 {offsets = [0, 0], sizes = [7, 128], strides = [1, 1]} : vector<8x128xbf16> to vector<7x128xbf16>
    %c0_9 = arith.constant 0 : index
    %c0_10 = arith.constant 0 : index
    %c0_11 = arith.constant 0 : index
    %c0_12 = arith.constant 0 : index
    %8 = vector.load %arg3[%c0_9, %c0_10, %c0_11, %c0_12] : memref<1x3x128x128xbf16, #tpu.memory_space<vmem>>, vector<1x1x128x128xbf16>
    %9 = vector.shape_cast %8 : vector<1x1x128x128xbf16> to vector<128x128xbf16>
    %cst_13 = arith.constant dense<0.000000e+00> : vector<7x128xf32>
    %10 = tpu.matmul %7, %9, %cst_13 {dimension_numbers = #tpu.dot_dimension_numbers<[1], [0], [0], [1], [0, 0, 1, 1], [], []>} : vector<7x128xbf16>, vector<128x128xbf16>, vector<7x128xf32> -> vector<7x128xf32>
    %11 = arith.addf %6, %10 : vector<7x128xf32>
    %c1_14 = arith.constant 1 : index
    %c0_15 = arith.constant 0 : index
    %12 = vector.load %arg6[%c1_14, %c0_15] : memref<8x128xf32, #tpu.memory_space<vmem>>, vector<7x128xf32>
    tpu.vector_store %arg6[%c1_14, %c0_15], %11 {strides = array<i32>} : memref<8x128xf32, #tpu.memory_space<vmem>>, vector<7x128xf32>,
    %c0_16 = arith.constant 0 : index
    %c0_17 = arith.constant 0 : index
    %13 = vector.load %arg6[%c0_16, %c0_17] : memref<8x128xf32, #tpu.memory_space<vmem>>, vector<7x128xf32>
    %14 = vector.extract_strided_slice %1 {offsets = [1, 0], sizes = [7, 128], strides = [1, 1]} : vector<8x128xbf16> to vector<7x128xbf16>
    %c0_18 = arith.constant 0 : index
    %c2 = arith.constant 2 : index
    %c0_19 = arith.constant 0 : index
    %c0_20 = arith.constant 0 : index
    %15 = vector.load %arg3[%c0_18, %c2, %c0_19, %c0_20] : memref<1x3x128x128xbf16, #tpu.memory_space<vmem>>, vector<1x1x128x128xbf16>
    %16 = vector.shape_cast %15 : vector<1x1x128x128xbf16> to vector<128x128xbf16>
    %cst_21 = arith.constant dense<0.000000e+00> : vector<7x128xf32>
    %17 = tpu.matmul %14, %16, %cst_21 {dimension_numbers = #tpu.dot_dimension_numbers<[1], [0], [0], [1], [0, 0, 1, 1], [], []>} : vector<7x128xbf16>, vector<128x128xbf16>, vector<7x128xf32> -> vector<7x128xf32>
    %18 = arith.addf %13, %17 : vector<7x128xf32>
    %c0_22 = arith.constant 0 : index
    %c0_23 = arith.constant 0 : index
    %19 = vector.load %arg6[%c0_22, %c0_23] : memref<8x128xf32, #tpu.memory_space<vmem>>, vector<7x128xf32>
    tpu.vector_store %arg6[%c0_22, %c0_23], %18 {strides = array<i32>} : memref<8x128xf32, #tpu.memory_space<vmem>>, vector<7x128xf32>,
    %c0_24 = arith.constant 0 : index
    %c0_25 = arith.constant 0 : index
    %20 = vector.load %arg6[%c0_24, %c0_25] : memref<8x128xf32, #tpu.memory_space<vmem>>, vector<8x128xf32>
    %c0_26 = arith.constant 0 : index
    %c0_27 = arith.constant 0 : index
    %c0_28 = arith.constant 0 : index
    %21 = vector.load %arg4[%c0_26, %c0_27, %c0_28] : memref<1x1x128xf32, #tpu.memory_space<vmem>>, vector<1x1x128xf32>
    %22 = vector.shape_cast %21 : vector<1x1x128xf32> to vector<1x128xf32>
    %23 = vector.broadcast %22 : vector<1x128xf32> to vector<8x128xf32>
    %24 = arith.addf %20, %23 : vector<8x128xf32>
    %cst_29 = arith.constant 0.000000e+00 : f32
    %25 = vector.broadcast %cst_29 : f32 to vector<8x128xf32>
    %26 = arith.maximumf %24, %25 : vector<8x128xf32>
    %27 = arith.truncf %26 : vector<8x128xf32> to vector<8x128xbf16>
    %c0_30 = arith.constant 0 : index
    %c0_31 = arith.constant 0 : index
    %c0_32 = arith.constant 0 : index
    %28 = vector.load %arg5[%c0_30, %c0_31, %c0_32] : memref<1x8x128xbf16, #tpu.memory_space<vmem>>, vector<1x8x128xbf16>
    %29 = vector.shape_cast %28 : vector<1x8x128xbf16> to vector<8x128xbf16>
    %30 = vector.shape_cast %27 : vector<8x128xbf16> to vector<1x8x128xbf16>
    tpu.vector_store %arg5[%c0_30, %c0_31, %c0_32], %30 {strides = array<i32>} : memref<1x8x128xbf16, #tpu.memory_space<vmem>>, vector<1x8x128xbf16>,
    return
  }
  func.func @transform_0(%arg0: i32, %arg1: i32) -> (i32, i32, i32) {
    %c2_i32 = arith.constant 2 : i32
    %0 = arith.muli %arg0, %c2_i32 : i32
    %1 = arith.addi %0, %arg1 : i32
    %c0_i32 = arith.constant 0 : i32
    %c0_i32_0 = arith.constant 0 : i32
    %c0_i32_1 = arith.constant 0 : i32
    return %1, %c0_i32, %c0_i32_0 : i32, i32, i32
  }
  func.func @transform_1(%arg0: i32, %arg1: i32) -> (i32, i32, i32, i32) {
    %c0_i32 = arith.constant 0 : i32
    %c0_i32_0 = arith.constant 0 : i32
    %c0_i32_1 = arith.constant 0 : i32
    %c0_i32_2 = arith.constant 0 : i32
    return %arg0, %c0_i32, %c0_i32_0, %c0_i32_1 : i32, i32, i32, i32
  }
  func.func @transform_2(%arg0: i32, %arg1: i32) -> (i32, i32, i32) {
    %c0_i32 = arith.constant 0 : i32
    %c0_i32_0 = arith.constant 0 : i32
    %c0_i32_1 = arith.constant 0 : i32
    return %arg0, %c0_i32, %c0_i32_0 : i32, i32, i32
  }
  func.func @transform_3(%arg0: i32, %arg1: i32) -> (i32, i32, i32) {
    %c2_i32 = arith.constant 2 : i32
    %0 = arith.muli %arg0, %c2_i32 : i32
    %1 = arith.addi %0, %arg1 : i32
    %c0_i32 = arith.constant 0 : i32
    %c0_i32_0 = arith.constant 0 : i32
    %c0_i32_1 = arith.constant 0 : i32
    return %1, %c0_i32, %c0_i32_0 : i32, i32, i32
  }
}

module attributes {stable_mosaic.version = 11 : i64} {
  func.func @conv3x3_kernel(%arg0: i32, %arg1: i32, %arg2: memref<1x4x64xbf16, #tpu.memory_space<vmem>>, %arg3: memref<1x3x64x128xbf16, #tpu.memory_space<vmem>>, %arg4: memref<1x1x128xf32, #tpu.memory_space<vmem>>, %arg5: memref<1x4x128xbf16, #tpu.memory_space<vmem>>, %arg6: memref<4x128xf32, #tpu.memory_space<vmem>>) attributes {dimension_semantics = [#tpu.dimension_semantics<parallel>, #tpu.dimension_semantics<parallel>], iteration_bounds = array<i64: 2, 2>, scalar_prefetch = 0 : i64, scratch_operands = 1 : i64, tpu.core_type = #tpu.core_type<tc>, window_params = [{transform_indices = @transform_0, window_bounds = array<i64: 1, 4, 64>}, {transform_indices = @transform_1, window_bounds = array<i64: 1, 3, 64, 128>}, {transform_indices = @transform_2, window_bounds = array<i64: 1, 1, 128>}, {transform_indices = @transform_3, window_bounds = array<i64: 1, 4, 128>}]} {
    %c0 = arith.constant 0 : index
    %c0_0 = arith.constant 0 : index
    %c0_1 = arith.constant 0 : index
    %0 = vector.load %arg2[%c0, %c0_0, %c0_1] : memref<1x4x64xbf16, #tpu.memory_space<vmem>>, vector<1x4x64xbf16>
    %1 = vector.shape_cast %0 : vector<1x4x64xbf16> to vector<4x64xbf16>
    %c0_2 = arith.constant 0 : index
    %c1 = arith.constant 1 : index
    %c0_3 = arith.constant 0 : index
    %c0_4 = arith.constant 0 : index
    %2 = vector.load %arg3[%c0_2, %c1, %c0_3, %c0_4] : memref<1x3x64x128xbf16, #tpu.memory_space<vmem>>, vector<1x1x64x128xbf16>
    %3 = vector.shape_cast %2 : vector<1x1x64x128xbf16> to vector<64x128xbf16>
    %cst = arith.constant dense<0.000000e+00> : vector<4x128xf32>
    %4 = tpu.matmul %1, %3, %cst {dimension_numbers = #tpu.dot_dimension_numbers<[1], [0], [0], [1], [0, 0, 1, 1], [], []>} : vector<4x64xbf16>, vector<64x128xbf16>, vector<4x128xf32> -> vector<4x128xf32>
    %c0_5 = arith.constant 0 : index
    %c0_6 = arith.constant 0 : index
    %5 = vector.load %arg6[%c0_5, %c0_6] : memref<4x128xf32, #tpu.memory_space<vmem>>, vector<4x128xf32>
    tpu.vector_store %arg6[%c0_5, %c0_6], %4 {strides = array<i32>} : memref<4x128xf32, #tpu.memory_space<vmem>>, vector<4x128xf32>,
    %c1_7 = arith.constant 1 : index
    %c0_8 = arith.constant 0 : index
    %6 = vector.load %arg6[%c1_7, %c0_8] : memref<4x128xf32, #tpu.memory_space<vmem>>, vector<3x128xf32>
    %7 = vector.extract_strided_slice %1 {offsets = [0, 0], sizes = [3, 64], strides = [1, 1]} : vector<4x64xbf16> to vector<3x64xbf16>
    %c0_9 = arith.constant 0 : index
    %c0_10 = arith.constant 0 : index
    %c0_11 = arith.constant 0 : index
    %c0_12 = arith.constant 0 : index
    %8 = vector.load %arg3[%c0_9, %c0_10, %c0_11, %c0_12] : memref<1x3x64x128xbf16, #tpu.memory_space<vmem>>, vector<1x1x64x128xbf16>
    %9 = vector.shape_cast %8 : vector<1x1x64x128xbf16> to vector<64x128xbf16>
    %cst_13 = arith.constant dense<0.000000e+00> : vector<3x128xf32>
    %10 = tpu.matmul %7, %9, %cst_13 {dimension_numbers = #tpu.dot_dimension_numbers<[1], [0], [0], [1], [0, 0, 1, 1], [], []>} : vector<3x64xbf16>, vector<64x128xbf16>, vector<3x128xf32> -> vector<3x128xf32>
    %11 = arith.addf %6, %10 : vector<3x128xf32>
    %c1_14 = arith.constant 1 : index
    %c0_15 = arith.constant 0 : index
    %12 = vector.load %arg6[%c1_14, %c0_15] : memref<4x128xf32, #tpu.memory_space<vmem>>, vector<3x128xf32>
    tpu.vector_store %arg6[%c1_14, %c0_15], %11 {strides = array<i32>} : memref<4x128xf32, #tpu.memory_space<vmem>>, vector<3x128xf32>,
    %c0_16 = arith.constant 0 : index
    %c0_17 = arith.constant 0 : index
    %13 = vector.load %arg6[%c0_16, %c0_17] : memref<4x128xf32, #tpu.memory_space<vmem>>, vector<3x128xf32>
    %14 = vector.extract_strided_slice %1 {offsets = [1, 0], sizes = [3, 64], strides = [1, 1]} : vector<4x64xbf16> to vector<3x64xbf16>
    %c0_18 = arith.constant 0 : index
    %c2 = arith.constant 2 : index
    %c0_19 = arith.constant 0 : index
    %c0_20 = arith.constant 0 : index
    %15 = vector.load %arg3[%c0_18, %c2, %c0_19, %c0_20] : memref<1x3x64x128xbf16, #tpu.memory_space<vmem>>, vector<1x1x64x128xbf16>
    %16 = vector.shape_cast %15 : vector<1x1x64x128xbf16> to vector<64x128xbf16>
    %cst_21 = arith.constant dense<0.000000e+00> : vector<3x128xf32>
    %17 = tpu.matmul %14, %16, %cst_21 {dimension_numbers = #tpu.dot_dimension_numbers<[1], [0], [0], [1], [0, 0, 1, 1], [], []>} : vector<3x64xbf16>, vector<64x128xbf16>, vector<3x128xf32> -> vector<3x128xf32>
    %18 = arith.addf %13, %17 : vector<3x128xf32>
    %c0_22 = arith.constant 0 : index
    %c0_23 = arith.constant 0 : index
    %19 = vector.load %arg6[%c0_22, %c0_23] : memref<4x128xf32, #tpu.memory_space<vmem>>, vector<3x128xf32>
    tpu.vector_store %arg6[%c0_22, %c0_23], %18 {strides = array<i32>} : memref<4x128xf32, #tpu.memory_space<vmem>>, vector<3x128xf32>,
    %c0_24 = arith.constant 0 : index
    %c0_25 = arith.constant 0 : index
    %20 = vector.load %arg6[%c0_24, %c0_25] : memref<4x128xf32, #tpu.memory_space<vmem>>, vector<4x128xf32>
    %c0_26 = arith.constant 0 : index
    %c0_27 = arith.constant 0 : index
    %c0_28 = arith.constant 0 : index
    %21 = vector.load %arg4[%c0_26, %c0_27, %c0_28] : memref<1x1x128xf32, #tpu.memory_space<vmem>>, vector<1x1x128xf32>
    %22 = vector.shape_cast %21 : vector<1x1x128xf32> to vector<1x128xf32>
    %23 = vector.broadcast %22 : vector<1x128xf32> to vector<4x128xf32>
    %24 = arith.addf %20, %23 : vector<4x128xf32>
    %cst_29 = arith.constant 0.000000e+00 : f32
    %25 = vector.broadcast %cst_29 : f32 to vector<4x128xf32>
    %26 = arith.maximumf %24, %25 : vector<4x128xf32>
    %27 = arith.truncf %26 : vector<4x128xf32> to vector<4x128xbf16>
    %c0_30 = arith.constant 0 : index
    %c0_31 = arith.constant 0 : index
    %c0_32 = arith.constant 0 : index
    %28 = vector.load %arg5[%c0_30, %c0_31, %c0_32] : memref<1x4x128xbf16, #tpu.memory_space<vmem>>, vector<1x4x128xbf16>
    %29 = vector.shape_cast %28 : vector<1x4x128xbf16> to vector<4x128xbf16>
    %30 = vector.shape_cast %27 : vector<4x128xbf16> to vector<1x4x128xbf16>
    tpu.vector_store %arg5[%c0_30, %c0_31, %c0_32], %30 {strides = array<i32>} : memref<1x4x128xbf16, #tpu.memory_space<vmem>>, vector<1x4x128xbf16>,
    return
  }
  func.func @transform_0(%arg0: i32, %arg1: i32) -> (i32, i32, i32) {
    %c2_i32 = arith.constant 2 : i32
    %0 = arith.muli %arg0, %c2_i32 : i32
    %1 = arith.addi %0, %arg1 : i32
    %c0_i32 = arith.constant 0 : i32
    %c0_i32_0 = arith.constant 0 : i32
    %c0_i32_1 = arith.constant 0 : i32
    return %1, %c0_i32, %c0_i32_0 : i32, i32, i32
  }
  func.func @transform_1(%arg0: i32, %arg1: i32) -> (i32, i32, i32, i32) {
    %c0_i32 = arith.constant 0 : i32
    %c0_i32_0 = arith.constant 0 : i32
    %c0_i32_1 = arith.constant 0 : i32
    %c0_i32_2 = arith.constant 0 : i32
    return %arg0, %c0_i32, %c0_i32_0, %c0_i32_1 : i32, i32, i32, i32
  }
  func.func @transform_2(%arg0: i32, %arg1: i32) -> (i32, i32, i32) {
    %c0_i32 = arith.constant 0 : i32
    %c0_i32_0 = arith.constant 0 : i32
    %c0_i32_1 = arith.constant 0 : i32
    return %arg0, %c0_i32, %c0_i32_0 : i32, i32, i32
  }
  func.func @transform_3(%arg0: i32, %arg1: i32) -> (i32, i32, i32) {
    %c2_i32 = arith.constant 2 : i32
    %0 = arith.muli %arg0, %c2_i32 : i32
    %1 = arith.addi %0, %arg1 : i32
    %c0_i32 = arith.constant 0 : i32
    %c0_i32_0 = arith.constant 0 : i32
    %c0_i32_1 = arith.constant 0 : i32
    return %1, %c0_i32, %c0_i32_0 : i32, i32, i32
  }
}

module attributes {stable_mosaic.version = 11 : i64} {
  func.func @maxpool2x2_kernel(%arg0: i32, %arg1: memref<1x8x4x32xbf16, #tpu.memory_space<vmem>>, %arg2: memref<1x4x4x16xbf16, #tpu.memory_space<vmem>>) attributes {dimension_semantics = [#tpu.dimension_semantics<parallel>], iteration_bounds = array<i64: 4>, scalar_prefetch = 0 : i64, scratch_operands = 0 : i64, tpu.core_type = #tpu.core_type<tc>, window_params = [{transform_indices = @transform_0, window_bounds = array<i64: 1, 8, 4, 32>}, {transform_indices = @transform_1, window_bounds = array<i64: 1, 4, 4, 16>}]} {
    %c0 = arith.constant 0 : index
    %c0_0 = arith.constant 0 : index
    %c0_1 = arith.constant 0 : index
    %c0_2 = arith.constant 0 : index
    %0 = vector.load %arg1[%c0, %c0_0, %c0_1, %c0_2] : memref<1x8x4x32xbf16, #tpu.memory_space<vmem>>, vector<1x1x4x32xbf16>
    %1 = vector.shape_cast %0 : vector<1x1x4x32xbf16> to vector<4x32xbf16>
    %c0_3 = arith.constant 0 : index
    %c1 = arith.constant 1 : index
    %c0_4 = arith.constant 0 : index
    %c0_5 = arith.constant 0 : index
    %2 = vector.load %arg1[%c0_3, %c1, %c0_4, %c0_5] : memref<1x8x4x32xbf16, #tpu.memory_space<vmem>>, vector<1x1x4x32xbf16>
    %3 = vector.shape_cast %2 : vector<1x1x4x32xbf16> to vector<4x32xbf16>
    %4 = arith.maximumf %1, %3 : vector<4x32xbf16>
    %5 = vector.extract_strided_slice %4 {offsets = [0, 0], sizes = [4, 16], strides = [1, 1]} : vector<4x32xbf16> to vector<4x16xbf16>
    %6 = vector.extract_strided_slice %4 {offsets = [0, 16], sizes = [4, 16], strides = [1, 1]} : vector<4x32xbf16> to vector<4x16xbf16>
    %7 = arith.maximumf %5, %6 : vector<4x16xbf16>
    %c0_6 = arith.constant 0 : index
    %c0_7 = arith.constant 0 : index
    %c0_8 = arith.constant 0 : index
    %c0_9 = arith.constant 0 : index
    %8 = vector.load %arg2[%c0_6, %c0_7, %c0_8, %c0_9] : memref<1x4x4x16xbf16, #tpu.memory_space<vmem>>, vector<1x1x4x16xbf16>
    %9 = vector.shape_cast %8 : vector<1x1x4x16xbf16> to vector<4x16xbf16>
    %10 = vector.shape_cast %7 : vector<4x16xbf16> to vector<1x1x4x16xbf16>
    tpu.vector_store %arg2[%c0_6, %c0_7, %c0_8, %c0_9], %10 {strides = array<i32>} : memref<1x4x4x16xbf16, #tpu.memory_space<vmem>>, vector<1x1x4x16xbf16>,
    %c0_10 = arith.constant 0 : index
    %c2 = arith.constant 2 : index
    %c0_11 = arith.constant 0 : index
    %c0_12 = arith.constant 0 : index
    %11 = vector.load %arg1[%c0_10, %c2, %c0_11, %c0_12] : memref<1x8x4x32xbf16, #tpu.memory_space<vmem>>, vector<1x1x4x32xbf16>
    %12 = vector.shape_cast %11 : vector<1x1x4x32xbf16> to vector<4x32xbf16>
    %c0_13 = arith.constant 0 : index
    %c3 = arith.constant 3 : index
    %c0_14 = arith.constant 0 : index
    %c0_15 = arith.constant 0 : index
    %13 = vector.load %arg1[%c0_13, %c3, %c0_14, %c0_15] : memref<1x8x4x32xbf16, #tpu.memory_space<vmem>>, vector<1x1x4x32xbf16>
    %14 = vector.shape_cast %13 : vector<1x1x4x32xbf16> to vector<4x32xbf16>
    %15 = arith.maximumf %12, %14 : vector<4x32xbf16>
    %16 = vector.extract_strided_slice %15 {offsets = [0, 0], sizes = [4, 16], strides = [1, 1]} : vector<4x32xbf16> to vector<4x16xbf16>
    %17 = vector.extract_strided_slice %15 {offsets = [0, 16], sizes = [4, 16], strides = [1, 1]} : vector<4x32xbf16> to vector<4x16xbf16>
    %18 = arith.maximumf %16, %17 : vector<4x16xbf16>
    %c0_16 = arith.constant 0 : index
    %c1_17 = arith.constant 1 : index
    %c0_18 = arith.constant 0 : index
    %c0_19 = arith.constant 0 : index
    %19 = vector.load %arg2[%c0_16, %c1_17, %c0_18, %c0_19] : memref<1x4x4x16xbf16, #tpu.memory_space<vmem>>, vector<1x1x4x16xbf16>
    %20 = vector.shape_cast %19 : vector<1x1x4x16xbf16> to vector<4x16xbf16>
    %21 = vector.shape_cast %18 : vector<4x16xbf16> to vector<1x1x4x16xbf16>
    tpu.vector_store %arg2[%c0_16, %c1_17, %c0_18, %c0_19], %21 {strides = array<i32>} : memref<1x4x4x16xbf16, #tpu.memory_space<vmem>>, vector<1x1x4x16xbf16>,
    %c0_20 = arith.constant 0 : index
    %c4 = arith.constant 4 : index
    %c0_21 = arith.constant 0 : index
    %c0_22 = arith.constant 0 : index
    %22 = vector.load %arg1[%c0_20, %c4, %c0_21, %c0_22] : memref<1x8x4x32xbf16, #tpu.memory_space<vmem>>, vector<1x1x4x32xbf16>
    %23 = vector.shape_cast %22 : vector<1x1x4x32xbf16> to vector<4x32xbf16>
    %c0_23 = arith.constant 0 : index
    %c5 = arith.constant 5 : index
    %c0_24 = arith.constant 0 : index
    %c0_25 = arith.constant 0 : index
    %24 = vector.load %arg1[%c0_23, %c5, %c0_24, %c0_25] : memref<1x8x4x32xbf16, #tpu.memory_space<vmem>>, vector<1x1x4x32xbf16>
    %25 = vector.shape_cast %24 : vector<1x1x4x32xbf16> to vector<4x32xbf16>
    %26 = arith.maximumf %23, %25 : vector<4x32xbf16>
    %27 = vector.extract_strided_slice %26 {offsets = [0, 0], sizes = [4, 16], strides = [1, 1]} : vector<4x32xbf16> to vector<4x16xbf16>
    %28 = vector.extract_strided_slice %26 {offsets = [0, 16], sizes = [4, 16], strides = [1, 1]} : vector<4x32xbf16> to vector<4x16xbf16>
    %29 = arith.maximumf %27, %28 : vector<4x16xbf16>
    %c0_26 = arith.constant 0 : index
    %c2_27 = arith.constant 2 : index
    %c0_28 = arith.constant 0 : index
    %c0_29 = arith.constant 0 : index
    %30 = vector.load %arg2[%c0_26, %c2_27, %c0_28, %c0_29] : memref<1x4x4x16xbf16, #tpu.memory_space<vmem>>, vector<1x1x4x16xbf16>
    %31 = vector.shape_cast %30 : vector<1x1x4x16xbf16> to vector<4x16xbf16>
    %32 = vector.shape_cast %29 : vector<4x16xbf16> to vector<1x1x4x16xbf16>
    tpu.vector_store %arg2[%c0_26, %c2_27, %c0_28, %c0_29], %32 {strides = array<i32>} : memref<1x4x4x16xbf16, #tpu.memory_space<vmem>>, vector<1x1x4x16xbf16>,
    %c0_30 = arith.constant 0 : index
    %c6 = arith.constant 6 : index
    %c0_31 = arith.constant 0 : index
    %c0_32 = arith.constant 0 : index
    %33 = vector.load %arg1[%c0_30, %c6, %c0_31, %c0_32] : memref<1x8x4x32xbf16, #tpu.memory_space<vmem>>, vector<1x1x4x32xbf16>
    %34 = vector.shape_cast %33 : vector<1x1x4x32xbf16> to vector<4x32xbf16>
    %c0_33 = arith.constant 0 : index
    %c7 = arith.constant 7 : index
    %c0_34 = arith.constant 0 : index
    %c0_35 = arith.constant 0 : index
    %35 = vector.load %arg1[%c0_33, %c7, %c0_34, %c0_35] : memref<1x8x4x32xbf16, #tpu.memory_space<vmem>>, vector<1x1x4x32xbf16>
    %36 = vector.shape_cast %35 : vector<1x1x4x32xbf16> to vector<4x32xbf16>
    %37 = arith.maximumf %34, %36 : vector<4x32xbf16>
    %38 = vector.extract_strided_slice %37 {offsets = [0, 0], sizes = [4, 16], strides = [1, 1]} : vector<4x32xbf16> to vector<4x16xbf16>
    %39 = vector.extract_strided_slice %37 {offsets = [0, 16], sizes = [4, 16], strides = [1, 1]} : vector<4x32xbf16> to vector<4x16xbf16>
    %40 = arith.maximumf %38, %39 : vector<4x16xbf16>
    %c0_36 = arith.constant 0 : index
    %c3_37 = arith.constant 3 : index
    %c0_38 = arith.constant 0 : index
    %c0_39 = arith.constant 0 : index
    %41 = vector.load %arg2[%c0_36, %c3_37, %c0_38, %c0_39] : memref<1x4x4x16xbf16, #tpu.memory_space<vmem>>, vector<1x1x4x16xbf16>
    %42 = vector.shape_cast %41 : vector<1x1x4x16xbf16> to vector<4x16xbf16>
    %43 = vector.shape_cast %40 : vector<4x16xbf16> to vector<1x1x4x16xbf16>
    tpu.vector_store %arg2[%c0_36, %c3_37, %c0_38, %c0_39], %43 {strides = array<i32>} : memref<1x4x4x16xbf16, #tpu.memory_space<vmem>>, vector<1x1x4x16xbf16>,
    return
  }
  func.func @transform_0(%arg0: i32) -> (i32, i32, i32, i32) {
    %c0_i32 = arith.constant 0 : i32
    %c0_i32_0 = arith.constant 0 : i32
    %c0_i32_1 = arith.constant 0 : i32
    %c0_i32_2 = arith.constant 0 : i32
    return %arg0, %c0_i32, %c0_i32_0, %c0_i32_1 : i32, i32, i32, i32
  }
  func.func @transform_1(%arg0: i32) -> (i32, i32, i32, i32) {
    %c0_i32 = arith.constant 0 : i32
    %c0_i32_0 = arith.constant 0 : i32
    %c0_i32_1 = arith.constant 0 : i32
    %c0_i32_2 = arith.constant 0 : i32
    return %arg0, %c0_i32, %c0_i32_0, %c0_i32_1 : i32, i32, i32, i32
  }
}

module attributes {stable_mosaic.version = 11 : i64} {
  func.func @conv3x3_kernel(%arg0: i32, %arg1: i32, %arg2: memref<1x4x128xbf16, #tpu.memory_space<vmem>>, %arg3: memref<1x3x128x128xbf16, #tpu.memory_space<vmem>>, %arg4: memref<1x1x128xf32, #tpu.memory_space<vmem>>, %arg5: memref<1x4x128xbf16, #tpu.memory_space<vmem>>, %arg6: memref<4x128xf32, #tpu.memory_space<vmem>>) attributes {dimension_semantics = [#tpu.dimension_semantics<parallel>, #tpu.dimension_semantics<parallel>], iteration_bounds = array<i64: 2, 2>, scalar_prefetch = 0 : i64, scratch_operands = 1 : i64, tpu.core_type = #tpu.core_type<tc>, window_params = [{transform_indices = @transform_0, window_bounds = array<i64: 1, 4, 128>}, {transform_indices = @transform_1, window_bounds = array<i64: 1, 3, 128, 128>}, {transform_indices = @transform_2, window_bounds = array<i64: 1, 1, 128>}, {transform_indices = @transform_3, window_bounds = array<i64: 1, 4, 128>}]} {
    %c0 = arith.constant 0 : index
    %c0_0 = arith.constant 0 : index
    %c0_1 = arith.constant 0 : index
    %0 = vector.load %arg2[%c0, %c0_0, %c0_1] : memref<1x4x128xbf16, #tpu.memory_space<vmem>>, vector<1x4x128xbf16>
    %1 = vector.shape_cast %0 : vector<1x4x128xbf16> to vector<4x128xbf16>
    %c0_2 = arith.constant 0 : index
    %c1 = arith.constant 1 : index
    %c0_3 = arith.constant 0 : index
    %c0_4 = arith.constant 0 : index
    %2 = vector.load %arg3[%c0_2, %c1, %c0_3, %c0_4] : memref<1x3x128x128xbf16, #tpu.memory_space<vmem>>, vector<1x1x128x128xbf16>
    %3 = vector.shape_cast %2 : vector<1x1x128x128xbf16> to vector<128x128xbf16>
    %cst = arith.constant dense<0.000000e+00> : vector<4x128xf32>
    %4 = tpu.matmul %1, %3, %cst {dimension_numbers = #tpu.dot_dimension_numbers<[1], [0], [0], [1], [0, 0, 1, 1], [], []>} : vector<4x128xbf16>, vector<128x128xbf16>, vector<4x128xf32> -> vector<4x128xf32>
    %c0_5 = arith.constant 0 : index
    %c0_6 = arith.constant 0 : index
    %5 = vector.load %arg6[%c0_5, %c0_6] : memref<4x128xf32, #tpu.memory_space<vmem>>, vector<4x128xf32>
    tpu.vector_store %arg6[%c0_5, %c0_6], %4 {strides = array<i32>} : memref<4x128xf32, #tpu.memory_space<vmem>>, vector<4x128xf32>,
    %c1_7 = arith.constant 1 : index
    %c0_8 = arith.constant 0 : index
    %6 = vector.load %arg6[%c1_7, %c0_8] : memref<4x128xf32, #tpu.memory_space<vmem>>, vector<3x128xf32>
    %7 = vector.extract_strided_slice %1 {offsets = [0, 0], sizes = [3, 128], strides = [1, 1]} : vector<4x128xbf16> to vector<3x128xbf16>
    %c0_9 = arith.constant 0 : index
    %c0_10 = arith.constant 0 : index
    %c0_11 = arith.constant 0 : index
    %c0_12 = arith.constant 0 : index
    %8 = vector.load %arg3[%c0_9, %c0_10, %c0_11, %c0_12] : memref<1x3x128x128xbf16, #tpu.memory_space<vmem>>, vector<1x1x128x128xbf16>
    %9 = vector.shape_cast %8 : vector<1x1x128x128xbf16> to vector<128x128xbf16>
    %cst_13 = arith.constant dense<0.000000e+00> : vector<3x128xf32>
    %10 = tpu.matmul %7, %9, %cst_13 {dimension_numbers = #tpu.dot_dimension_numbers<[1], [0], [0], [1], [0, 0, 1, 1], [], []>} : vector<3x128xbf16>, vector<128x128xbf16>, vector<3x128xf32> -> vector<3x128xf32>
    %11 = arith.addf %6, %10 : vector<3x128xf32>
    %c1_14 = arith.constant 1 : index
    %c0_15 = arith.constant 0 : index
    %12 = vector.load %arg6[%c1_14, %c0_15] : memref<4x128xf32, #tpu.memory_space<vmem>>, vector<3x128xf32>
    tpu.vector_store %arg6[%c1_14, %c0_15], %11 {strides = array<i32>} : memref<4x128xf32, #tpu.memory_space<vmem>>, vector<3x128xf32>,
    %c0_16 = arith.constant 0 : index
    %c0_17 = arith.constant 0 : index
    %13 = vector.load %arg6[%c0_16, %c0_17] : memref<4x128xf32, #tpu.memory_space<vmem>>, vector<3x128xf32>
    %14 = vector.extract_strided_slice %1 {offsets = [1, 0], sizes = [3, 128], strides = [1, 1]} : vector<4x128xbf16> to vector<3x128xbf16>
    %c0_18 = arith.constant 0 : index
    %c2 = arith.constant 2 : index
    %c0_19 = arith.constant 0 : index
    %c0_20 = arith.constant 0 : index
    %15 = vector.load %arg3[%c0_18, %c2, %c0_19, %c0_20] : memref<1x3x128x128xbf16, #tpu.memory_space<vmem>>, vector<1x1x128x128xbf16>
    %16 = vector.shape_cast %15 : vector<1x1x128x128xbf16> to vector<128x128xbf16>
    %cst_21 = arith.constant dense<0.000000e+00> : vector<3x128xf32>
    %17 = tpu.matmul %14, %16, %cst_21 {dimension_numbers = #tpu.dot_dimension_numbers<[1], [0], [0], [1], [0, 0, 1, 1], [], []>} : vector<3x128xbf16>, vector<128x128xbf16>, vector<3x128xf32> -> vector<3x128xf32>
    %18 = arith.addf %13, %17 : vector<3x128xf32>
    %c0_22 = arith.constant 0 : index
    %c0_23 = arith.constant 0 : index
    %19 = vector.load %arg6[%c0_22, %c0_23] : memref<4x128xf32, #tpu.memory_space<vmem>>, vector<3x128xf32>
    tpu.vector_store %arg6[%c0_22, %c0_23], %18 {strides = array<i32>} : memref<4x128xf32, #tpu.memory_space<vmem>>, vector<3x128xf32>,
    %c0_24 = arith.constant 0 : index
    %c0_25 = arith.constant 0 : index
    %20 = vector.load %arg6[%c0_24, %c0_25] : memref<4x128xf32, #tpu.memory_space<vmem>>, vector<4x128xf32>
    %c0_26 = arith.constant 0 : index
    %c0_27 = arith.constant 0 : index
    %c0_28 = arith.constant 0 : index
    %21 = vector.load %arg4[%c0_26, %c0_27, %c0_28] : memref<1x1x128xf32, #tpu.memory_space<vmem>>, vector<1x1x128xf32>
    %22 = vector.shape_cast %21 : vector<1x1x128xf32> to vector<1x128xf32>
    %23 = vector.broadcast %22 : vector<1x128xf32> to vector<4x128xf32>
    %24 = arith.addf %20, %23 : vector<4x128xf32>
    %cst_29 = arith.constant 0.000000e+00 : f32
    %25 = vector.broadcast %cst_29 : f32 to vector<4x128xf32>
    %26 = arith.maximumf %24, %25 : vector<4x128xf32>
    %27 = arith.truncf %26 : vector<4x128xf32> to vector<4x128xbf16>
    %c0_30 = arith.constant 0 : index
    %c0_31 = arith.constant 0 : index
    %c0_32 = arith.constant 0 : index
    %28 = vector.load %arg5[%c0_30, %c0_31, %c0_32] : memref<1x4x128xbf16, #tpu.memory_space<vmem>>, vector<1x4x128xbf16>
    %29 = vector.shape_cast %28 : vector<1x4x128xbf16> to vector<4x128xbf16>
    %30 = vector.shape_cast %27 : vector<4x128xbf16> to vector<1x4x128xbf16>
    tpu.vector_store %arg5[%c0_30, %c0_31, %c0_32], %30 {strides = array<i32>} : memref<1x4x128xbf16, #tpu.memory_space<vmem>>, vector<1x4x128xbf16>,
    return
  }
  func.func @transform_0(%arg0: i32, %arg1: i32) -> (i32, i32, i32) {
    %c2_i32 = arith.constant 2 : i32
    %0 = arith.muli %arg0, %c2_i32 : i32
    %1 = arith.addi %0, %arg1 : i32
    %c0_i32 = arith.constant 0 : i32
    %c0_i32_0 = arith.constant 0 : i32
    %c0_i32_1 = arith.constant 0 : i32
    return %1, %c0_i32, %c0_i32_0 : i32, i32, i32
  }
  func.func @transform_1(%arg0: i32, %arg1: i32) -> (i32, i32, i32, i32) {
    %c0_i32 = arith.constant 0 : i32
    %c0_i32_0 = arith.constant 0 : i32
    %c0_i32_1 = arith.constant 0 : i32
    %c0_i32_2 = arith.constant 0 : i32
    return %arg0, %c0_i32, %c0_i32_0, %c0_i32_1 : i32, i32, i32, i32
  }
  func.func @transform_2(%arg0: i32, %arg1: i32) -> (i32, i32, i32) {
    %c0_i32 = arith.constant 0 : i32
    %c0_i32_0 = arith.constant 0 : i32
    %c0_i32_1 = arith.constant 0 : i32
    return %arg0, %c0_i32, %c0_i32_0 : i32, i32, i32
  }
  func.func @transform_3(%arg0: i32, %arg1: i32) -> (i32, i32, i32) {
    %c2_i32 = arith.constant 2 : i32
    %0 = arith.muli %arg0, %c2_i32 : i32
    %1 = arith.addi %0, %arg1 : i32
    %c0_i32 = arith.constant 0 : i32
    %c0_i32_0 = arith.constant 0 : i32
    %c0_i32_1 = arith.constant 0 : i32
    return %1, %c0_i32, %c0_i32_0 : i32, i32, i32
  }
}

module attributes {stable_mosaic.version = 11 : i64} {
  func.func @maxpool2x2_kernel(%arg0: i32, %arg1: memref<1x4x2x64xbf16, #tpu.memory_space<vmem>>, %arg2: memref<1x2x2x32xbf16, #tpu.memory_space<vmem>>) attributes {dimension_semantics = [#tpu.dimension_semantics<parallel>], iteration_bounds = array<i64: 4>, scalar_prefetch = 0 : i64, scratch_operands = 0 : i64, tpu.core_type = #tpu.core_type<tc>, window_params = [{transform_indices = @transform_0, window_bounds = array<i64: 1, 4, 2, 64>}, {transform_indices = @transform_1, window_bounds = array<i64: 1, 2, 2, 32>}]} {
    %c0 = arith.constant 0 : index
    %c0_0 = arith.constant 0 : index
    %c0_1 = arith.constant 0 : index
    %c0_2 = arith.constant 0 : index
    %0 = vector.load %arg1[%c0, %c0_0, %c0_1, %c0_2] : memref<1x4x2x64xbf16, #tpu.memory_space<vmem>>, vector<1x1x2x64xbf16>
    %1 = vector.shape_cast %0 : vector<1x1x2x64xbf16> to vector<2x64xbf16>
    %c0_3 = arith.constant 0 : index
    %c1 = arith.constant 1 : index
    %c0_4 = arith.constant 0 : index
    %c0_5 = arith.constant 0 : index
    %2 = vector.load %arg1[%c0_3, %c1, %c0_4, %c0_5] : memref<1x4x2x64xbf16, #tpu.memory_space<vmem>>, vector<1x1x2x64xbf16>
    %3 = vector.shape_cast %2 : vector<1x1x2x64xbf16> to vector<2x64xbf16>
    %4 = arith.maximumf %1, %3 : vector<2x64xbf16>
    %5 = vector.extract_strided_slice %4 {offsets = [0, 0], sizes = [2, 32], strides = [1, 1]} : vector<2x64xbf16> to vector<2x32xbf16>
    %6 = vector.extract_strided_slice %4 {offsets = [0, 32], sizes = [2, 32], strides = [1, 1]} : vector<2x64xbf16> to vector<2x32xbf16>
    %7 = arith.maximumf %5, %6 : vector<2x32xbf16>
    %c0_6 = arith.constant 0 : index
    %c0_7 = arith.constant 0 : index
    %c0_8 = arith.constant 0 : index
    %c0_9 = arith.constant 0 : index
    %8 = vector.load %arg2[%c0_6, %c0_7, %c0_8, %c0_9] : memref<1x2x2x32xbf16, #tpu.memory_space<vmem>>, vector<1x1x2x32xbf16>
    %9 = vector.shape_cast %8 : vector<1x1x2x32xbf16> to vector<2x32xbf16>
    %10 = vector.shape_cast %7 : vector<2x32xbf16> to vector<1x1x2x32xbf16>
    tpu.vector_store %arg2[%c0_6, %c0_7, %c0_8, %c0_9], %10 {strides = array<i32>} : memref<1x2x2x32xbf16, #tpu.memory_space<vmem>>, vector<1x1x2x32xbf16>,
    %c0_10 = arith.constant 0 : index
    %c2 = arith.constant 2 : index
    %c0_11 = arith.constant 0 : index
    %c0_12 = arith.constant 0 : index
    %11 = vector.load %arg1[%c0_10, %c2, %c0_11, %c0_12] : memref<1x4x2x64xbf16, #tpu.memory_space<vmem>>, vector<1x1x2x64xbf16>
    %12 = vector.shape_cast %11 : vector<1x1x2x64xbf16> to vector<2x64xbf16>
    %c0_13 = arith.constant 0 : index
    %c3 = arith.constant 3 : index
    %c0_14 = arith.constant 0 : index
    %c0_15 = arith.constant 0 : index
    %13 = vector.load %arg1[%c0_13, %c3, %c0_14, %c0_15] : memref<1x4x2x64xbf16, #tpu.memory_space<vmem>>, vector<1x1x2x64xbf16>
    %14 = vector.shape_cast %13 : vector<1x1x2x64xbf16> to vector<2x64xbf16>
    %15 = arith.maximumf %12, %14 : vector<2x64xbf16>
    %16 = vector.extract_strided_slice %15 {offsets = [0, 0], sizes = [2, 32], strides = [1, 1]} : vector<2x64xbf16> to vector<2x32xbf16>
    %17 = vector.extract_strided_slice %15 {offsets = [0, 32], sizes = [2, 32], strides = [1, 1]} : vector<2x64xbf16> to vector<2x32xbf16>
    %18 = arith.maximumf %16, %17 : vector<2x32xbf16>
    %c0_16 = arith.constant 0 : index
    %c1_17 = arith.constant 1 : index
    %c0_18 = arith.constant 0 : index
    %c0_19 = arith.constant 0 : index
    %19 = vector.load %arg2[%c0_16, %c1_17, %c0_18, %c0_19] : memref<1x2x2x32xbf16, #tpu.memory_space<vmem>>, vector<1x1x2x32xbf16>
    %20 = vector.shape_cast %19 : vector<1x1x2x32xbf16> to vector<2x32xbf16>
    %21 = vector.shape_cast %18 : vector<2x32xbf16> to vector<1x1x2x32xbf16>
    tpu.vector_store %arg2[%c0_16, %c1_17, %c0_18, %c0_19], %21 {strides = array<i32>} : memref<1x2x2x32xbf16, #tpu.memory_space<vmem>>, vector<1x1x2x32xbf16>,
    return
  }
  func.func @transform_0(%arg0: i32) -> (i32, i32, i32, i32) {
    %c0_i32 = arith.constant 0 : i32
    %c0_i32_0 = arith.constant 0 : i32
    %c0_i32_1 = arith.constant 0 : i32
    %c0_i32_2 = arith.constant 0 : i32
    return %arg0, %c0_i32, %c0_i32_0, %c0_i32_1 : i32, i32, i32, i32
  }
  func.func @transform_1(%arg0: i32) -> (i32, i32, i32, i32) {
    %c0_i32 = arith.constant 0 : i32
    %c0_i32_0 = arith.constant 0 : i32
    %c0_i32_1 = arith.constant 0 : i32
    %c0_i32_2 = arith.constant 0 : i32
    return %arg0, %c0_i32, %c0_i32_0, %c0_i32_1 : i32, i32, i32, i32
  }
}

module attributes {stable_mosaic.version = 11 : i64} {
  func.func @conv3x3_kernel(%arg0: i32, %arg1: i32, %arg2: memref<1x2x64xbf16, #tpu.memory_space<vmem>>, %arg3: memref<1x3x64x64xbf16, #tpu.memory_space<vmem>>, %arg4: memref<1x1x64xf32, #tpu.memory_space<vmem>>, %arg5: memref<1x2x64xbf16, #tpu.memory_space<vmem>>, %arg6: memref<2x64xf32, #tpu.memory_space<vmem>>) attributes {dimension_semantics = [#tpu.dimension_semantics<parallel>, #tpu.dimension_semantics<parallel>], iteration_bounds = array<i64: 2, 2>, scalar_prefetch = 0 : i64, scratch_operands = 1 : i64, tpu.core_type = #tpu.core_type<tc>, window_params = [{transform_indices = @transform_0, window_bounds = array<i64: 1, 2, 64>}, {transform_indices = @transform_1, window_bounds = array<i64: 1, 3, 64, 64>}, {transform_indices = @transform_2, window_bounds = array<i64: 1, 1, 64>}, {transform_indices = @transform_3, window_bounds = array<i64: 1, 2, 64>}]} {
    %c0 = arith.constant 0 : index
    %c0_0 = arith.constant 0 : index
    %c0_1 = arith.constant 0 : index
    %0 = vector.load %arg2[%c0, %c0_0, %c0_1] : memref<1x2x64xbf16, #tpu.memory_space<vmem>>, vector<1x2x64xbf16>
    %1 = vector.shape_cast %0 : vector<1x2x64xbf16> to vector<2x64xbf16>
    %c0_2 = arith.constant 0 : index
    %c1 = arith.constant 1 : index
    %c0_3 = arith.constant 0 : index
    %c0_4 = arith.constant 0 : index
    %2 = vector.load %arg3[%c0_2, %c1, %c0_3, %c0_4] : memref<1x3x64x64xbf16, #tpu.memory_space<vmem>>, vector<1x1x64x64xbf16>
    %3 = vector.shape_cast %2 : vector<1x1x64x64xbf16> to vector<64x64xbf16>
    %cst = arith.constant dense<0.000000e+00> : vector<2x64xf32>
    %4 = tpu.matmul %1, %3, %cst {dimension_numbers = #tpu.dot_dimension_numbers<[1], [0], [0], [1], [0, 0, 1, 1], [], []>} : vector<2x64xbf16>, vector<64x64xbf16>, vector<2x64xf32> -> vector<2x64xf32>
    %c0_5 = arith.constant 0 : index
    %c0_6 = arith.constant 0 : index
    %5 = vector.load %arg6[%c0_5, %c0_6] : memref<2x64xf32, #tpu.memory_space<vmem>>, vector<2x64xf32>
    tpu.vector_store %arg6[%c0_5, %c0_6], %4 {strides = array<i32>} : memref<2x64xf32, #tpu.memory_space<vmem>>, vector<2x64xf32>,
    %c1_7 = arith.constant 1 : index
    %c0_8 = arith.constant 0 : index
    %6 = vector.load %arg6[%c1_7, %c0_8] : memref<2x64xf32, #tpu.memory_space<vmem>>, vector<1x64xf32>
    %7 = vector.extract_strided_slice %1 {offsets = [0, 0], sizes = [1, 64], strides = [1, 1]} : vector<2x64xbf16> to vector<1x64xbf16>
    %c0_9 = arith.constant 0 : index
    %c0_10 = arith.constant 0 : index
    %c0_11 = arith.constant 0 : index
    %c0_12 = arith.constant 0 : index
    %8 = vector.load %arg3[%c0_9, %c0_10, %c0_11, %c0_12] : memref<1x3x64x64xbf16, #tpu.memory_space<vmem>>, vector<1x1x64x64xbf16>
    %9 = vector.shape_cast %8 : vector<1x1x64x64xbf16> to vector<64x64xbf16>
    %cst_13 = arith.constant dense<0.000000e+00> : vector<1x64xf32>
    %10 = tpu.matmul %7, %9, %cst_13 {dimension_numbers = #tpu.dot_dimension_numbers<[1], [0], [0], [1], [0, 0, 1, 1], [], []>} : vector<1x64xbf16>, vector<64x64xbf16>, vector<1x64xf32> -> vector<1x64xf32>
    %11 = arith.addf %6, %10 : vector<1x64xf32>
    %c1_14 = arith.constant 1 : index
    %c0_15 = arith.constant 0 : index
    %12 = vector.load %arg6[%c1_14, %c0_15] : memref<2x64xf32, #tpu.memory_space<vmem>>, vector<1x64xf32>
    tpu.vector_store %arg6[%c1_14, %c0_15], %11 {strides = array<i32>} : memref<2x64xf32, #tpu.memory_space<vmem>>, vector<1x64xf32>,
    %c0_16 = arith.constant 0 : index
    %c0_17 = arith.constant 0 : index
    %13 = vector.load %arg6[%c0_16, %c0_17] : memref<2x64xf32, #tpu.memory_space<vmem>>, vector<1x64xf32>
    %14 = vector.extract_strided_slice %1 {offsets = [1, 0], sizes = [1, 64], strides = [1, 1]} : vector<2x64xbf16> to vector<1x64xbf16>
    %c0_18 = arith.constant 0 : index
    %c2 = arith.constant 2 : index
    %c0_19 = arith.constant 0 : index
    %c0_20 = arith.constant 0 : index
    %15 = vector.load %arg3[%c0_18, %c2, %c0_19, %c0_20] : memref<1x3x64x64xbf16, #tpu.memory_space<vmem>>, vector<1x1x64x64xbf16>
    %16 = vector.shape_cast %15 : vector<1x1x64x64xbf16> to vector<64x64xbf16>
    %cst_21 = arith.constant dense<0.000000e+00> : vector<1x64xf32>
    %17 = tpu.matmul %14, %16, %cst_21 {dimension_numbers = #tpu.dot_dimension_numbers<[1], [0], [0], [1], [0, 0, 1, 1], [], []>} : vector<1x64xbf16>, vector<64x64xbf16>, vector<1x64xf32> -> vector<1x64xf32>
    %18 = arith.addf %13, %17 : vector<1x64xf32>
    %c0_22 = arith.constant 0 : index
    %c0_23 = arith.constant 0 : index
    %19 = vector.load %arg6[%c0_22, %c0_23] : memref<2x64xf32, #tpu.memory_space<vmem>>, vector<1x64xf32>
    tpu.vector_store %arg6[%c0_22, %c0_23], %18 {strides = array<i32>} : memref<2x64xf32, #tpu.memory_space<vmem>>, vector<1x64xf32>,
    %c0_24 = arith.constant 0 : index
    %c0_25 = arith.constant 0 : index
    %20 = vector.load %arg6[%c0_24, %c0_25] : memref<2x64xf32, #tpu.memory_space<vmem>>, vector<2x64xf32>
    %c0_26 = arith.constant 0 : index
    %c0_27 = arith.constant 0 : index
    %c0_28 = arith.constant 0 : index
    %21 = vector.load %arg4[%c0_26, %c0_27, %c0_28] : memref<1x1x64xf32, #tpu.memory_space<vmem>>, vector<1x1x64xf32>
    %22 = vector.shape_cast %21 : vector<1x1x64xf32> to vector<1x64xf32>
    %23 = vector.broadcast %22 : vector<1x64xf32> to vector<2x64xf32>
    %24 = arith.addf %20, %23 : vector<2x64xf32>
    %cst_29 = arith.constant 0.000000e+00 : f32
    %25 = vector.broadcast %cst_29 : f32 to vector<2x64xf32>
    %26 = arith.maximumf %24, %25 : vector<2x64xf32>
    %27 = arith.truncf %26 : vector<2x64xf32> to vector<2x64xbf16>
    %c0_30 = arith.constant 0 : index
    %c0_31 = arith.constant 0 : index
    %c0_32 = arith.constant 0 : index
    %28 = vector.load %arg5[%c0_30, %c0_31, %c0_32] : memref<1x2x64xbf16, #tpu.memory_space<vmem>>, vector<1x2x64xbf16>
    %29 = vector.shape_cast %28 : vector<1x2x64xbf16> to vector<2x64xbf16>
    %30 = vector.shape_cast %27 : vector<2x64xbf16> to vector<1x2x64xbf16>
    tpu.vector_store %arg5[%c0_30, %c0_31, %c0_32], %30 {strides = array<i32>} : memref<1x2x64xbf16, #tpu.memory_space<vmem>>, vector<1x2x64xbf16>,
    return
  }
  func.func @transform_0(%arg0: i32, %arg1: i32) -> (i32, i32, i32) {
    %c2_i32 = arith.constant 2 : i32
    %0 = arith.muli %arg0, %c2_i32 : i32
    %1 = arith.addi %0, %arg1 : i32
    %c0_i32 = arith.constant 0 : i32
    %c0_i32_0 = arith.constant 0 : i32
    %c0_i32_1 = arith.constant 0 : i32
    return %1, %c0_i32, %c0_i32_0 : i32, i32, i32
  }
  func.func @transform_1(%arg0: i32, %arg1: i32) -> (i32, i32, i32, i32) {
    %c0_i32 = arith.constant 0 : i32
    %c0_i32_0 = arith.constant 0 : i32
    %c0_i32_1 = arith.constant 0 : i32
    %c0_i32_2 = arith.constant 0 : i32
    return %arg0, %c0_i32, %c0_i32_0, %c0_i32_1 : i32, i32, i32, i32
  }
  func.func @transform_2(%arg0: i32, %arg1: i32) -> (i32, i32, i32) {
    %c0_i32 = arith.constant 0 : i32
    %c0_i32_0 = arith.constant 0 : i32
    %c0_i32_1 = arith.constant 0 : i32
    return %arg0, %c0_i32, %c0_i32_0 : i32, i32, i32
  }
  func.func @transform_3(%arg0: i32, %arg1: i32) -> (i32, i32, i32) {
    %c2_i32 = arith.constant 2 : i32
    %0 = arith.muli %arg0, %c2_i32 : i32
    %1 = arith.addi %0, %arg1 : i32
    %c0_i32 = arith.constant 0 : i32
    %c0_i32_0 = arith.constant 0 : i32
    %c0_i32_1 = arith.constant 0 : i32
    return %1, %c0_i32, %c0_i32_0 : i32, i32, i32
  }
}

module attributes {stable_mosaic.version = 11 : i64} {
  func.func @classifier_kernel(%arg0: i32, %arg1: memref<2x256xbf16, #tpu.memory_space<vmem>>, %arg2: memref<256x128xbf16, #tpu.memory_space<vmem>>, %arg3: memref<1x128xf32, #tpu.memory_space<vmem>>, %arg4: memref<128x128xbf16, #tpu.memory_space<vmem>>, %arg5: memref<1x128xf32, #tpu.memory_space<vmem>>, %arg6: memref<128x5xbf16, #tpu.memory_space<vmem>>, %arg7: memref<1x5xf32, #tpu.memory_space<vmem>>, %arg8: memref<2x5xf32, #tpu.memory_space<vmem>>) attributes {dimension_semantics = [#tpu.dimension_semantics<arbitrary>], iteration_bounds = array<i64: 1>, scalar_prefetch = 0 : i64, scratch_operands = 0 : i64, tpu.core_type = #tpu.core_type<tc>, window_params = [{pipeline_mode = #tpu.pipeline_mode<synchronous>, transform_indices = @transform_0, window_bounds = array<i64: 2, 256>}, {pipeline_mode = #tpu.pipeline_mode<synchronous>, transform_indices = @transform_1, window_bounds = array<i64: 256, 128>}, {pipeline_mode = #tpu.pipeline_mode<synchronous>, transform_indices = @transform_2, window_bounds = array<i64: 1, 128>}, {pipeline_mode = #tpu.pipeline_mode<synchronous>, transform_indices = @transform_3, window_bounds = array<i64: 128, 128>}, {pipeline_mode = #tpu.pipeline_mode<synchronous>, transform_indices = @transform_4, window_bounds = array<i64: 1, 128>}, {pipeline_mode = #tpu.pipeline_mode<synchronous>, transform_indices = @transform_5, window_bounds = array<i64: 128, 5>}, {pipeline_mode = #tpu.pipeline_mode<synchronous>, transform_indices = @transform_6, window_bounds = array<i64: 1, 5>}, {pipeline_mode = #tpu.pipeline_mode<synchronous>, transform_indices = @transform_7, window_bounds = array<i64: 2, 5>}]} {
    %c0 = arith.constant 0 : index
    %c0_0 = arith.constant 0 : index
    %0 = vector.load %arg1[%c0, %c0_0] : memref<2x256xbf16, #tpu.memory_space<vmem>>, vector<2x256xbf16>
    %c0_1 = arith.constant 0 : index
    %c0_2 = arith.constant 0 : index
    %1 = vector.load %arg2[%c0_1, %c0_2] : memref<256x128xbf16, #tpu.memory_space<vmem>>, vector<256x128xbf16>
    %cst = arith.constant dense<0.000000e+00> : vector<2x128xf32>
    %2 = tpu.matmul %0, %1, %cst {dimension_numbers = #tpu.dot_dimension_numbers<[1], [0], [0], [1], [0, 0, 1, 1], [], []>} : vector<2x256xbf16>, vector<256x128xbf16>, vector<2x128xf32> -> vector<2x128xf32>
    %c0_3 = arith.constant 0 : index
    %c0_4 = arith.constant 0 : index
    %3 = vector.load %arg3[%c0_3, %c0_4] : memref<1x128xf32, #tpu.memory_space<vmem>>, vector<1x128xf32>
    %4 = vector.broadcast %3 : vector<1x128xf32> to vector<2x128xf32>
    %5 = arith.addf %2, %4 : vector<2x128xf32>
    %cst_5 = arith.constant 0.000000e+00 : f32
    %6 = vector.broadcast %cst_5 : f32 to vector<2x128xf32>
    %7 = arith.maximumf %5, %6 : vector<2x128xf32>
    %8 = arith.truncf %7 : vector<2x128xf32> to vector<2x128xbf16>
    %c0_6 = arith.constant 0 : index
    %c0_7 = arith.constant 0 : index
    %9 = vector.load %arg4[%c0_6, %c0_7] : memref<128x128xbf16, #tpu.memory_space<vmem>>, vector<128x128xbf16>
    %cst_8 = arith.constant dense<0.000000e+00> : vector<2x128xf32>
    %10 = tpu.matmul %8, %9, %cst_8 {dimension_numbers = #tpu.dot_dimension_numbers<[1], [0], [0], [1], [0, 0, 1, 1], [], []>} : vector<2x128xbf16>, vector<128x128xbf16>, vector<2x128xf32> -> vector<2x128xf32>
    %c0_9 = arith.constant 0 : index
    %c0_10 = arith.constant 0 : index
    %11 = vector.load %arg5[%c0_9, %c0_10] : memref<1x128xf32, #tpu.memory_space<vmem>>, vector<1x128xf32>
    %12 = vector.broadcast %11 : vector<1x128xf32> to vector<2x128xf32>
    %13 = arith.addf %10, %12 : vector<2x128xf32>
    %cst_11 = arith.constant 0.000000e+00 : f32
    %14 = vector.broadcast %cst_11 : f32 to vector<2x128xf32>
    %15 = arith.maximumf %13, %14 : vector<2x128xf32>
    %16 = arith.truncf %15 : vector<2x128xf32> to vector<2x128xbf16>
    %c0_12 = arith.constant 0 : index
    %c0_13 = arith.constant 0 : index
    %17 = vector.load %arg6[%c0_12, %c0_13] : memref<128x5xbf16, #tpu.memory_space<vmem>>, vector<128x5xbf16>
    %cst_14 = arith.constant dense<0.000000e+00> : vector<2x5xf32>
    %18 = tpu.matmul %16, %17, %cst_14 {dimension_numbers = #tpu.dot_dimension_numbers<[1], [0], [0], [1], [0, 0, 1, 1], [], []>} : vector<2x128xbf16>, vector<128x5xbf16>, vector<2x5xf32> -> vector<2x5xf32>
    %c0_15 = arith.constant 0 : index
    %c0_16 = arith.constant 0 : index
    %19 = vector.load %arg7[%c0_15, %c0_16] : memref<1x5xf32, #tpu.memory_space<vmem>>, vector<1x5xf32>
    %20 = vector.broadcast %19 : vector<1x5xf32> to vector<2x5xf32>
    %21 = arith.addf %18, %20 : vector<2x5xf32>
    %c0_17 = arith.constant 0 : index
    %c0_18 = arith.constant 0 : index
    %22 = vector.load %arg8[%c0_17, %c0_18] : memref<2x5xf32, #tpu.memory_space<vmem>>, vector<2x5xf32>
    tpu.vector_store %arg8[%c0_17, %c0_18], %21 {strides = array<i32>} : memref<2x5xf32, #tpu.memory_space<vmem>>, vector<2x5xf32>,
    return
  }
  func.func @transform_0(%arg0: i32) -> (i32, i32) {
    %c0_i32 = arith.constant 0 : i32
    %c0_i32_0 = arith.constant 0 : i32
    %c0_i32_1 = arith.constant 0 : i32
    return %c0_i32, %c0_i32_0 : i32, i32
  }
  func.func @transform_1(%arg0: i32) -> (i32, i32) {
    %c0_i32 = arith.constant 0 : i32
    %c0_i32_0 = arith.constant 0 : i32
    %c0_i32_1 = arith.constant 0 : i32
    return %c0_i32, %c0_i32_0 : i32, i32
  }
  func.func @transform_2(%arg0: i32) -> (i32, i32) {
    %c0_i32 = arith.constant 0 : i32
    %c0_i32_0 = arith.constant 0 : i32
    %c0_i32_1 = arith.constant 0 : i32
    return %c0_i32, %c0_i32_0 : i32, i32
  }
  func.func @transform_3(%arg0: i32) -> (i32, i32) {
    %c0_i32 = arith.constant 0 : i32
    %c0_i32_0 = arith.constant 0 : i32
    %c0_i32_1 = arith.constant 0 : i32
    return %c0_i32, %c0_i32_0 : i32, i32
  }
  func.func @transform_4(%arg0: i32) -> (i32, i32) {
    %c0_i32 = arith.constant 0 : i32
    %c0_i32_0 = arith.constant 0 : i32
    %c0_i32_1 = arith.constant 0 : i32
    return %c0_i32, %c0_i32_0 : i32, i32
  }
  func.func @transform_5(%arg0: i32) -> (i32, i32) {
    %c0_i32 = arith.constant 0 : i32
    %c0_i32_0 = arith.constant 0 : i32
    %c0_i32_1 = arith.constant 0 : i32
    return %c0_i32, %c0_i32_0 : i32, i32
  }
  func.func @transform_6(%arg0: i32) -> (i32, i32) {
    %c0_i32 = arith.constant 0 : i32
    %c0_i32_0 = arith.constant 0 : i32
    %c0_i32_1 = arith.constant 0 : i32
    return %c0_i32, %c0_i32_0 : i32, i32
  }
  func.func @transform_7(%arg0: i32) -> (i32, i32) {
    %c0_i32 = arith.constant 0 : i32
    %c0_i32_0 = arith.constant 0 : i32
    %c0_i32_1 = arith.constant 0 : i32
    return %c0_i32, %c0_i32_0 : i32, i32
  }
}

</mosaic_0001>

<bundles_post_ra>
// kernel: vgg_forward.17
= control target key start
LH: loop header
LB: loop body
LE: loop exit
PB: predicated region body
PF: predicated region fallthrough
CT: control target
= control target key end

     0   :  { %s901_s12 = smov 0   ;;  %s903_s13 = smov 0   ;;  %s989_s0 = inlined_call_operand.vmem [shape: bf16[4,32,96], index: 0, kind: input, shape index: {}]   ;;  %s990_s1 = inlined_call_operand.vmem [shape: bf16[2,3,96,128], index: 1, kind: input, shape index: {}]   ;;  %s991_s2 = inlined_call_operand.vmem [shape: f32[2,1,128], index: 2, kind: input, shape index: {}]   ;;  %s992_s3 = inlined_call_operand.vmem [shape: bf16[4,32,128], index: 3, kind: output, shape index: {}]  }
   0x1   :  { %s905_s14 = smov 0   ;;  %s907_s15 = smov 0  }
   0x2   :  { %s909_s16 = smov 0  }
   0x3 LB: > { %s22_s17 = sadd.s32 1, %s871_s14  ;;  %s25_s18 = sadd.s32 1, %s875_s15  ;;  %s879_s16 = sphi %s909_s16, %s13_s16   ;;  %s875_s15 = sphi %s907_s15, %s996_s15   ;;  %s871_s14 = sphi %s905_s14, %s995_s14   ;;  %s867_s13 = sphi %s903_s13, %s994_s13   ;;  %s863_s12 = sphi %s901_s12, %s993_s12  }
   0x4   : > { %p23_p0 = scmp.ge.s32.totalorder %s22_s17, 2  ;;  %p640_p1 = scmp.ge.s32.totalorder %s879_s16, 1 }
   0x5   : > { %p179_p2 = scmp.lt.s32.totalorder %s879_s16, 5 }
   0x6   : > { %s998_s17 = smov (%p23_p0, %s22_s17), 0  ;;  %s1000_s18 = smov (!%p23_p0, %s25_s18), %s875_s15 }
   0x7   : > { %p180_p3 = pnand %p640_p1, %p179_p2  ;;  %p27_p4 = scmp.ge.s32.totalorder %s1000_s18, 2 }
   0x8   : > { %p224_p5 = scmp.lt.s32.totalorder (!%p180_p3), %s867_s13, 1  ;;  %s641_s19 = sshll.u32 (!%p180_p3), %s867_s13, 1 }
   0x9   : > { %s1002_s18 = smov (%p27_p4, %s1000_s18), 0  ;;  %183 = sbr.rel (%p180_p3) target bundleno = 220 (0xdc), region = 32 }
   0xa   : > { %s216_s20 = sadd.s32 (!%p180_p3), %s863_s12, %s641_s19 }
   0xb   : > { %p217_p6 = scmp.lt.s32.totalorder (!%p180_p3), %s216_s20, 3 }
   0xe   : > { %s1004_s13 = smov (!%p224_p5, %s867_s13), 1  ;;  %s1006_s20 = smov (!%p217_p6, %s216_s20), 3  ;;  %vm431_vm0 = vsmask.f32 7424  ;;  %vm305_vm1 = vcmask 785408  }
   0xf   : > { %s799_s21 = smul.u32 144, %s1004_s13  ;;  %s760_s25 = sshll.u32 %s1006_s20, 4 }
  0x10   : > { %s221_s28 = scalar_lea.vmem %s989_s0, %s760_s25  ;;  %s231_s4 = scalar_lea.vmem %s991_s2, %s1004_s13 }
  0x11   : > { %s939_s24 = scalar_lea.vmem %s990_s1, %s799_s21  ;;  %v762_v9 = vld [vmem:[%s221_s28] sm:$0xff]  ;;  %v763_v13 = vld [vmem:[%s221_s28 + $0x8] sm:$0xff]  ;;  %s238_s7 = scalar_lea.vmem %s992_s3, %s760_s25 }
  0x12   : > { %v769_v0 = vld [vmem:[%s939_s24 + $0x58] sm:$0xff]  ;;  %v775_v1 = vld [vmem:[%s939_s24 + $0x28] sm:$0xff]  ;;  %v768_v3 = vld [vmem:[%s939_s24 + $0x50] sm:$0xff]  ;;  %v434_v14 = vshll.u32 %v762_v9, 16  ;;  %v432_v18 = vshrl.u32 %v762_v9, 16  ;;  %v438_v20 = vshll.u32 %v763_v13, 16 }
  0x13   : > { %v781_v2 = vld [vmem:[%s939_s24 + $0x88] sm:$0xff]  ;;  %314 = vmatpush.bf16.msra.mxu0 %v769_v0  ;;  %793 = vmatpush.bf16.msra.mxu3 %v769_v0  ;;  %v774_v4 = vld [vmem:[%s939_s24 + $0x20] sm:$0xff]  ;;  %v773_v7 = vld [vmem:[%s939_s24 + $0x18] sm:$0xff]  ;;  %v442_v27 = vshrl.u32 %v763_v13, 16 }
  0x14   : > { %389 = vmatpush.bf16.msra.mxu1 %v775_v1  ;;  %489 = vmatpush.bf16.msra.mxu2 %v781_v2  ;;  %v780_v5 = vld [vmem:[%s939_s24 + $0x80] sm:$0xff]  ;;  %v767_v6 = vld [vmem:[%s939_s24 + $0x48] sm:$0xff]  ;;  %v779_v8 = vld [vmem:[%s939_s24 + $0x78] sm:$0xff]  ;;  %v436_v19 = vrot.slane %v434_v14, 1  ;;  %v440_v25 = vrot.slane %v438_v20, 1 }
  0x15   : > { %v766_v10 = vld [vmem:[%s939_s24 + $0x40] sm:$0xff]  ;;  %v772_v11 = vld [vmem:[%s939_s24 + $0x10] sm:$0xff]  ;;  %v765_v15 = vld [vmem:[%s939_s24 + $0x38] sm:$0xff] }
  0x16   : > { %v778_v12 = vld [vmem:[%s939_s24 + $0x70] sm:$0xff]  ;;  %v771_v16 = vld [vmem:[%s939_s24 + $0x8] sm:$0xff]  ;;  %v770_v22 = vld [vmem:[%s939_s24] sm:$0xff]  ;;  %v437_v24 = vor.u32 %v436_v19, %v432_v18  ;;  %v444_v28 = vor.u32 %v442_v27, %v440_v25 }
  0x17   : > { %315 = vmatpush.bf16.msra.mxu0 %v768_v3  ;;  %794 = vmatpush.bf16.msra.mxu3 %v768_v3  ;;  %v777_v17 = vld [vmem:[%s939_s24 + $0x68] sm:$0xff]  ;;  %v764_v21 = vld [vmem:[%s939_s24 + $0x30] sm:$0xff]  ;;  %v776_v23 = vld [vmem:[%s939_s24 + $0x60] sm:$0xff] }
  0x18   : > { %390 = vmatpush.bf16.msra.mxu1 %v774_v4  ;;  %490 = vmatpush.bf16.msra.mxu2 %v780_v5  ;;  %v441_v26 = vsel %vm431_vm0, %v437_v24, %v440_v25  ;;  %v840_v44 = vld [vmem:[%s231_s4] ss:$0 sm:$0xff] }
  0x1b   : > { %316 = vmatpush.bf16.msra.mxu0 %v767_v6  ;;  %795 = vmatpush.bf16.msra.mxu3 %v767_v6 }
  0x1c   : > { %391 = vmatpush.bf16.msra.mxu1 %v773_v7  ;;  %491 = vmatpush.bf16.msra.mxu2 %v779_v8 }
  0x1f   : > { %317 = vmatpush.bf16.msra.mxu0 %v766_v10  ;;  %796 = vmatpush.bf16.msra.mxu3 %v766_v10 }
  0x20   : > { %392 = vmatpush.bf16.msra.mxu1 %v772_v11  ;;  %492 = vmatpush.bf16.msra.mxu2 %v778_v12 }
  0x23   : > { %318 = vmatpush.bf16.msra.mxu0 %v765_v15  ;;  %797 = vmatpush.bf16.msra.mxu3 %v765_v15 }
  0x24   : > { %393 = vmatpush.bf16.msra.mxu1 %v771_v16  ;;  %493 = vmatpush.bf16.msra.mxu2 %v777_v17 }
  0x27   : > { %319 = vmatpush.bf16.msra.mxu0 %v764_v21  ;;  %798 = vmatpush.bf16.msra.mxu3 %v764_v21 }
  0x28   : > { %394 = vmatpush.bf16.msra.mxu1 %v770_v22  ;;  %494 = vmatpush.bf16.msra.mxu2 %v776_v23 }
  0x2a   : > { %692 = vmatmul.msk.bf16.vlgmr.msra.gmra.mxu0 %vm305_vm1, %v762_v9  ;;  %693 = vmatmul.msk.bf16.vlgmr.msra.gmra.mxu3 %vm305_vm1, %v763_v13 }
  0x2b   : > { %718 = vmatmul.msk.bf16.vlgmr.msra.gmra.mxu1 %vm305_vm1, %v762_v9  ;;  %756 = vmatmul.msk.bf16.vlgmr.msra.gmra.mxu2 %vm305_vm1, %v441_v26 }
  0x3b   : > { %719 = vmatmul.msk.bf16.gmra.mxu1 %vm305_vm1, %v763_v13  ;;  %757 = vmatmul.msk.bf16.gmra.mxu2 %vm305_vm1, %v444_v28 }
  0xa7   : > { %v321_v29 = vpop.f32.mrf.mxu0 }
  0xa8   : > { %331 = vst [vmem:[#allocation2] sm:$0xff] %v321_v29  ;;  %v396_v30 = vpop.f32.mrf.mxu1 }
  0xad   : > { %v326_v31 = vpop.f32.mrf.mxu3 }
  0xae   : > { %333 = vst [vmem:[#allocation2 + $0x10] sm:$0xff] %v326_v31  ;;  %v496_v32 = vpop.f32.mrf.mxu2 }
  0xaf   : > { %v323_v33 = vpop.f32.mrf.mxu0 }
  0xb0   : > { %332 = vst [vmem:[#allocation2 + $0x8] sm:$0xff] %v323_v33  ;;  %v398_v34 = vpop.f32.mrf.mxu1 }
  0xb5   : > { %v328_v35 = vpop.f32.mrf.mxu3 }
  0xb6   : > { %334 = vst [vmem:[#allocation2 + $0x18] sm:$0xff] %v328_v35  ;;  %v498_v36 = vpop.f32.mrf.mxu2 }
  0xb7   : > { %v335_v37 = vld [vmem:[#allocation2 + $0x1] sm:$0xff]  ;;  %v336_v38 = vld [vmem:[#allocation2 + $0x9] sm:$0xff] }
  0xb8   : > { %v406_v39 = vadd.f32 %v396_v30, %v335_v37  ;;  %v407_v40 = vadd.f32 %v398_v34, %v336_v38  ;;  %v401_v41 = vpop.f32.mrf.mxu1 }
  0xba   : > { %410 = vst [vmem:[#allocation2 + $0x1] sm:$0xff] %v406_v39 }
  0xbb   : > { %411 = vst [vmem:[#allocation2 + $0x9] sm:$0xff] %v407_v40 }
  0xbd   : > { %v337_v42 = vld [vmem:[#allocation2 + $0x11] sm:$0xff]  ;;  %v338_v46 = vld [vmem:[#allocation2 + $0x19] sm:$0x7f] }
  0xbe   : > { %v408_v43 = vadd.f32 %v401_v41, %v337_v42  ;;  %v501_v45 = vpop.f32.mrf.mxu2 }
  0xc0   : > { %412 = vst [vmem:[#allocation2 + $0x11] sm:$0xff] %v408_v43  ;;  %v403_v47 = vpop.f32.mrf.mxu1 }
  0xc1   : > { %v414_v48 = vld [vmem:[#allocation2] sm:$0xff]  ;;  %v409_v49 = vadd.f32 %v403_v47, %v338_v46 }
  0xc2   : > { %v506_v50 = vadd.f32 %v496_v32, %v414_v48  ;;  %v415_v51 = vld [vmem:[#allocation2 + $0x8] sm:$0xff] }
  0xc3   : > { %v507_v52 = vadd.f32 %v498_v36, %v415_v51  ;;  %413 = vst [vmem:[#allocation2 + $0x19] sm:$0x7f] %v409_v49 }
  0xc4   : > { %510 = vst [vmem:[#allocation2] sm:$0xff] %v506_v50  ;;  %v522_v53 = vadd.f32 %v840_v44, %v506_v50 }
  0xc5   : > { %511 = vst [vmem:[#allocation2 + $0x8] sm:$0xff] %v507_v52  ;;  %v523_v54 = vadd.f32 %v840_v44, %v507_v52 }
  0xc6   : > { %v526_v55 = vmax.f32 %v522_v53, 0.0  ;;  %v503_v61 = vpop.f32.mrf.mxu2 }
  0xc7   : > { %v527_v56 = vmax.f32 %v523_v54, 0.0  ;;  %v416_v57 = vld [vmem:[#allocation2 + $0x10] sm:$0xff] }
  0xc8   : > { %v508_v58 = vadd.f32 %v501_v45, %v416_v57 }
  0xc9   : > { %v785_v59 = vpack.c.bf16 %v527_v56, %v526_v55 }
  0xca   : > { %512 = vst [vmem:[#allocation2 + $0x10] sm:$0xff] %v508_v58  ;;  %v417_v60 = vld [vmem:[#allocation2 + $0x18] sm:$0x7f]  ;;  %v524_v63 = vadd.f32 %v840_v44, %v508_v58 }
  0xcb   : > { %786 = vst [vmem:[%s238_s7] sm:$0xff] %v785_v59   ;;  %v509_v62 = vadd.f32 %v503_v61, %v417_v60 }
  0xcc   : > { %v528_v2 = vmax.f32 %v524_v63, 0.0 }
  0xcd   : > { %513 = vst [vmem:[#allocation2 + $0x18] sm:$0x7f] %v509_v62 }
  0xd4   : > { %v517_v0 = vld [vmem:[#allocation2 + $0x18] sm:$0xff] }
  0xd5   : > { %v525_v1 = vadd.f32 %v840_v44, %v517_v0 }
  0xd7   : > { %v529_v3 = vmax.f32 %v525_v1, 0.0 }
  0xd9   : > { %v790_v4 = vpack.c.bf16 %v529_v3, %v528_v2 }
  0xdb   : > { %792 = vst [vmem:[%s238_s7 + $0x8] sm:$0xff] %v790_v4  }
  0xdc PF: > { %s13_s16 = sadd.s32 1, %s879_s16   ;;  %s993_s12 = smov %s871_s14 }
  0xdd   : > { %p10_p7 = scmp.ge.s32.totalorder %s13_s16, 6   ;;  %s994_s13 = smov %s875_s15 }
  0xde   : > { %s995_s14 = smov %s998_s17  ;;  %s996_s15 = smov %s1002_s18 }
  0xdf   :  { %12 = sbr.rel (!%p10_p7) target bundleno = 3 (0x3), region = 70 }

// kernel: vgg_forward.18
= control target key start
LH: loop header
LB: loop body
LE: loop exit
PB: predicated region body
PF: predicated region fallthrough
CT: control target
= control target key end

     0   :  { %s975_s12 = smov 0   ;;  %s977_s13 = smov 0   ;;  %s1069_s0 = inlined_call_operand.vmem [shape: bf16[4,32,128], index: 0, kind: input, shape index: {}]   ;;  %s1070_s1 = inlined_call_operand.vmem [shape: bf16[2,3,128,128], index: 1, kind: input, shape index: {}]   ;;  %s1071_s2 = inlined_call_operand.vmem [shape: f32[2,1,128], index: 2, kind: input, shape index: {}]   ;;  %s1072_s3 = inlined_call_operand.vmem [shape: bf16[4,32,128], index: 3, kind: output, shape index: {}]  }
   0x1   :  { %s979_s14 = smov 0   ;;  %s981_s15 = smov 0  }
   0x2   :  { %s983_s16 = smov 0  }
   0x3 LB: > { %s22_s17 = sadd.s32 1, %s945_s14  ;;  %s25_s18 = sadd.s32 1, %s949_s15  ;;  %s953_s16 = sphi %s983_s16, %s13_s16   ;;  %s949_s15 = sphi %s981_s15, %s1076_s15   ;;  %s945_s14 = sphi %s979_s14, %s1075_s14   ;;  %s941_s13 = sphi %s977_s13, %s1074_s13   ;;  %s937_s12 = sphi %s975_s12, %s1073_s12  }
   0x4   : > { %p23_p0 = scmp.ge.s32.totalorder %s22_s17, 2  ;;  %p680_p1 = scmp.ge.s32.totalorder %s953_s16, 1 }
   0x5   : > { %p179_p2 = scmp.lt.s32.totalorder %s953_s16, 5 }
   0x6   : > { %s1078_s17 = smov (%p23_p0, %s22_s17), 0  ;;  %s1080_s18 = smov (!%p23_p0, %s25_s18), %s949_s15 }
   0x7   : > { %p180_p3 = pnand %p680_p1, %p179_p2  ;;  %p27_p4 = scmp.ge.s32.totalorder %s1080_s18, 2 }
   0x8   : > { %p224_p5 = scmp.lt.s32.totalorder (!%p180_p3), %s941_s13, 1  ;;  %s681_s19 = sshll.u32 (!%p180_p3), %s941_s13, 1 }
   0x9   : > { %s1082_s18 = smov (%p27_p4, %s1080_s18), 0  ;;  %183 = sbr.rel (%p180_p3) target bundleno = 228 (0xe4), region = 32 }
   0xa   : > { %s216_s21 = sadd.s32 (!%p180_p3), %s937_s12, %s681_s19 }
   0xb   : > { %p217_p6 = scmp.lt.s32.totalorder (!%p180_p3), %s216_s21, 3 }
   0xe   : > { %s1084_s13 = smov (!%p224_p5, %s941_s13), 1  ;;  %s1086_s21 = smov (!%p217_p6, %s216_s21), 3  ;;  %vm461_vm0 = vsmask.f32 7424 }
   0xf   : > { %s873_s20 = smul.u32 192, %s1084_s13  ;;  %s826_s25 = sshll.u32 %s1086_s21, 4 }
  0x10   : > { %s221_s28 = scalar_lea.vmem %s1069_s0, %s826_s25  ;;  %s231_s4 = scalar_lea.vmem %s1071_s2, %s1084_s13 }
  0x11   : > { %s1011_s24 = scalar_lea.vmem %s1070_s1, %s873_s20  ;;  %v828_v15 = vld [vmem:[%s221_s28] sm:$0xff]  ;;  %v829_v19 = vld [vmem:[%s221_s28 + $0x8] sm:$0xff]  ;;  %s238_s7 = scalar_lea.vmem %s1072_s3, %s826_s25 }
  0x12   : > { %v837_v0 = vld [vmem:[%s1011_s24 + $0x78] sm:$0xff]  ;;  %v836_v3 = vld [vmem:[%s1011_s24 + $0x70] sm:$0xff]  ;;  %v835_v6 = vld [vmem:[%s1011_s24 + $0x68] sm:$0xff]  ;;  %v465_v20 = vshll.u32 %v828_v15, 16  ;;  %v463_v24 = vshrl.u32 %v828_v15, 16  ;;  %v470_v26 = vshll.u32 %v829_v19, 16 }
  0x13   : > { %v845_v1 = vld [vmem:[%s1011_s24 + $0x38] sm:$0xff]  ;;  %322 = vmatpush.bf16.msra.mxu0 %v837_v0  ;;  %865 = vmatpush.bf16.msra.mxu3 %v837_v0  ;;  %v844_v4 = vld [vmem:[%s1011_s24 + $0x30] sm:$0xff]  ;;  %v843_v7 = vld [vmem:[%s1011_s24 + $0x28] sm:$0xff]  ;;  %v474_v33 = vshrl.u32 %v829_v19, 16 }
  0x14   : > { %v853_v2 = vld [vmem:[%s1011_s24 + $0xb8] sm:$0xff]  ;;  %413 = vmatpush.bf16.msra.mxu1 %v845_v1  ;;  %v852_v5 = vld [vmem:[%s1011_s24 + $0xb0] sm:$0xff]  ;;  %v851_v8 = vld [vmem:[%s1011_s24 + $0xa8] sm:$0xff]  ;;  %v467_v25 = vrot.slane %v465_v20, 1  ;;  %v472_v31 = vrot.slane %v470_v26, 1 }
  0x15   : > { %527 = vmatpush.bf16.msra.mxu2 %v853_v2  ;;  %v834_v9 = vld [vmem:[%s1011_s24 + $0x60] sm:$0xff]  ;;  %v833_v12 = vld [vmem:[%s1011_s24 + $0x58] sm:$0xff]  ;;  %v832_v16 = vld [vmem:[%s1011_s24 + $0x50] sm:$0xff] }
  0x16   : > { %v842_v10 = vld [vmem:[%s1011_s24 + $0x20] sm:$0xff]  ;;  %v841_v13 = vld [vmem:[%s1011_s24 + $0x18] sm:$0xff]  ;;  %v840_v17 = vld [vmem:[%s1011_s24 + $0x10] sm:$0xff]  ;;  %v468_v30 = vor.u32 %v467_v25, %v463_v24  ;;  %v476_v34 = vor.u32 %v474_v33, %v472_v31 }
  0x17   : > { %323 = vmatpush.bf16.msra.mxu0 %v836_v3  ;;  %866 = vmatpush.bf16.msra.mxu3 %v836_v3  ;;  %v850_v11 = vld [vmem:[%s1011_s24 + $0xa0] sm:$0xff]  ;;  %v849_v14 = vld [vmem:[%s1011_s24 + $0x98] sm:$0xff]  ;;  %v848_v18 = vld [vmem:[%s1011_s24 + $0x90] sm:$0xff] }
  0x18   : > { %414 = vmatpush.bf16.msra.mxu1 %v844_v4  ;;  %v831_v21 = vld [vmem:[%s1011_s24 + $0x48] sm:$0xff]  ;;  %v830_v27 = vld [vmem:[%s1011_s24 + $0x40] sm:$0xff]  ;;  %v473_v32 = vsel %vm461_vm0, %v468_v30, %v472_v31 }
  0x19   : > { %528 = vmatpush.bf16.msra.mxu2 %v852_v5  ;;  %v839_v22 = vld [vmem:[%s1011_s24 + $0x8] sm:$0xff]  ;;  %v838_v28 = vld [vmem:[%s1011_s24] sm:$0xff] }
  0x1a   : > { %v847_v23 = vld [vmem:[%s1011_s24 + $0x88] sm:$0xff]  ;;  %v846_v29 = vld [vmem:[%s1011_s24 + $0x80] sm:$0xff] }
  0x1b   : > { %324 = vmatpush.bf16.msra.mxu0 %v835_v6  ;;  %867 = vmatpush.bf16.msra.mxu3 %v835_v6  ;;  %v914_v50 = vld [vmem:[%s231_s4] ss:$0 sm:$0xff] }
  0x1c   : > { %415 = vmatpush.bf16.msra.mxu1 %v843_v7 }
  0x1d   : > { %529 = vmatpush.bf16.msra.mxu2 %v851_v8 }
  0x1f   : > { %325 = vmatpush.bf16.msra.mxu0 %v834_v9  ;;  %868 = vmatpush.bf16.msra.mxu3 %v834_v9 }
  0x20   : > { %416 = vmatpush.bf16.msra.mxu1 %v842_v10 }
  0x21   : > { %530 = vmatpush.bf16.msra.mxu2 %v850_v11 }
  0x23   : > { %326 = vmatpush.bf16.msra.mxu0 %v833_v12  ;;  %869 = vmatpush.bf16.msra.mxu3 %v833_v12 }
  0x24   : > { %417 = vmatpush.bf16.msra.mxu1 %v841_v13 }
  0x25   : > { %531 = vmatpush.bf16.msra.mxu2 %v849_v14 }
  0x27   : > { %327 = vmatpush.bf16.msra.mxu0 %v832_v16  ;;  %870 = vmatpush.bf16.msra.mxu3 %v832_v16 }
  0x28   : > { %418 = vmatpush.bf16.msra.mxu1 %v840_v17 }
  0x29   : > { %532 = vmatpush.bf16.msra.mxu2 %v848_v18 }
  0x2b   : > { %328 = vmatpush.bf16.msra.mxu0 %v831_v21  ;;  %871 = vmatpush.bf16.msra.mxu3 %v831_v21 }
  0x2c   : > { %419 = vmatpush.bf16.msra.mxu1 %v839_v22 }
  0x2d   : > { %533 = vmatpush.bf16.msra.mxu2 %v847_v23 }
  0x2f   : > { %329 = vmatpush.bf16.msra.mxu0 %v830_v27  ;;  %872 = vmatpush.bf16.msra.mxu3 %v830_v27 }
  0x30   : > { %420 = vmatpush.bf16.msra.mxu1 %v838_v28 }
  0x31   : > { %534 = vmatpush.bf16.msra.mxu2 %v846_v29 }
  0x32   : > { %330 = vmatmul.bf16.vlgmr.msra.gmra.mxu0 %v828_v15  ;;  %335 = vmatmul.bf16.vlgmr.msra.gmra.mxu3 %v829_v19 }
  0x33   : > { %421 = vmatmul.bf16.vlgmr.msra.gmra.mxu1 %v828_v15 }
  0x34   : > { %535 = vmatmul.bf16.vlgmr.msra.gmra.mxu2 %v473_v32 }
  0x43   : > { %426 = vmatmul.bf16.gmra.mxu1 %v829_v19 }
  0x44   : > { %540 = vmatmul.bf16.gmra.mxu2 %v476_v34 }
  0xaf   : > { %v331_v35 = vpop.f32.mrf.mxu0 }
  0xb0   : > { %341 = vst [vmem:[#allocation2] sm:$0xff] %v331_v35  ;;  %v422_v36 = vpop.f32.mrf.mxu1 }
  0xb5   : > { %v336_v37 = vpop.f32.mrf.mxu3 }
  0xb6   : > { %343 = vst [vmem:[#allocation2 + $0x10] sm:$0xff] %v336_v37 }
  0xb7   : > { %v536_v38 = vpop.f32.mrf.mxu2  ;;  %v333_v39 = vpop.f32.mrf.mxu0 }
  0xb8   : > { %342 = vst [vmem:[#allocation2 + $0x8] sm:$0xff] %v333_v39  ;;  %v424_v40 = vpop.f32.mrf.mxu1 }
  0xbd   : > { %v338_v41 = vpop.f32.mrf.mxu3 }
  0xbe   : > { %344 = vst [vmem:[#allocation2 + $0x18] sm:$0xff] %v338_v41 }
  0xbf   : > { %v538_v42 = vpop.f32.mrf.mxu2  ;;  %v345_v43 = vld [vmem:[#allocation2 + $0x1] sm:$0xff]  ;;  %v346_v44 = vld [vmem:[#allocation2 + $0x9] sm:$0xff] }
  0xc0   : > { %v432_v45 = vadd.f32 %v422_v36, %v345_v43  ;;  %v433_v46 = vadd.f32 %v424_v40, %v346_v44  ;;  %v427_v47 = vpop.f32.mrf.mxu1 }
  0xc2   : > { %436 = vst [vmem:[#allocation2 + $0x1] sm:$0xff] %v432_v45 }
  0xc3   : > { %437 = vst [vmem:[#allocation2 + $0x9] sm:$0xff] %v433_v46 }
  0xc5   : > { %v347_v48 = vld [vmem:[#allocation2 + $0x11] sm:$0xff]  ;;  %v348_v52 = vld [vmem:[#allocation2 + $0x19] sm:$0x7f] }
  0xc6   : > { %v434_v49 = vadd.f32 %v427_v47, %v347_v48 }
  0xc7   : > { %v541_v51 = vpop.f32.mrf.mxu2 }
  0xc8   : > { %438 = vst [vmem:[#allocation2 + $0x11] sm:$0xff] %v434_v49  ;;  %v429_v53 = vpop.f32.mrf.mxu1 }
  0xc9   : > { %v440_v54 = vld [vmem:[#allocation2] sm:$0xff]  ;;  %v435_v55 = vadd.f32 %v429_v53, %v348_v52 }
  0xca   : > { %v546_v56 = vadd.f32 %v536_v38, %v440_v54  ;;  %v441_v57 = vld [vmem:[#allocation2 + $0x8] sm:$0xff] }
  0xcb   : > { %v547_v58 = vadd.f32 %v538_v42, %v441_v57  ;;  %439 = vst [vmem:[#allocation2 + $0x19] sm:$0x7f] %v435_v55 }
  0xcc   : > { %550 = vst [vmem:[#allocation2] sm:$0xff] %v546_v56  ;;  %v562_v59 = vadd.f32 %v914_v50, %v546_v56 }
  0xcd   : > { %551 = vst [vmem:[#allocation2 + $0x8] sm:$0xff] %v547_v58  ;;  %v563_v60 = vadd.f32 %v914_v50, %v547_v58 }
  0xce   : > { %v566_v61 = vmax.f32 %v562_v59, 0.0 }
  0xcf   : > { %v567_v62 = vmax.f32 %v563_v60, 0.0  ;;  %v442_v63 = vld [vmem:[#allocation2 + $0x10] sm:$0xff]  ;;  %v543_v3 = vpop.f32.mrf.mxu2 }
  0xd0   : > { %v548_v0 = vadd.f32 %v541_v51, %v442_v63 }
  0xd1   : > { %v857_v1 = vpack.c.bf16 %v567_v62, %v566_v61 }
  0xd2   : > { %552 = vst [vmem:[#allocation2 + $0x10] sm:$0xff] %v548_v0  ;;  %v443_v2 = vld [vmem:[#allocation2 + $0x18] sm:$0x7f]  ;;  %v564_v5 = vadd.f32 %v914_v50, %v548_v0 }
  0xd3   : > { %858 = vst [vmem:[%s238_s7] sm:$0xff] %v857_v1   ;;  %v549_v4 = vadd.f32 %v543_v3, %v443_v2 }
  0xd4   : > { %v568_v8 = vmax.f32 %v564_v5, 0.0 }
  0xd5   : > { %553 = vst [vmem:[#allocation2 + $0x18] sm:$0x7f] %v549_v4 }
  0xdc   : > { %v557_v6 = vld [vmem:[#allocation2 + $0x18] sm:$0xff] }
  0xdd   : > { %v565_v7 = vadd.f32 %v914_v50, %v557_v6 }
  0xdf   : > { %v569_v9 = vmax.f32 %v565_v7, 0.0 }
  0xe1   : > { %v862_v10 = vpack.c.bf16 %v569_v9, %v568_v8 }
  0xe3   : > { %864 = vst [vmem:[%s238_s7 + $0x8] sm:$0xff] %v862_v10  }
  0xe4 PF: > { %s13_s16 = sadd.s32 1, %s953_s16   ;;  %s1073_s12 = smov %s945_s14 }
  0xe5   : > { %p10_p7 = scmp.ge.s32.totalorder %s13_s16, 6   ;;  %s1074_s13 = smov %s949_s15 }
  0xe6   : > { %s1075_s14 = smov %s1078_s17  ;;  %s1076_s15 = smov %s1082_s18 }
  0xe7   :  { %12 = sbr.rel (!%p10_p7) target bundleno = 3 (0x3), region = 70 }

// kernel: vgg_forward.19
= control target key start
LH: loop header
LB: loop body
LE: loop exit
PB: predicated region body
PF: predicated region fallthrough
CT: control target
= control target key end

     0   :  { %s1039_s6 = smov 0   ;;  %s1304_s0 = inlined_call_operand.vmem [shape: bf16[4,32,16,8], index: 0, kind: input, shape index: {}]   ;;  %s1305_s1 = inlined_call_operand.vmem [shape: bf16[4,16,16,4], index: 1, kind: output, shape index: {}]  }
   0x1 LB: > { %s667_s7 = sadd.s32 4294967295, %s1026_s6   ;;  %p671_p0 = scmp.ge.s32.totalorder %s1026_s6, 1  ;;  %s1026_s6 = sphi %s1039_s6, %s11_s6  }
   0x2   : > { %p87_p1 = scmp.lt.s32.totalorder %s1026_s6, 5 }
   0x4   : > { %p88_p2 = pnand %p671_p0, %p87_p1 }
   0x5   : > { %p107_p3 = scmp.lt.s32.totalorder (!%p88_p2), %s667_s7, 3  ;;  %s1028_s12 = smov (!%p88_p2), 124  }
   0x6   : > { %91 = sbr.rel (%p88_p2) target bundleno = 185 (0xb9), region = 24 }
   0xb   : > { %s1307_s7 = smov (!%p107_p3, %s667_s7), 3  ;;  %vm144_vm0 = vcmask 27648  }
   0xc   : > { %s770_s8 = sshll.u32 %s1307_s7, 8  ;;  %s771_s13 = sshll.u32 %s1307_s7, 7 }
   0xd   : > { %s1053_s11 = scalar_lea.vmem %s1304_s0, %s770_s8  ;;  %s1205_s16 = scalar_lea.vmem %s1305_s1, %s771_s13 }
   0xe   : > { %v773_v0 = vld [vmem:[%s1053_s11] sm:$0xff]   ;;  %v900_v1 = vld [vmem:[%s1053_s11 + $0x8] sm:$0xff]   ;;  %v901_v8 = vld [vmem:[%s1053_s11 + $0x10] sm:$0xff]  }
   0xf   : > { %v903_v2 = vld [vmem:[%s1053_s11 + $0x20] sm:$0xff]   ;;  %v774_v3 = vunpack.c.l.bf16 %v773_v0  ;;  %v775_v4 = vunpack.c.h.bf16 %v773_v0  ;;  %v778_v5 = vunpack.c.l.bf16 %v900_v1  ;;  %v779_v6 = vunpack.c.h.bf16 %v900_v1  ;;  %v904_v7 = vld [vmem:[%s1053_s11 + $0x28] sm:$0xff]   ;;  %v902_v9 = vld [vmem:[%s1053_s11 + $0x18] sm:$0xff]  }
  0x10   : > { %v790_v10 = vunpack.c.l.bf16 %v903_v2  ;;  %v791_v11 = vunpack.c.h.bf16 %v903_v2  ;;  %v794_v12 = vunpack.c.l.bf16 %v904_v7  ;;  %v795_v13 = vunpack.c.h.bf16 %v904_v7  ;;  %v905_v14 = vld [vmem:[%s1053_s11 + $0x30] sm:$0xff]   ;;  %v906_v23 = vld [vmem:[%s1053_s11 + $0x38] sm:$0xff]   ;;  %v911_v28 = vld [vmem:[%s1053_s11 + $0x60] sm:$0xff]  }
  0x11   : > { %v1062_v15 = vmax.f32 %v774_v3, %v778_v5  ;;  %v1064_v16 = vmax.f32 %v775_v4, %v779_v6  ;;  %v782_v17 = vunpack.c.l.bf16 %v901_v8  ;;  %v783_v18 = vunpack.c.h.bf16 %v901_v8  ;;  %v912_v31 = vld [vmem:[%s1053_s11 + $0x68] sm:$0xff]   ;;  %v913_v36 = vld [vmem:[%s1053_s11 + $0x70] sm:$0xff]   ;;  %v914_v37 = vld [vmem:[%s1053_s11 + $0x78] sm:$0xff]  }
  0x12   : > { %v1066_v19 = vmax.f32 %v790_v10, %v794_v12  ;;  %v1068_v20 = vmax.f32 %v791_v11, %v795_v13  ;;  %v786_v21 = vunpack.c.l.bf16 %v902_v9  ;;  %v787_v22 = vunpack.c.h.bf16 %v902_v9  ;;  %v917_v42 = vld [vmem:[%s1053_s11 + $0x90] sm:$0xff]   ;;  %v918_v47 = vld [vmem:[%s1053_s11 + $0x98] sm:$0xff]   ;;  %v907_v50 = vld [vmem:[%s1053_s11 + $0x40] sm:$0xff]  }
  0x13   : > { %v798_v24 = vunpack.c.l.bf16 %v905_v14  ;;  %v799_v25 = vunpack.c.h.bf16 %v905_v14  ;;  %v802_v29 = vunpack.c.l.bf16 %v906_v23  ;;  %v803_v30 = vunpack.c.h.bf16 %v906_v23  ;;  %v908_v57 = vld [vmem:[%s1053_s11 + $0x48] sm:$0xff]   ;;  %v919_v61 = vld [vmem:[%s1053_s11 + $0xa0] sm:$0xff]   ;;  %v910_v23 = vld [vmem:[%s1053_s11 + $0x58] sm:$0xff]  }
  0x14   : > { %v1071_v26 = vmax.f32 %v782_v17, %v786_v21  ;;  %v1073_v27 = vmax.f32 %v783_v18, %v787_v22  ;;  %v940_v32 = vpack.i.bf16 %v1064_v16, %v1062_v15  ;;  %v822_v35 = vunpack.c.l.bf16 %v911_v28  ;;  %v920_v2 = vld [vmem:[%s1053_s11 + $0xa8] sm:$0xff]   ;;  %v923_v5 = vld [vmem:[%s1053_s11 + $0xc0] sm:$0xff]   ;;  %v909_v17 = vld [vmem:[%s1053_s11 + $0x50] sm:$0xff]  }
  0x15   : > { %v1079_v33 = vmax.f32 %v798_v24, %v802_v29  ;;  %v1081_v34 = vmax.f32 %v799_v25, %v803_v30  ;;  %v950_v38 = vpack.i.bf16 %v1068_v20, %v1066_v19  ;;  %v823_v39 = vunpack.c.h.bf16 %v911_v28  ;;  %v924_v12 = vld [vmem:[%s1053_s11 + $0xc8] sm:$0xff]   ;;  %v925_v29 = vld [vmem:[%s1053_s11 + $0xd0] sm:$0xff]  }
  0x16   : > { %941 = vrot.lane.b32.xlu0 %v940_v32, %s1028_s12  ;;  %v826_v40 = vunpack.c.l.bf16 %v912_v31  ;;  %v827_v41 = vunpack.c.h.bf16 %v912_v31  ;;  %v945_v43 = vpack.i.bf16 %v1073_v27, %v1071_v26  ;;  %v830_v44 = vunpack.c.l.bf16 %v913_v36 }
  0x17   : > { %951 = vrot.lane.b32.xlu1 %v950_v38, %s1028_s12  ;;  %v831_v45 = vunpack.c.h.bf16 %v913_v36  ;;  %v834_v46 = vunpack.c.l.bf16 %v914_v37  ;;  %v835_v51 = vunpack.c.h.bf16 %v914_v37  ;;  %v846_v53 = vunpack.c.l.bf16 %v917_v42  ;;  %v926_v36 = vld [vmem:[%s1053_s11 + $0xd8] sm:$0xff]  }
  0x18   : > { %v1093_v48 = vmax.f32 %v822_v35, %v826_v40  ;;  %v1095_v49 = vmax.f32 %v823_v39, %v827_v41  ;;  %v847_v54 = vunpack.c.h.bf16 %v917_v42  ;;  %v955_v55 = vpack.i.bf16 %v1081_v34, %v1079_v33  ;;  %v929_v41 = vld [vmem:[%s1053_s11 + $0xf0] sm:$0xff]  }
  0x19   : > { %v1098_v52 = vmax.f32 %v830_v44, %v834_v46  ;;  %v850_v56 = vunpack.c.l.bf16 %v918_v47  ;;  %v1103_v58 = vmax.f32 %v831_v45, %v835_v51  ;;  %v851_v59 = vunpack.c.h.bf16 %v918_v47  ;;  %v930_v46 = vld [vmem:[%s1053_s11 + $0xf8] sm:$0xff]   ;;  %v915_v51 = vld [vmem:[%s1053_s11 + $0x80] sm:$0xff]  }
  0x1a   : > { %v806_v60 = vunpack.c.l.bf16 %v907_v50  ;;  %v807_v63 = vunpack.c.h.bf16 %v907_v50  ;;  %v810_v1 = vunpack.c.l.bf16 %v908_v57  ;;  %v811_v3 = vunpack.c.h.bf16 %v908_v57 }
  0x1b   : > { %v1106_v62 = vmax.f32 %v846_v53, %v850_v56  ;;  %v1108_v0 = vmax.f32 %v847_v54, %v851_v59  ;;  %v854_v4 = vunpack.c.l.bf16 %v919_v61  ;;  %v855_v7 = vunpack.c.h.bf16 %v919_v61  ;;  %v916_v56 = vld [vmem:[%s1053_s11 + $0x88] sm:$0xff]  }
  0x1c   : > { %v1114_v6 = vmax.f32 %v806_v60, %v810_v1  ;;  %v970_v8 = vpack.i.bf16 %v1095_v49, %v1093_v48  ;;  %v1118_v9 = vmax.f32 %v807_v63, %v811_v3  ;;  %v858_v10 = vunpack.c.l.bf16 %v920_v2  ;;  %v921_v63 = vld [vmem:[%s1053_s11 + $0xb0] sm:$0xff]  }
  0x1d   : > { %v859_v11 = vunpack.c.h.bf16 %v920_v2  ;;  %v975_v13 = vpack.i.bf16 %v1103_v58, %v1098_v52  ;;  %v870_v14 = vunpack.c.l.bf16 %v923_v5  ;;  %v871_v22 = vunpack.c.h.bf16 %v923_v5 }
  0x1e   : > { %946 = vrot.lane.b32.xlu0 %v945_v43, %s1028_s12  ;;  %v1124_v18 = vmax.f32 %v854_v4, %v858_v10  ;;  %v874_v24 = vunpack.c.l.bf16 %v924_v12  ;;  %v875_v25 = vunpack.c.h.bf16 %v924_v12  ;;  %v814_v28 = vunpack.c.l.bf16 %v909_v17  ;;  %v922_v4 = vld [vmem:[%s1053_s11 + $0xb8] sm:$0xff]  }
  0x1f   : > { %956 = vrot.lane.b32.xlu1 %v955_v55, %s1028_s12  ;;  %v1126_v21 = vmax.f32 %v855_v7, %v859_v11  ;;  %v815_v32 = vunpack.c.h.bf16 %v909_v17  ;;  %v818_v35 = vunpack.c.l.bf16 %v910_v23  ;;  %v960_v37 = vpack.i.bf16 %v1118_v9, %v1114_v6  ;;  %v927_v17 = vld [vmem:[%s1053_s11 + $0xe0] sm:$0xff]  }
  0x20   : > { %v1130_v30 = vmax.f32 %v870_v14, %v874_v24  ;;  %v1132_v31 = vmax.f32 %v871_v22, %v875_v25  ;;  %v819_v38 = vunpack.c.h.bf16 %v910_v23  ;;  %v878_v40 = vunpack.c.l.bf16 %v925_v29  ;;  %v928_v24 = vld [vmem:[%s1053_s11 + $0xe8] sm:$0xff]  }
  0x21   : > { %v1139_v39 = vmax.f32 %v814_v28, %v818_v35  ;;  %v985_v42 = vpack.i.bf16 %v1108_v0, %v1106_v62  ;;  %961 = vrot.lane.b32.xlu2 %v960_v37, %s1028_s12  ;;  %v879_v44 = vunpack.c.h.bf16 %v925_v29  ;;  %v882_v45 = vunpack.c.l.bf16 %v926_v36 }
  0x22   : > { %v1145_v43 = vmax.f32 %v815_v32, %v819_v38  ;;  %v990_v47 = vpack.i.bf16 %v1126_v21, %v1124_v18  ;;  %v883_v50 = vunpack.c.h.bf16 %v926_v36  ;;  %v894_v54 = vunpack.c.l.bf16 %v929_v41 }
  0x23   : > { %v1151_v53 = vmax.f32 %v878_v40, %v882_v45  ;;  %v895_v55 = vunpack.c.h.bf16 %v929_v41  ;;  %v898_v59 = vunpack.c.l.bf16 %v930_v46  ;;  %v899_v60 = vunpack.c.h.bf16 %v930_v46 }
  0x24   : > { %v1154_v57 = vmax.f32 %v879_v44, %v883_v50  ;;  %v838_v61 = vunpack.c.l.bf16 %v915_v51  ;;  %v839_v2 = vunpack.c.h.bf16 %v915_v51  ;;  %v842_v3 = vunpack.c.l.bf16 %v916_v56 }
  0x25   : > { %v1157_v1 = vmax.f32 %v894_v54, %v898_v59  ;;  %v965_v5 = vpack.i.bf16 %v1145_v43, %v1139_v39  ;;  %v1163_v7 = vmax.f32 %v895_v55, %v899_v60  ;;  %v862_v11 = vunpack.c.l.bf16 %v921_v63 }
  0x26   : > { %971 = vrot.lane.b32.xlu0 %v970_v8, %s1028_s12  ;;  %v843_v8 = vunpack.c.h.bf16 %v916_v56  ;;  %v1166_v10 = vmax.f32 %v838_v61, %v842_v3  ;;  %v866_v14 = vunpack.c.l.bf16 %v922_v4  ;;  %v1000_v22 = vpack.i.bf16 %v1132_v31, %v1130_v30 }
  0x27   : > { %976 = vrot.lane.b32.xlu1 %v975_v13, %s1028_s12  ;;  %v863_v13 = vunpack.c.h.bf16 %v921_v63  ;;  %v867_v23 = vunpack.c.h.bf16 %v922_v4  ;;  %v1005_v25 = vpack.i.bf16 %v1154_v57, %v1151_v53  ;;  %v886_v32 = vunpack.c.l.bf16 %v927_v17 }
  0x28   : > { %v1169_v12 = vmax.f32 %v839_v2, %v843_v8  ;;  %v1177_v28 = vmax.f32 %v862_v11, %v866_v14  ;;  %v887_v35 = vunpack.c.h.bf16 %v927_v17  ;;  %v890_v36 = vunpack.c.l.bf16 %v928_v24 }
  0x29   : > { %966 = vrot.lane.b32.xlu2 %v965_v5, %s1028_s12  ;;  %v1179_v29 = vmax.f32 %v863_v13, %v867_v23  ;;  %v891_v37 = vunpack.c.h.bf16 %v928_v24 }
  0x2a   : > { %v980_v38 = vpack.i.bf16 %v1169_v12, %v1166_v10  ;;  %v1186_v40 = vmax.f32 %v886_v32, %v890_v36 }
  0x2b   : > { %v1188_v41 = vmax.f32 %v887_v35, %v891_v37  ;;  %v995_v44 = vpack.i.bf16 %v1179_v29, %v1177_v28 }
  0x2d   : > { %v1010_v45 = vpack.i.bf16 %v1188_v41, %v1186_v40 }
  0x2e   : > { %986 = vrot.lane.b32.xlu0 %v985_v42, %s1028_s12  ;;  %v1015_v42 = vpack.i.bf16 %v1163_v7, %v1157_v1 }
  0x2f   : > { %991 = vrot.lane.b32.xlu1 %v990_v47, %s1028_s12 }
  0x31   : > { %981 = vrot.lane.b32.xlu2 %v980_v38, %s1028_s12 }
  0x36   : > { %1001 = vrot.lane.b32.xlu0 %v1000_v22, %s1028_s12 }
  0x37   : > { %1006 = vrot.lane.b32.xlu1 %v1005_v25, %s1028_s12 }
  0x39   : > { %996 = vrot.lane.b32.xlu2 %v995_v44, %s1028_s12 }
  0x3e   : > { %1016 = vrot.lane.b32.xlu0 %v1015_v42, %s1028_s12 }
  0x41   : > { %1011 = vrot.lane.b32.xlu2 %v1010_v45, %s1028_s12 }
  0x7b   : > { %v962_v46 = vpop.permute.xlu2 %961 }
  0x7c   : > { %v964_v47 = vunpack.i.h.bf16 %v962_v46  ;;  %v963_v50 = vunpack.i.l.bf16 %v962_v46 }
  0x7e   : > { %v265_v51 = vmax.f32 %v1118_v9, %v964_v47  ;;  %v264_v54 = vmax.f32 %v1114_v6, %v963_v50 }
  0x80   : > { %v267_v55 = vpack.c.bf16 %v265_v51, %v265_v51  ;;  %v266_v56 = vpack.c.bf16 %v264_v54, %v264_v54 }
  0x82   : > { %701 = vst.msk [vmem:[%s1205_s16 + $0x24] sm:$0xf] %vm144_vm0, %v267_v55 }
  0x83   : > { %700 = vst.msk [vmem:[%s1205_s16 + $0x20] sm:$0xf] %vm144_vm0, %v266_v56  ;;  %v967_v2 = vpop.permute.xlu2 %966 }
  0x84   : > { %v969_v5 = vunpack.i.h.bf16 %v967_v2  ;;  %v968_v8 = vunpack.i.l.bf16 %v967_v2 }
  0x86   : > { %v296_v22 = vmax.f32 %v1145_v43, %v969_v5  ;;  %v295_v23 = vmax.f32 %v1139_v39, %v968_v8 }
  0x88   : > { %v942_v59 = vpop.permute.xlu0 %941 }
  0x89   : > { %v944_v60 = vunpack.i.h.bf16 %v942_v59  ;;  %v943_v61 = vunpack.i.l.bf16 %v942_v59  ;;  %v952_v63 = vpop.permute.xlu1 %951 }
  0x8a   : > { %v954_v6 = vunpack.i.h.bf16 %v952_v63  ;;  %v953_v9 = vunpack.i.l.bf16 %v952_v63 }
  0x8b   : > { %v141_v3 = vmax.f32 %v1064_v16, %v944_v60  ;;  %v140_v4 = vmax.f32 %v1062_v15, %v943_v61  ;;  %v298_v15 = vpack.c.bf16 %v296_v22, %v296_v22  ;;  %v982_v36 = vpop.permute.xlu2 %981 }
  0x8c   : > { %v203_v11 = vmax.f32 %v1068_v20, %v954_v6  ;;  %v202_v13 = vmax.f32 %v1066_v19, %v953_v9  ;;  %v297_v20 = vpack.c.bf16 %v295_v23, %v295_v23  ;;  %v984_v42 = vunpack.i.h.bf16 %v982_v36 }
  0x8d   : > { %v143_v14 = vpack.c.bf16 %v141_v3, %v141_v3  ;;  %v142_v17 = vpack.c.bf16 %v140_v4, %v140_v4  ;;  %707 = vst.msk [vmem:[%s1205_s16 + $0x2c] sm:$0xf] %vm144_vm0, %v298_v15  ;;  %v983_v44 = vunpack.i.l.bf16 %v982_v36 }
  0x8e   : > { %v205_v24 = vpack.c.bf16 %v203_v11, %v203_v11  ;;  %v204_v25 = vpack.c.bf16 %v202_v13, %v202_v13  ;;  %706 = vst.msk [vmem:[%s1205_s16 + $0x28] sm:$0xf] %vm144_vm0, %v297_v20  ;;  %v389_v51 = vmax.f32 %v1169_v12, %v984_v42 }
  0x8f   : > { %146 = vst.msk [vmem:[%s1205_s16 + $0x4] sm:$0xf] %vm144_vm0, %v143_v14 }
  0x90   : > { %145 = vst.msk [vmem:[%s1205_s16] sm:$0xf] %vm144_vm0, %v142_v17  ;;  %v947_v16 = vpop.permute.xlu0 %946  ;;  %v391_v55 = vpack.c.bf16 %v389_v51, %v389_v51 }
  0x91   : > { %689 = vst.msk [vmem:[%s1205_s16 + $0x14] sm:$0xf] %vm144_vm0, %v205_v24  ;;  %v949_v19 = vunpack.i.h.bf16 %v947_v16  ;;  %v948_v32 = vunpack.i.l.bf16 %v947_v16  ;;  %v957_v35 = vpop.permute.xlu1 %956 }
  0x92   : > { %688 = vst.msk [vmem:[%s1205_s16 + $0x10] sm:$0xf] %vm144_vm0, %v204_v25  ;;  %v959_v43 = vunpack.i.h.bf16 %v957_v35  ;;  %v958_v39 = vunpack.i.l.bf16 %v957_v35 }
  0x93   : > { %v172_v37 = vmax.f32 %v1073_v27, %v949_v19  ;;  %v171_v38 = vmax.f32 %v1071_v26, %v948_v32  ;;  %v388_v27 = vmax.f32 %v1166_v10, %v983_v44  ;;  %v997_v61 = vpop.permute.xlu2 %996  ;;  %725 = vst.msk [vmem:[%s1205_s16 + $0x44] sm:$0xf] %vm144_vm0, %v391_v55 }
  0x94   : > { %v234_v45 = vmax.f32 %v1081_v34, %v959_v43  ;;  %v233_v46 = vmax.f32 %v1079_v33, %v958_v39  ;;  %v999_v9 = vunpack.i.h.bf16 %v997_v61  ;;  %v998_v2 = vunpack.i.l.bf16 %v997_v61 }
  0x95   : > { %v174_v47 = vpack.c.bf16 %v172_v37, %v172_v37  ;;  %v173_v50 = vpack.c.bf16 %v171_v38, %v171_v38  ;;  %v390_v34 = vpack.c.bf16 %v388_v27, %v388_v27 }
  0x96   : > { %v236_v54 = vpack.c.bf16 %v234_v45, %v234_v45  ;;  %v235_v26 = vpack.c.bf16 %v233_v46, %v233_v46  ;;  %v482_v11 = vmax.f32 %v1179_v29, %v999_v9 }
  0x97   : > { %683 = vst.msk [vmem:[%s1205_s16 + $0xc] sm:$0xf] %vm144_vm0, %v174_v47 }
  0x98   : > { %682 = vst.msk [vmem:[%s1205_s16 + $0x8] sm:$0xf] %vm144_vm0, %v173_v50  ;;  %v972_v56 = vpop.permute.xlu0 %971  ;;  %v484_v14 = vpack.c.bf16 %v482_v11, %v482_v11 }
  0x99   : > { %695 = vst.msk [vmem:[%s1205_s16 + $0x1c] sm:$0xf] %vm144_vm0, %v236_v54  ;;  %v974_v33 = vunpack.i.h.bf16 %v972_v56  ;;  %v973_v59 = vunpack.i.l.bf16 %v972_v56  ;;  %v977_v60 = vpop.permute.xlu1 %976 }
  0x9a   : > { %694 = vst.msk [vmem:[%s1205_s16 + $0x18] sm:$0xf] %vm144_vm0, %v235_v26  ;;  %v979_v12 = vunpack.i.h.bf16 %v977_v60  ;;  %v978_v10 = vunpack.i.l.bf16 %v977_v60 }
  0x9b   : > { %v327_v63 = vmax.f32 %v1095_v49, %v974_v33  ;;  %v326_v6 = vmax.f32 %v1093_v48, %v973_v59  ;;  %724 = vst.msk [vmem:[%s1205_s16 + $0x40] sm:$0xf] %vm144_vm0, %v390_v34  ;;  %v481_v49 = vmax.f32 %v1177_v28, %v998_v2  ;;  %v1012_v24 = vpop.permute.xlu2 %1011 }
  0x9c   : > { %v358_v3 = vmax.f32 %v1103_v58, %v979_v12  ;;  %v357_v4 = vmax.f32 %v1098_v52, %v978_v10  ;;  %743 = vst.msk [vmem:[%s1205_s16 + $0x5c] sm:$0xf] %vm144_vm0, %v484_v14  ;;  %v1014_v16 = vunpack.i.h.bf16 %v1012_v24  ;;  %v1013_v20 = vunpack.i.l.bf16 %v1012_v24 }
  0x9d   : > { %v329_v5 = vpack.c.bf16 %v327_v63, %v327_v63  ;;  %v328_v8 = vpack.c.bf16 %v326_v6, %v326_v6  ;;  %v483_v58 = vpack.c.bf16 %v481_v49, %v481_v49 }
  0x9e   : > { %v360_v13 = vpack.c.bf16 %v358_v3, %v358_v3  ;;  %v359_v48 = vpack.c.bf16 %v357_v4, %v357_v4  ;;  %v575_v39 = vmax.f32 %v1188_v41, %v1014_v16 }
  0x9f   : > { %713 = vst.msk [vmem:[%s1205_s16 + $0x34] sm:$0xf] %vm144_vm0, %v329_v5 }
  0xa0   : > { %712 = vst.msk [vmem:[%s1205_s16 + $0x30] sm:$0xf] %vm144_vm0, %v328_v8  ;;  %v987_v17 = vpop.permute.xlu0 %986  ;;  %v577_v37 = vpack.c.bf16 %v575_v39, %v575_v39 }
  0xa1   : > { %719 = vst.msk [vmem:[%s1205_s16 + $0x3c] sm:$0xf] %vm144_vm0, %v360_v13  ;;  %v989_v52 = vunpack.i.h.bf16 %v987_v17  ;;  %v988_v22 = vunpack.i.l.bf16 %v987_v17  ;;  %v992_v23 = vpop.permute.xlu1 %991 }
  0xa2   : > { %718 = vst.msk [vmem:[%s1205_s16 + $0x38] sm:$0xf] %vm144_vm0, %v359_v48  ;;  %v994_v29 = vunpack.i.h.bf16 %v992_v23  ;;  %v993_v28 = vunpack.i.l.bf16 %v992_v23 }
  0xa3   : > { %v420_v25 = vmax.f32 %v1108_v0, %v989_v52  ;;  %v419_v15 = vmax.f32 %v1106_v62, %v988_v22  ;;  %742 = vst.msk [vmem:[%s1205_s16 + $0x58] sm:$0xf] %vm144_vm0, %v483_v58  ;;  %v574_v0 = vmax.f32 %v1186_v40, %v1013_v20 }
  0xa4   : > { %v451_v19 = vmax.f32 %v1126_v21, %v994_v29  ;;  %v450_v32 = vmax.f32 %v1124_v18, %v993_v28  ;;  %761 = vst.msk [vmem:[%s1205_s16 + $0x74] sm:$0xf] %vm144_vm0, %v577_v37 }
  0xa5   : > { %v422_v35 = vpack.c.bf16 %v420_v25, %v420_v25  ;;  %v421_v43 = vpack.c.bf16 %v419_v15, %v419_v15  ;;  %v576_v21 = vpack.c.bf16 %v574_v0, %v574_v0 }
  0xa6   : > { %v453_v36 = vpack.c.bf16 %v451_v19, %v451_v19  ;;  %v452_v62 = vpack.c.bf16 %v450_v32, %v450_v32 }
  0xa7   : > { %731 = vst.msk [vmem:[%s1205_s16 + $0x4c] sm:$0xf] %vm144_vm0, %v422_v35 }
  0xa8   : > { %730 = vst.msk [vmem:[%s1205_s16 + $0x48] sm:$0xf] %vm144_vm0, %v421_v43  ;;  %v1002_v38 = vpop.permute.xlu0 %1001 }
  0xa9   : > { %737 = vst.msk [vmem:[%s1205_s16 + $0x54] sm:$0xf] %vm144_vm0, %v453_v36  ;;  %v1004_v18 = vunpack.i.h.bf16 %v1002_v38  ;;  %v1003_v42 = vunpack.i.l.bf16 %v1002_v38  ;;  %v1007_v41 = vpop.permute.xlu1 %1006 }
  0xaa   : > { %736 = vst.msk [vmem:[%s1205_s16 + $0x50] sm:$0xf] %vm144_vm0, %v452_v62  ;;  %v1009_v40 = vunpack.i.h.bf16 %v1007_v41  ;;  %v1008_v44 = vunpack.i.l.bf16 %v1007_v41 }
  0xab   : > { %v513_v45 = vmax.f32 %v1132_v31, %v1004_v18  ;;  %v512_v46 = vmax.f32 %v1130_v30, %v1003_v42  ;;  %760 = vst.msk [vmem:[%s1205_s16 + $0x70] sm:$0xf] %vm144_vm0, %v576_v21 }
  0xac   : > { %v544_v47 = vmax.f32 %v1154_v57, %v1009_v40  ;;  %v543_v50 = vmax.f32 %v1151_v53, %v1008_v44 }
  0xad   : > { %v515_v51 = vpack.c.bf16 %v513_v45, %v513_v45  ;;  %v514_v27 = vpack.c.bf16 %v512_v46, %v512_v46 }
  0xae   : > { %v546_v54 = vpack.c.bf16 %v544_v47, %v544_v47  ;;  %v545_v26 = vpack.c.bf16 %v543_v50, %v543_v50 }
  0xaf   : > { %749 = vst.msk [vmem:[%s1205_s16 + $0x64] sm:$0xf] %vm144_vm0, %v515_v51 }
  0xb0   : > { %748 = vst.msk [vmem:[%s1205_s16 + $0x60] sm:$0xf] %vm144_vm0, %v514_v27  ;;  %v1017_v31 = vpop.permute.xlu0 %1016 }
  0xb1   : > { %755 = vst.msk [vmem:[%s1205_s16 + $0x6c] sm:$0xf] %vm144_vm0, %v546_v54  ;;  %v1019_v30 = vunpack.i.h.bf16 %v1017_v31  ;;  %v1018_v55 = vunpack.i.l.bf16 %v1017_v31 }
  0xb2   : > { %754 = vst.msk [vmem:[%s1205_s16 + $0x68] sm:$0xf] %vm144_vm0, %v545_v26 }
  0xb3   : > { %v606_v57 = vmax.f32 %v1163_v7, %v1019_v30  ;;  %v605_v53 = vmax.f32 %v1157_v1, %v1018_v55 }
  0xb5   : > { %v608_v56 = vpack.c.bf16 %v606_v57, %v606_v57  ;;  %v607_v34 = vpack.c.bf16 %v605_v53, %v605_v53 }
  0xb7   : > { %767 = vst.msk [vmem:[%s1205_s16 + $0x7c] sm:$0xf] %vm144_vm0, %v608_v56 }
  0xb8   : > { %766 = vst.msk [vmem:[%s1205_s16 + $0x78] sm:$0xf] %vm144_vm0, %v607_v34 }
  0xb9 PF: > { %s11_s6 = sadd.s32 1, %s1026_s6  }
  0xba   : > { %p8_p4 = scmp.ge.s32.totalorder %s11_s6, 6  }
  0xbc   :  { %10 = sbr.rel (!%p8_p4) target bundleno = 1 (0x1), region = 100 }

// kernel: vgg_forward.20
= control target key start
LH: loop header
LB: loop body
LE: loop exit
PB: predicated region body
PF: predicated region fallthrough
CT: control target
= control target key end

     0   :  { %s735_s12 = smov 0   ;;  %s737_s13 = smov 0   ;;  %s803_s0 = inlined_call_operand.vmem [shape: bf16[4,16,64], index: 0, kind: input, shape index: {}]   ;;  %s804_s1 = inlined_call_operand.vmem [shape: bf16[2,3,64,128], index: 1, kind: input, shape index: {}]   ;;  %s805_s2 = inlined_call_operand.vmem [shape: f32[2,1,128], index: 2, kind: input, shape index: {}]   ;;  %s806_s3 = inlined_call_operand.vmem [shape: bf16[4,16,128], index: 3, kind: output, shape index: {}]  }
   0x1   :  { %s739_s14 = smov 0   ;;  %s741_s15 = smov 0  }
   0x2   :  { %s743_s16 = smov 0  }
   0x3 LB: > { %s22_s17 = sadd.s32 1, %s705_s14  ;;  %s25_s18 = sadd.s32 1, %s709_s15  ;;  %s713_s16 = sphi %s743_s16, %s13_s16   ;;  %s709_s15 = sphi %s741_s15, %s810_s15   ;;  %s705_s14 = sphi %s739_s14, %s809_s14   ;;  %s701_s13 = sphi %s737_s13, %s808_s13   ;;  %s697_s12 = sphi %s735_s12, %s807_s12  }
   0x4   : > { %p23_p0 = scmp.ge.s32.totalorder %s22_s17, 2  ;;  %p532_p1 = scmp.ge.s32.totalorder %s713_s16, 1 }
   0x5   : > { %p179_p2 = scmp.lt.s32.totalorder %s713_s16, 5 }
   0x6   : > { %s812_s17 = smov (%p23_p0, %s22_s17), 0  ;;  %s814_s18 = smov (!%p23_p0, %s25_s18), %s709_s15 }
   0x7   : > { %p180_p3 = pnand %p532_p1, %p179_p2  ;;  %p27_p4 = scmp.ge.s32.totalorder %s814_s18, 2 }
   0x8   : > { %p224_p5 = scmp.lt.s32.totalorder (!%p180_p3), %s701_s13, 1  ;;  %s533_s19 = sshll.u32 (!%p180_p3), %s701_s13, 1 }
   0x9   : > { %s816_s18 = smov (%p27_p4, %s814_s18), 0  ;;  %183 = sbr.rel (%p180_p3) target bundleno = 204 (0xcc), region = 32 }
   0xa   : > { %s216_s20 = sadd.s32 (!%p180_p3), %s697_s12, %s533_s19 }
   0xb   : > { %p217_p6 = scmp.lt.s32.totalorder (!%p180_p3), %s216_s20, 3 }
   0xe   : > { %s818_s13 = smov (!%p224_p5, %s701_s13), 1  ;;  %s820_s20 = smov (!%p217_p6, %s216_s20), 3  ;;  %vm282_vm0 = vcmask 523264  }
   0xf   : > { %s633_s21 = smul.u32 96, %s818_s13  ;;  %s613_s25 = sshll.u32 %s820_s20, 3 }
  0x10   : > { %s221_s28 = scalar_lea.vmem %s803_s0, %s613_s25  ;;  %s231_s4 = scalar_lea.vmem %s805_s2, %s818_s13 }
  0x11   : > { %s228_s24 = scalar_lea.vmem %s804_s1, %s633_s21  ;;  %v615_v6 = vld [vmem:[%s221_s28] sm:$0xff]  ;;  %s238_s7 = scalar_lea.vmem %s806_s3, %s613_s25 }
  0x12   : > { %v619_v0 = vld [vmem:[%s228_s24 + $0x38] sm:$0xff]  ;;  %v618_v3 = vld [vmem:[%s228_s24 + $0x30] sm:$0xff]  ;;  %v617_v7 = vld [vmem:[%s228_s24 + $0x28] sm:$0xff]  ;;  %v367_v9 = vshll.u32 %v615_v6, 16  ;;  %v365_v13 = vshrl.u32 %v615_v6, 16 }
  0x13   : > { %v623_v1 = vld [vmem:[%s228_s24 + $0x18] sm:$0xff]  ;;  %290 = vmatpush.bf16.msra.mxu0 %v619_v0  ;;  %v622_v4 = vld [vmem:[%s228_s24 + $0x10] sm:$0xff]  ;;  %v621_v8 = vld [vmem:[%s228_s24 + $0x8] sm:$0xff] }
  0x14   : > { %v627_v2 = vld [vmem:[%s228_s24 + $0x58] sm:$0xff]  ;;  %340 = vmatpush.bf16.msra.mxu1 %v623_v1  ;;  %v626_v5 = vld [vmem:[%s228_s24 + $0x50] sm:$0xff]  ;;  %v625_v10 = vld [vmem:[%s228_s24 + $0x48] sm:$0xff]  ;;  %v369_v14 = vrot.slane %v367_v9, 1 }
  0x15   : > { %402 = vmatpush.bf16.msra.mxu2 %v627_v2  ;;  %v616_v11 = vld [vmem:[%s228_s24 + $0x20] sm:$0xff] }
  0x16   : > { %v620_v12 = vld [vmem:[%s228_s24] sm:$0xff]  ;;  %v370_v16 = vor.u32 %v369_v14, %v365_v13 }
  0x17   : > { %291 = vmatpush.bf16.msra.mxu0 %v618_v3  ;;  %v624_v15 = vld [vmem:[%s228_s24 + $0x40] sm:$0xff] }
  0x18   : > { %341 = vmatpush.bf16.msra.mxu1 %v622_v4  ;;  %v674_v31 = vld [vmem:[%s231_s4] ss:$0 sm:$0xff] }
  0x19   : > { %403 = vmatpush.bf16.msra.mxu2 %v626_v5 }
  0x1b   : > { %292 = vmatpush.bf16.msra.mxu0 %v617_v7 }
  0x1c   : > { %342 = vmatpush.bf16.msra.mxu1 %v621_v8 }
  0x1d   : > { %404 = vmatpush.bf16.msra.mxu2 %v625_v10 }
  0x1f   : > { %293 = vmatpush.bf16.msra.mxu0 %v616_v11 }
  0x20   : > { %343 = vmatpush.bf16.msra.mxu1 %v620_v12 }
  0x21   : > { %405 = vmatpush.bf16.msra.mxu2 %v624_v15 }
  0x22   : > { %568 = vmatmul.msk.bf16.vlgmr.msra.gmra.mxu0 %vm282_vm0, %v615_v6 }
  0x23   : > { %585 = vmatmul.msk.bf16.vlgmr.msra.gmra.mxu1 %vm282_vm0, %v615_v6 }
  0x24   : > { %610 = vmatmul.msk.bf16.vlgmr.msra.gmra.mxu2 %vm282_vm0, %v370_v16 }
  0x9f   : > { %v295_v17 = vpop.f32.mrf.mxu0 }
  0xa0   : > { %300 = vst [vmem:[#allocation2] sm:$0xff] %v295_v17  ;;  %v345_v18 = vpop.f32.mrf.mxu1 }
  0xa7   : > { %v297_v19 = vpop.f32.mrf.mxu0  ;;  %v407_v25 = vpop.f32.mrf.mxu2 }
  0xa8   : > { %301 = vst [vmem:[#allocation2 + $0x8] sm:$0xff] %v297_v19  ;;  %v347_v22 = vpop.f32.mrf.mxu1 }
  0xaf   : > { %v302_v20 = vld [vmem:[#allocation2 + $0x1] sm:$0xff]  ;;  %v303_v21 = vld [vmem:[#allocation2 + $0x9] sm:$0x7f]  ;;  %v409_v29 = vpop.f32.mrf.mxu2 }
  0xb0   : > { %v350_v23 = vadd.f32 %v345_v18, %v302_v20  ;;  %v351_v24 = vadd.f32 %v347_v22, %v303_v21 }
  0xb2   : > { %352 = vst [vmem:[#allocation2 + $0x1] sm:$0xff] %v350_v23 }
  0xb3   : > { %353 = vst [vmem:[#allocation2 + $0x9] sm:$0x7f] %v351_v24 }
  0xb9   : > { %v354_v26 = vld [vmem:[#allocation2] sm:$0xff] }
  0xba   : > { %v412_v27 = vadd.f32 %v407_v25, %v354_v26  ;;  %v355_v28 = vld [vmem:[#allocation2 + $0x8] sm:$0x7f] }
  0xbb   : > { %v413_v30 = vadd.f32 %v409_v29, %v355_v28 }
  0xbc   : > { %414 = vst [vmem:[#allocation2] sm:$0xff] %v412_v27  ;;  %v422_v32 = vadd.f32 %v674_v31, %v412_v27 }
  0xbd   : > { %415 = vst [vmem:[#allocation2 + $0x8] sm:$0x7f] %v413_v30 }
  0xbe   : > { %v424_v35 = vmax.f32 %v422_v32, 0.0 }
  0xc4   : > { %v417_v33 = vld [vmem:[#allocation2 + $0x8] sm:$0xff] }
  0xc5   : > { %v423_v34 = vadd.f32 %v674_v31, %v417_v33 }
  0xc7   : > { %v425_v36 = vmax.f32 %v423_v34, 0.0 }
  0xc9   : > { %v631_v37 = vpack.c.bf16 %v425_v36, %v424_v35 }
  0xcb   : > { %632 = vst [vmem:[%s238_s7] sm:$0xff] %v631_v37  }
  0xcc PF: > { %s13_s16 = sadd.s32 1, %s713_s16   ;;  %s807_s12 = smov %s705_s14 }
  0xcd   : > { %p10_p7 = scmp.ge.s32.totalorder %s13_s16, 6   ;;  %s808_s13 = smov %s709_s15 }
  0xce   : > { %s809_s14 = smov %s812_s17  ;;  %s810_s15 = smov %s816_s18 }
  0xcf   :  { %12 = sbr.rel (!%p10_p7) target bundleno = 3 (0x3), region = 70 }

// kernel: vgg_forward.21
= control target key start
LH: loop header
LB: loop body
LE: loop exit
PB: predicated region body
PF: predicated region fallthrough
CT: control target
= control target key end

     0   :  { %s899_s12 = smov 0   ;;  %s901_s13 = smov 0   ;;  %s993_s0 = inlined_call_operand.vmem [shape: bf16[4,16,128], index: 0, kind: input, shape index: {}]   ;;  %s994_s1 = inlined_call_operand.vmem [shape: bf16[2,3,128,128], index: 1, kind: input, shape index: {}]   ;;  %s995_s2 = inlined_call_operand.vmem [shape: f32[2,1,128], index: 2, kind: input, shape index: {}]   ;;  %s996_s3 = inlined_call_operand.vmem [shape: bf16[4,16,128], index: 3, kind: output, shape index: {}]  }
   0x1   :  { %s903_s14 = smov 0   ;;  %s905_s15 = smov 0  }
   0x2   :  { %s907_s16 = smov 0  }
   0x3 LB: > { %s22_s17 = sadd.s32 1, %s869_s14  ;;  %s25_s18 = sadd.s32 1, %s873_s15  ;;  %s877_s16 = sphi %s907_s16, %s13_s16   ;;  %s873_s15 = sphi %s905_s15, %s1000_s15   ;;  %s869_s14 = sphi %s903_s14, %s999_s14   ;;  %s865_s13 = sphi %s901_s13, %s998_s13   ;;  %s861_s12 = sphi %s899_s12, %s997_s12  }
   0x4   : > { %p23_p0 = scmp.ge.s32.totalorder %s22_s17, 2  ;;  %p623_p1 = scmp.ge.s32.totalorder %s877_s16, 1 }
   0x5   : > { %p179_p2 = scmp.lt.s32.totalorder %s877_s16, 5 }
   0x6   : > { %s1002_s17 = smov (%p23_p0, %s22_s17), 0  ;;  %s1004_s18 = smov (!%p23_p0, %s25_s18), %s873_s15 }
   0x7   : > { %p180_p3 = pnand %p623_p1, %p179_p2  ;;  %p27_p4 = scmp.ge.s32.totalorder %s1004_s18, 2 }
   0x8   : > { %p224_p5 = scmp.lt.s32.totalorder (!%p180_p3), %s865_s13, 1  ;;  %s624_s21 = sshll.u32 (!%p180_p3), %s865_s13, 1 }
   0x9   : > { %s1006_s18 = smov (%p27_p4, %s1004_s18), 0  ;;  %183 = sbr.rel (%p180_p3) target bundleno = 221 (0xdd), region = 32 }
   0xa   : > { %s216_s25 = sadd.s32 (!%p180_p3), %s861_s12, %s624_s21 }
   0xb   : > { %p217_p6 = scmp.lt.s32.totalorder (!%p180_p3), %s216_s25, 3 }
   0xe   : > { %s929_s19 = scalar_select %p224_p5, %s865_s13, 1 }
   0xf   : > { %s1008_s25 = smov (!%p217_p6, %s216_s25), 3 }
  0x10   : > { %s797_s20 = smul.u32 192, %s929_s19  ;;  %s765_s26 = sshll.u32 %s1008_s25, 3 }
  0x11   : > { %s221_s29 = scalar_lea.vmem %s993_s0, %s765_s26  ;;  %s231_s5 = scalar_lea.vmem %s995_s2, %s929_s19 }
  0x12   : > { %s935_s24 = scalar_lea.vmem %s994_s1, %s797_s20  ;;  %v767_v17 = vld [vmem:[%s221_s29] sm:$0xff]  ;;  %s238_s8 = scalar_lea.vmem %s996_s3, %s765_s26 }
  0x13   : > { %v775_v0 = vld [vmem:[%s935_s24 + $0x78] sm:$0xff]  ;;  %v774_v3 = vld [vmem:[%s935_s24 + $0x70] sm:$0xff]  ;;  %v773_v6 = vld [vmem:[%s935_s24 + $0x68] sm:$0xff]  ;;  %v436_v21 = vshll.u32 %v767_v17, 16  ;;  %v434_v25 = vshrl.u32 %v767_v17, 16 }
  0x14   : > { %v783_v1 = vld [vmem:[%s935_s24 + $0x38] sm:$0xff]  ;;  %314 = vmatpush.bf16.msra.mxu0 %v775_v0  ;;  %v782_v4 = vld [vmem:[%s935_s24 + $0x30] sm:$0xff]  ;;  %v781_v7 = vld [vmem:[%s935_s24 + $0x28] sm:$0xff] }
  0x15   : > { %v791_v2 = vld [vmem:[%s935_s24 + $0xb8] sm:$0xff]  ;;  %396 = vmatpush.bf16.msra.mxu1 %v783_v1  ;;  %v790_v5 = vld [vmem:[%s935_s24 + $0xb0] sm:$0xff]  ;;  %v789_v8 = vld [vmem:[%s935_s24 + $0xa8] sm:$0xff]  ;;  %v438_v26 = vrot.slane %v436_v21, 1 }
  0x16   : > { %489 = vmatpush.bf16.msra.mxu2 %v791_v2  ;;  %v772_v9 = vld [vmem:[%s935_s24 + $0x60] sm:$0xff]  ;;  %v771_v12 = vld [vmem:[%s935_s24 + $0x58] sm:$0xff]  ;;  %v770_v15 = vld [vmem:[%s935_s24 + $0x50] sm:$0xff] }
  0x17   : > { %v780_v10 = vld [vmem:[%s935_s24 + $0x20] sm:$0xff]  ;;  %v779_v13 = vld [vmem:[%s935_s24 + $0x18] sm:$0xff]  ;;  %v778_v16 = vld [vmem:[%s935_s24 + $0x10] sm:$0xff]  ;;  %v439_v28 = vor.u32 %v438_v26, %v434_v25 }
  0x18   : > { %315 = vmatpush.bf16.msra.mxu0 %v774_v3  ;;  %v788_v11 = vld [vmem:[%s935_s24 + $0xa0] sm:$0xff]  ;;  %v787_v14 = vld [vmem:[%s935_s24 + $0x98] sm:$0xff]  ;;  %v786_v18 = vld [vmem:[%s935_s24 + $0x90] sm:$0xff] }
  0x19   : > { %397 = vmatpush.bf16.msra.mxu1 %v782_v4  ;;  %v769_v19 = vld [vmem:[%s935_s24 + $0x48] sm:$0xff]  ;;  %v768_v23 = vld [vmem:[%s935_s24 + $0x40] sm:$0xff] }
  0x1a   : > { %490 = vmatpush.bf16.msra.mxu2 %v790_v5  ;;  %v777_v20 = vld [vmem:[%s935_s24 + $0x8] sm:$0xff]  ;;  %v776_v24 = vld [vmem:[%s935_s24] sm:$0xff] }
  0x1b   : > { %v785_v22 = vld [vmem:[%s935_s24 + $0x88] sm:$0xff]  ;;  %v784_v27 = vld [vmem:[%s935_s24 + $0x80] sm:$0xff] }
  0x1c   : > { %316 = vmatpush.bf16.msra.mxu0 %v773_v6  ;;  %v838_v43 = vld [vmem:[%s231_s5] ss:$0 sm:$0xff] }
  0x1d   : > { %398 = vmatpush.bf16.msra.mxu1 %v781_v7 }
  0x1e   : > { %491 = vmatpush.bf16.msra.mxu2 %v789_v8 }
  0x20   : > { %317 = vmatpush.bf16.msra.mxu0 %v772_v9 }
  0x21   : > { %399 = vmatpush.bf16.msra.mxu1 %v780_v10 }
  0x22   : > { %492 = vmatpush.bf16.msra.mxu2 %v788_v11 }
  0x24   : > { %318 = vmatpush.bf16.msra.mxu0 %v771_v12 }
  0x25   : > { %400 = vmatpush.bf16.msra.mxu1 %v779_v13 }
  0x26   : > { %493 = vmatpush.bf16.msra.mxu2 %v787_v14 }
  0x28   : > { %319 = vmatpush.bf16.msra.mxu0 %v770_v15 }
  0x29   : > { %401 = vmatpush.bf16.msra.mxu1 %v778_v16 }
  0x2a   : > { %494 = vmatpush.bf16.msra.mxu2 %v786_v18 }
  0x2c   : > { %320 = vmatpush.bf16.msra.mxu0 %v769_v19 }
  0x2d   : > { %402 = vmatpush.bf16.msra.mxu1 %v777_v20 }
  0x2e   : > { %495 = vmatpush.bf16.msra.mxu2 %v785_v22 }
  0x30   : > { %321 = vmatpush.bf16.msra.mxu0 %v768_v23 }
  0x31   : > { %403 = vmatpush.bf16.msra.mxu1 %v776_v24 }
  0x32   : > { %496 = vmatpush.bf16.msra.mxu2 %v784_v27 }
  0x33   : > { %322 = vmatmul.bf16.vlgmr.msra.gmra.mxu0 %v767_v17 }
  0x34   : > { %404 = vmatmul.bf16.vlgmr.msra.gmra.mxu1 %v767_v17 }
  0x35   : > { %497 = vmatmul.bf16.vlgmr.msra.gmra.mxu2 %v439_v28 }
  0xb0   : > { %v323_v29 = vpop.f32.mrf.mxu0 }
  0xb1   : > { %328 = vst [vmem:[#allocation2] sm:$0xff] %v323_v29  ;;  %v405_v30 = vpop.f32.mrf.mxu1 }
  0xb8   : > { %v325_v31 = vpop.f32.mrf.mxu0  ;;  %v498_v37 = vpop.f32.mrf.mxu2 }
  0xb9   : > { %329 = vst [vmem:[#allocation2 + $0x8] sm:$0xff] %v325_v31  ;;  %v407_v34 = vpop.f32.mrf.mxu1 }
  0xc0   : > { %v330_v32 = vld [vmem:[#allocation2 + $0x1] sm:$0xff]  ;;  %v331_v33 = vld [vmem:[#allocation2 + $0x9] sm:$0x7f]  ;;  %v500_v41 = vpop.f32.mrf.mxu2 }
  0xc1   : > { %v410_v35 = vadd.f32 %v405_v30, %v330_v32  ;;  %v411_v36 = vadd.f32 %v407_v34, %v331_v33 }
  0xc3   : > { %412 = vst [vmem:[#allocation2 + $0x1] sm:$0xff] %v410_v35 }
  0xc4   : > { %413 = vst [vmem:[#allocation2 + $0x9] sm:$0x7f] %v411_v36 }
  0xca   : > { %v414_v38 = vld [vmem:[#allocation2] sm:$0xff] }
  0xcb   : > { %v503_v39 = vadd.f32 %v498_v37, %v414_v38  ;;  %v415_v40 = vld [vmem:[#allocation2 + $0x8] sm:$0x7f] }
  0xcc   : > { %v504_v42 = vadd.f32 %v500_v41, %v415_v40 }
  0xcd   : > { %505 = vst [vmem:[#allocation2] sm:$0xff] %v503_v39  ;;  %v513_v44 = vadd.f32 %v838_v43, %v503_v39 }
  0xce   : > { %506 = vst [vmem:[#allocation2 + $0x8] sm:$0x7f] %v504_v42 }
  0xcf   : > { %v515_v47 = vmax.f32 %v513_v44, 0.0 }
  0xd5   : > { %v508_v45 = vld [vmem:[#allocation2 + $0x8] sm:$0xff] }
  0xd6   : > { %v514_v46 = vadd.f32 %v838_v43, %v508_v45 }
  0xd8   : > { %v516_v48 = vmax.f32 %v514_v46, 0.0 }
  0xda   : > { %v795_v49 = vpack.c.bf16 %v516_v48, %v515_v47 }
  0xdc   : > { %796 = vst [vmem:[%s238_s8] sm:$0xff] %v795_v49  }
  0xdd PF: > { %s13_s16 = sadd.s32 1, %s877_s16   ;;  %s997_s12 = smov %s869_s14 }
  0xde   : > { %p10_p7 = scmp.ge.s32.totalorder %s13_s16, 6   ;;  %s998_s13 = smov %s873_s15 }
  0xdf   : > { %s999_s14 = smov %s1002_s17  ;;  %s1000_s15 = smov %s1006_s18 }
  0xe0   :  { %12 = sbr.rel (!%p10_p7) target bundleno = 3 (0x3), region = 70 }

// kernel: vgg_forward.22
= control target key start
LH: loop header
LB: loop body
LE: loop exit
PB: predicated region body
PF: predicated region fallthrough
CT: control target
= control target key end

     0   :  { %s429_s6 = smov 0   ;;  %s458_s0 = inlined_call_operand.vmem [shape: bf16[4,16,8,16], index: 0, kind: input, shape index: {}]   ;;  %s459_s1 = inlined_call_operand.vmem [shape: bf16[4,8,8,8], index: 1, kind: output, shape index: {}]  }
   0x1 LB: > { %s307_s7 = sadd.s32 4294967295, %s416_s6   ;;  %p311_p0 = scmp.ge.s32.totalorder %s416_s6, 1  ;;  %s416_s6 = sphi %s429_s6, %s11_s6  }
   0x2   : > { %p87_p1 = scmp.lt.s32.totalorder %s416_s6, 5 }
   0x4   : > { %p88_p2 = pnand %p311_p0, %p87_p1 }
   0x5   : > { %p107_p3 = scmp.lt.s32.totalorder (!%p88_p2), %s307_s7, 3  ;;  %s418_s12 = smov (!%p88_p2), 120  }
   0x6   : > { %91 = sbr.rel (%p88_p2) target bundleno = 155 (0x9b), region = 24 }
   0xb   : > { %s461_s7 = smov (!%p107_p3, %s307_s7), 3  ;;  %vm131_vm0 = vcmask 60416  }
   0xc   : > { %s340_s8 = sshll.u32 %s461_s7, 6  ;;  %s341_s13 = sshll.u32 %s461_s7, 5 }
   0xd   : > { %s111_s11 = scalar_lea.vmem %s458_s0, %s340_s8  ;;  %s116_s16 = scalar_lea.vmem %s459_s1, %s341_s13 }
   0xe   : > { %v377_v0 = vld [vmem:[%s111_s11 + $0x20] sm:$0xff]   ;;  %v378_v1 = vld [vmem:[%s111_s11 + $0x28] sm:$0xff]   ;;  %v379_v8 = vld [vmem:[%s111_s11 + $0x30] sm:$0xff]  }
   0xf   : > { %v343_v2 = vld [vmem:[%s111_s11] sm:$0xff]   ;;  %v360_v3 = vunpack.c.l.bf16 %v377_v0  ;;  %v361_v4 = vunpack.c.h.bf16 %v377_v0  ;;  %v364_v5 = vunpack.c.l.bf16 %v378_v1  ;;  %v365_v6 = vunpack.c.h.bf16 %v378_v1  ;;  %v374_v7 = vld [vmem:[%s111_s11 + $0x8] sm:$0xff]   ;;  %v380_v9 = vld [vmem:[%s111_s11 + $0x38] sm:$0xff]  }
  0x10   : > { %v344_v10 = vunpack.c.l.bf16 %v343_v2  ;;  %v345_v11 = vunpack.c.h.bf16 %v343_v2  ;;  %v348_v12 = vunpack.c.l.bf16 %v374_v7  ;;  %v349_v13 = vunpack.c.h.bf16 %v374_v7  ;;  %v375_v14 = vld [vmem:[%s111_s11 + $0x10] sm:$0xff]   ;;  %v376_v23 = vld [vmem:[%s111_s11 + $0x18] sm:$0xff]  }
  0x11   : > { %v190_v15 = vmax.f32 %v360_v3, %v361_v4  ;;  %v207_v16 = vmax.f32 %v364_v5, %v365_v6  ;;  %v368_v17 = vunpack.c.l.bf16 %v379_v8  ;;  %v369_v18 = vunpack.c.h.bf16 %v379_v8 }
  0x12   : > { %v122_v19 = vmax.f32 %v344_v10, %v345_v11  ;;  %v139_v20 = vmax.f32 %v348_v12, %v349_v13  ;;  %v372_v21 = vunpack.c.l.bf16 %v380_v9  ;;  %v373_v22 = vunpack.c.h.bf16 %v380_v9 }
  0x13   : > { %v224_v24 = vmax.f32 %v368_v17, %v369_v18  ;;  %v352_v25 = vunpack.c.l.bf16 %v375_v14  ;;  %v353_v27 = vunpack.c.h.bf16 %v375_v14  ;;  %v356_v28 = vunpack.c.l.bf16 %v376_v23 }
  0x14   : > { %v241_v26 = vmax.f32 %v372_v21, %v373_v22  ;;  %v400_v30 = vpack.i.bf16 %v207_v16, %v190_v15  ;;  %v357_v31 = vunpack.c.h.bf16 %v376_v23  ;;  %v390_v32 = vpack.i.bf16 %v139_v20, %v122_v19 }
  0x15   : > { %v156_v29 = vmax.f32 %v352_v25, %v353_v27 }
  0x16   : > { %401 = vrot.lane.b32.xlu1 %v400_v30, %s418_s12  ;;  %v173_v33 = vmax.f32 %v356_v28, %v357_v31  ;;  %391 = vrot.lane.b32.xlu0 %v390_v32, %s418_s12  ;;  %v405_v34 = vpack.i.bf16 %v241_v26, %v224_v24 }
  0x18   : > { %v395_v35 = vpack.i.bf16 %v173_v33, %v156_v29 }
  0x1e   : > { %406 = vrot.lane.b32.xlu1 %v405_v34, %s418_s12  ;;  %396 = vrot.lane.b32.xlu0 %v395_v35, %s418_s12 }
  0x88   : > { %v402_v36 = vpop.permute.xlu1 %401  ;;  %v392_v39 = vpop.permute.xlu0 %391 }
  0x89   : > { %v404_v37 = vunpack.i.h.bf16 %v402_v36  ;;  %v403_v38 = vunpack.i.l.bf16 %v402_v36  ;;  %v394_v40 = vunpack.i.h.bf16 %v392_v39  ;;  %v393_v41 = vunpack.i.l.bf16 %v392_v39 }
  0x8b   : > { %v214_v42 = vmax.f32 %v207_v16, %v404_v37  ;;  %v197_v43 = vmax.f32 %v190_v15, %v403_v38  ;;  %v146_v44 = vmax.f32 %v139_v20, %v394_v40  ;;  %v129_v45 = vmax.f32 %v122_v19, %v393_v41 }
  0x8d   : > { %v215_v46 = vpack.c.bf16 %v214_v42, %v214_v42  ;;  %v198_v47 = vpack.c.bf16 %v197_v43, %v197_v43  ;;  %v147_v48 = vpack.c.bf16 %v146_v44, %v146_v44  ;;  %v130_v49 = vpack.c.bf16 %v129_v45, %v129_v45 }
  0x8f   : > { %331 = vst.msk [vmem:[%s116_s16 + $0x14] sm:$0xf] %vm131_vm0, %v215_v46 }
  0x90   : > { %328 = vst.msk [vmem:[%s116_s16 + $0x10] sm:$0xf] %vm131_vm0, %v198_v47  ;;  %v407_v50 = vpop.permute.xlu1 %406  ;;  %v397_v53 = vpop.permute.xlu0 %396 }
  0x91   : > { %319 = vst.msk [vmem:[%s116_s16 + $0x4] sm:$0xf] %vm131_vm0, %v147_v48  ;;  %v409_v51 = vunpack.i.h.bf16 %v407_v50  ;;  %v408_v52 = vunpack.i.l.bf16 %v407_v50  ;;  %v399_v54 = vunpack.i.h.bf16 %v397_v53  ;;  %v398_v55 = vunpack.i.l.bf16 %v397_v53 }
  0x92   : > { %132 = vst.msk [vmem:[%s116_s16] sm:$0xf] %vm131_vm0, %v130_v49 }
  0x93   : > { %v248_v56 = vmax.f32 %v241_v26, %v409_v51  ;;  %v231_v57 = vmax.f32 %v224_v24, %v408_v52  ;;  %v180_v58 = vmax.f32 %v173_v33, %v399_v54  ;;  %v163_v59 = vmax.f32 %v156_v29, %v398_v55 }
  0x95   : > { %v249_v60 = vpack.c.bf16 %v248_v56, %v248_v56  ;;  %v232_v61 = vpack.c.bf16 %v231_v57, %v231_v57  ;;  %v181_v62 = vpack.c.bf16 %v180_v58, %v180_v58  ;;  %v164_v63 = vpack.c.bf16 %v163_v59, %v163_v59 }
  0x97   : > { %337 = vst.msk [vmem:[%s116_s16 + $0x1c] sm:$0xf] %vm131_vm0, %v249_v60 }
  0x98   : > { %334 = vst.msk [vmem:[%s116_s16 + $0x18] sm:$0xf] %vm131_vm0, %v232_v61 }
  0x99   : > { %325 = vst.msk [vmem:[%s116_s16 + $0xc] sm:$0xf] %vm131_vm0, %v181_v62 }
  0x9a   : > { %322 = vst.msk [vmem:[%s116_s16 + $0x8] sm:$0xf] %vm131_vm0, %v164_v63 }
  0x9b PF: > { %s11_s6 = sadd.s32 1, %s416_s6  }
  0x9c   : > { %p8_p4 = scmp.ge.s32.totalorder %s11_s6, 6  }
  0x9e   :  { %10 = sbr.rel (!%p8_p4) target bundleno = 1 (0x1), region = 76 }

// kernel: vgg_forward.23
= control target key start
LH: loop header
LB: loop body
LE: loop exit
PB: predicated region body
PF: predicated region fallthrough
CT: control target
= control target key end

     0   :  { %s697_s12 = smov 0   ;;  %s699_s13 = smov 0   ;;  %s765_s0 = inlined_call_operand.vmem [shape: bf16[4,8,64], index: 0, kind: input, shape index: {}]   ;;  %s766_s1 = inlined_call_operand.vmem [shape: bf16[2,3,64,128], index: 1, kind: input, shape index: {}]   ;;  %s767_s2 = inlined_call_operand.vmem [shape: f32[2,1,128], index: 2, kind: input, shape index: {}]   ;;  %s768_s3 = inlined_call_operand.vmem [shape: bf16[4,8,128], index: 3, kind: output, shape index: {}]  }
   0x1   :  { %s701_s14 = smov 0   ;;  %s703_s15 = smov 0  }
   0x2   :  { %s705_s16 = smov 0  }
   0x3 LB: > { %s22_s17 = sadd.s32 1, %s667_s14  ;;  %s25_s18 = sadd.s32 1, %s671_s15  ;;  %s675_s16 = sphi %s705_s16, %s13_s16   ;;  %s671_s15 = sphi %s703_s15, %s772_s15   ;;  %s667_s14 = sphi %s701_s14, %s771_s14   ;;  %s663_s13 = sphi %s699_s13, %s770_s13   ;;  %s659_s12 = sphi %s697_s12, %s769_s12  }
   0x4   : > { %p23_p0 = scmp.ge.s32.totalorder %s22_s17, 2  ;;  %p508_p1 = scmp.ge.s32.totalorder %s675_s16, 1 }
   0x5   : > { %p178_p2 = scmp.lt.s32.totalorder %s675_s16, 5 }
   0x6   : > { %s774_s17 = smov (%p23_p0, %s22_s17), 0  ;;  %s776_s18 = smov (!%p23_p0, %s25_s18), %s671_s15 }
   0x7   : > { %p179_p3 = pnand %p508_p1, %p178_p2  ;;  %p27_p4 = scmp.ge.s32.totalorder %s776_s18, 2 }
   0x8   : > { %p220_p5 = scmp.lt.s32.totalorder (!%p179_p3), %s663_s13, 1  ;;  %s509_s19 = sshll.u32 (!%p179_p3), %s663_s13, 1 }
   0x9   : > { %s778_s18 = smov (%p27_p4, %s776_s18), 0  ;;  %182 = sbr.rel (%p179_p3) target bundleno = 195 (0xc3), region = 32 }
   0xa   : > { %s213_s20 = sadd.s32 (!%p179_p3), %s659_s12, %s509_s19 }
   0xb   : > { %p214_p6 = scmp.lt.s32.totalorder (!%p179_p3), %s213_s20, 3 }
   0xe   : > { %s780_s13 = smov (!%p220_p5, %s663_s13), 1  ;;  %s782_s20 = smov (!%p214_p6, %s213_s20), 3  ;;  %vm271_vm0 = vcmask 523264  }
   0xf   : > { %s595_s21 = smul.u32 96, %s780_s13  ;;  %s510_s25 = sshll.u32 %s782_s20, 2 }
  0x10   : > { %s217_s28 = scalar_lea.vmem %s765_s0, %s510_s25  ;;  %s227_s4 = scalar_lea.vmem %s767_s2, %s780_s13 }
  0x11   : > { %s224_s24 = scalar_lea.vmem %s766_s1, %s595_s21  ;;  %v237_v6 = vld [vmem:[%s217_s28] sm:$0xf]  ;;  %s233_s7 = scalar_lea.vmem %s768_s3, %s510_s25 }
  0x12   : > { %v586_v0 = vld [vmem:[%s224_s24 + $0x38] sm:$0xff]  ;;  %v585_v3 = vld [vmem:[%s224_s24 + $0x30] sm:$0xff]  ;;  %v348_v7 = vunpack.c.l.b16 %v237_v6  ;;  %v584_v8 = vld [vmem:[%s224_s24 + $0x28] sm:$0xff] }
  0x13   : > { %v590_v1 = vld [vmem:[%s224_s24 + $0x18] sm:$0xff]  ;;  %279 = vmatpush.bf16.msra.mxu0 %v586_v0  ;;  %v589_v4 = vld [vmem:[%s224_s24 + $0x10] sm:$0xff]  ;;  %v588_v9 = vld [vmem:[%s224_s24 + $0x8] sm:$0xff] }
  0x14   : > { %v594_v2 = vld [vmem:[%s224_s24 + $0x58] sm:$0xff]  ;;  %326 = vmatpush.bf16.msra.mxu1 %v590_v1  ;;  %v593_v5 = vld [vmem:[%s224_s24 + $0x50] sm:$0xff]  ;;  %v349_v10 = vpack.c.b16 %v348_v7, %v348_v7  ;;  %v592_v11 = vld [vmem:[%s224_s24 + $0x48] sm:$0xff] }
  0x15   : > { %388 = vmatpush.bf16.msra.mxu2 %v594_v2  ;;  %v583_v13 = vld [vmem:[%s224_s24 + $0x20] sm:$0xff] }
  0x16   : > { %v353_v12 = vshll.u32 %v349_v10, 16  ;;  %v587_v14 = vld [vmem:[%s224_s24] sm:$0xff]  ;;  %v351_v15 = vshrl.u32 %v349_v10, 16 }
  0x17   : > { %280 = vmatpush.bf16.msra.mxu0 %v585_v3  ;;  %v591_v17 = vld [vmem:[%s224_s24 + $0x40] sm:$0xff] }
  0x18   : > { %327 = vmatpush.bf16.msra.mxu1 %v589_v4  ;;  %v355_v16 = vrot.slane %v353_v12, 1  ;;  %v636_v29 = vld [vmem:[%s227_s4] ss:$0 sm:$0xff] }
  0x19   : > { %389 = vmatpush.bf16.msra.mxu2 %v593_v5 }
  0x1a   : > { %v356_v18 = vor.u32 %v355_v16, %v351_v15 }
  0x1b   : > { %281 = vmatpush.bf16.msra.mxu0 %v584_v8 }
  0x1c   : > { %328 = vmatpush.bf16.msra.mxu1 %v588_v9 }
  0x1d   : > { %390 = vmatpush.bf16.msra.mxu2 %v592_v11 }
  0x1f   : > { %282 = vmatpush.bf16.msra.mxu0 %v583_v13 }
  0x20   : > { %329 = vmatpush.bf16.msra.mxu1 %v587_v14 }
  0x21   : > { %391 = vmatpush.bf16.msra.mxu2 %v591_v17 }
  0x22   : > { %538 = vmatmul.msk.bf16.vlgmr.msra.gmra.mxu0 %vm271_vm0, %v237_v6 }
  0x23   : > { %555 = vmatmul.msk.bf16.vlgmr.msra.gmra.mxu1 %vm271_vm0, %v237_v6 }
  0x24   : > { %580 = vmatmul.msk.bf16.vlgmr.msra.gmra.mxu2 %vm271_vm0, %v356_v18 }
  0x9f   : > { %v284_v19 = vpop.f32.mrf.mxu0 }
  0xa0   : > { %v331_v20 = vpop.f32.mrf.mxu1  ;;  %288 = vst [vmem:[#allocation2] sm:$0xff] %v284_v19 }
  0xa7   : > { %v393_v21 = vpop.f32.mrf.mxu2  ;;  %v289_v22 = vld [vmem:[#allocation2 + $0x1] sm:$0x7f]  ;;  %v286_v23 = vpop.f32.mrf.mxu0 }
  0xa8   : > { %v333_v24 = vpop.f32.mrf.mxu1  ;;  %v335_v25 = vadd.f32 %v331_v20, %v289_v22 }
  0xaa   : > { %336 = vst [vmem:[#allocation2 + $0x1] sm:$0x7f] %v335_v25 }
  0xaf   : > { %v395_v26 = vpop.f32.mrf.mxu2 }
  0xb1   : > { %v337_v27 = vld [vmem:[#allocation2] sm:$0x7f] }
  0xb2   : > { %v397_v28 = vadd.f32 %v393_v21, %v337_v27 }
  0xb4   : > { %398 = vst [vmem:[#allocation2] sm:$0x7f] %v397_v28 }
  0xbb   : > { %v399_v30 = vld [vmem:[#allocation2] sm:$0xff] }
  0xbc   : > { %v404_v31 = vadd.f32 %v636_v29, %v399_v30 }
  0xbe   : > { %v405_v32 = vmax.f32 %v404_v31, 0.0 }
  0xc0   : > { %v406_v33 = vpack.c.bf16 %v405_v32, %v405_v32 }
  0xc2   : > { %407 = vst [vmem:[%s233_s7] sm:$0xf] %v406_v33 }
  0xc3 PF: > { %s13_s16 = sadd.s32 1, %s675_s16   ;;  %s769_s12 = smov %s667_s14 }
  0xc4   : > { %p10_p7 = scmp.ge.s32.totalorder %s13_s16, 6   ;;  %s770_s13 = smov %s671_s15 }
  0xc5   : > { %s771_s14 = smov %s774_s17  ;;  %s772_s15 = smov %s778_s18 }
  0xc6   :  { %12 = sbr.rel (!%p10_p7) target bundleno = 3 (0x3), region = 70 }

// kernel: vgg_forward.24
= control target key start
LH: loop header
LB: loop body
LE: loop exit
PB: predicated region body
PF: predicated region fallthrough
CT: control target
= control target key end

     0   :  { %s859_s12 = smov 0   ;;  %s861_s13 = smov 0   ;;  %s953_s0 = inlined_call_operand.vmem [shape: bf16[4,8,128], index: 0, kind: input, shape index: {}]   ;;  %s954_s1 = inlined_call_operand.vmem [shape: bf16[2,3,128,128], index: 1, kind: input, shape index: {}]   ;;  %s955_s2 = inlined_call_operand.vmem [shape: f32[2,1,128], index: 2, kind: input, shape index: {}]   ;;  %s956_s3 = inlined_call_operand.vmem [shape: bf16[4,8,128], index: 3, kind: output, shape index: {}]  }
   0x1   :  { %s863_s14 = smov 0   ;;  %s865_s15 = smov 0  }
   0x2   :  { %s867_s16 = smov 0  }
   0x3 LB: > { %s22_s17 = sadd.s32 1, %s829_s14  ;;  %s25_s18 = sadd.s32 1, %s833_s15  ;;  %s837_s16 = sphi %s867_s16, %s13_s16   ;;  %s833_s15 = sphi %s865_s15, %s960_s15   ;;  %s829_s14 = sphi %s863_s14, %s959_s14   ;;  %s825_s13 = sphi %s861_s13, %s958_s13   ;;  %s821_s12 = sphi %s859_s12, %s957_s12  }
   0x4   : > { %p23_p0 = scmp.ge.s32.totalorder %s22_s17, 2  ;;  %p597_p1 = scmp.ge.s32.totalorder %s837_s16, 1 }
   0x5   : > { %p178_p2 = scmp.lt.s32.totalorder %s837_s16, 5 }
   0x6   : > { %s962_s17 = smov (%p23_p0, %s22_s17), 0  ;;  %s964_s18 = smov (!%p23_p0, %s25_s18), %s833_s15 }
   0x7   : > { %p179_p3 = pnand %p597_p1, %p178_p2  ;;  %p27_p4 = scmp.ge.s32.totalorder %s964_s18, 2 }
   0x8   : > { %p220_p5 = scmp.lt.s32.totalorder (!%p179_p3), %s825_s13, 1  ;;  %s598_s19 = sshll.u32 (!%p179_p3), %s825_s13, 1 }
   0x9   : > { %s966_s18 = smov (%p27_p4, %s964_s18), 0  ;;  %182 = sbr.rel (%p179_p3) target bundleno = 211 (0xd3), region = 32 }
   0xa   : > { %s213_s20 = sadd.s32 (!%p179_p3), %s821_s12, %s598_s19 }
   0xb   : > { %p214_p6 = scmp.lt.s32.totalorder (!%p179_p3), %s213_s20, 3 }
   0xe   : > { %s968_s13 = smov (!%p220_p5, %s825_s13), 1  ;;  %s970_s20 = smov (!%p214_p6, %s213_s20), 3 }
   0xf   : > { %s757_s21 = smul.u32 192, %s968_s13  ;;  %s599_s25 = sshll.u32 %s970_s20, 2 }
  0x10   : > { %s217_s28 = scalar_lea.vmem %s953_s0, %s599_s25  ;;  %s227_s4 = scalar_lea.vmem %s955_s2, %s968_s13 }
  0x11   : > { %s895_s24 = scalar_lea.vmem %s954_s1, %s757_s21  ;;  %v236_v12 = vld [vmem:[%s217_s28] sm:$0xf]  ;;  %s233_s7 = scalar_lea.vmem %s956_s3, %s599_s25 }
  0x12   : > { %v740_v0 = vld [vmem:[%s895_s24 + $0x78] sm:$0xff]  ;;  %v739_v3 = vld [vmem:[%s895_s24 + $0x70] sm:$0xff]  ;;  %v738_v6 = vld [vmem:[%s895_s24 + $0x68] sm:$0xff]  ;;  %v415_v15 = vunpack.c.l.b16 %v236_v12 }
  0x13   : > { %v748_v1 = vld [vmem:[%s895_s24 + $0x38] sm:$0xff]  ;;  %302 = vmatpush.bf16.msra.mxu0 %v740_v0  ;;  %v747_v4 = vld [vmem:[%s895_s24 + $0x30] sm:$0xff]  ;;  %v746_v7 = vld [vmem:[%s895_s24 + $0x28] sm:$0xff] }
  0x14   : > { %v756_v2 = vld [vmem:[%s895_s24 + $0xb8] sm:$0xff]  ;;  %381 = vmatpush.bf16.msra.mxu1 %v748_v1  ;;  %v755_v5 = vld [vmem:[%s895_s24 + $0xb0] sm:$0xff]  ;;  %v754_v8 = vld [vmem:[%s895_s24 + $0xa8] sm:$0xff]  ;;  %v416_v19 = vpack.c.b16 %v415_v15, %v415_v15 }
  0x15   : > { %473 = vmatpush.bf16.msra.mxu2 %v756_v2  ;;  %v737_v9 = vld [vmem:[%s895_s24 + $0x60] sm:$0xff]  ;;  %v736_v13 = vld [vmem:[%s895_s24 + $0x58] sm:$0xff]  ;;  %v735_v17 = vld [vmem:[%s895_s24 + $0x50] sm:$0xff] }
  0x16   : > { %v745_v10 = vld [vmem:[%s895_s24 + $0x20] sm:$0xff]  ;;  %v744_v14 = vld [vmem:[%s895_s24 + $0x18] sm:$0xff]  ;;  %v743_v18 = vld [vmem:[%s895_s24 + $0x10] sm:$0xff]  ;;  %v420_v23 = vshll.u32 %v416_v19, 16  ;;  %v418_v27 = vshrl.u32 %v416_v19, 16 }
  0x17   : > { %303 = vmatpush.bf16.msra.mxu0 %v739_v3  ;;  %v753_v11 = vld [vmem:[%s895_s24 + $0xa0] sm:$0xff]  ;;  %v752_v16 = vld [vmem:[%s895_s24 + $0x98] sm:$0xff]  ;;  %v751_v20 = vld [vmem:[%s895_s24 + $0x90] sm:$0xff] }
  0x18   : > { %382 = vmatpush.bf16.msra.mxu1 %v747_v4  ;;  %v734_v21 = vld [vmem:[%s895_s24 + $0x48] sm:$0xff]  ;;  %v733_v25 = vld [vmem:[%s895_s24 + $0x40] sm:$0xff]  ;;  %v422_v28 = vrot.slane %v420_v23, 1 }
  0x19   : > { %474 = vmatpush.bf16.msra.mxu2 %v755_v5  ;;  %v742_v22 = vld [vmem:[%s895_s24 + $0x8] sm:$0xff]  ;;  %v741_v26 = vld [vmem:[%s895_s24] sm:$0xff] }
  0x1a   : > { %v750_v24 = vld [vmem:[%s895_s24 + $0x88] sm:$0xff]  ;;  %v749_v29 = vld [vmem:[%s895_s24 + $0x80] sm:$0xff]  ;;  %v423_v30 = vor.u32 %v422_v28, %v418_v27 }
  0x1b   : > { %304 = vmatpush.bf16.msra.mxu0 %v738_v6  ;;  %v798_v41 = vld [vmem:[%s227_s4] ss:$0 sm:$0xff] }
  0x1c   : > { %383 = vmatpush.bf16.msra.mxu1 %v746_v7 }
  0x1d   : > { %475 = vmatpush.bf16.msra.mxu2 %v754_v8 }
  0x1f   : > { %305 = vmatpush.bf16.msra.mxu0 %v737_v9 }
  0x20   : > { %384 = vmatpush.bf16.msra.mxu1 %v745_v10 }
  0x21   : > { %476 = vmatpush.bf16.msra.mxu2 %v753_v11 }
  0x23   : > { %306 = vmatpush.bf16.msra.mxu0 %v736_v13 }
  0x24   : > { %385 = vmatpush.bf16.msra.mxu1 %v744_v14 }
  0x25   : > { %477 = vmatpush.bf16.msra.mxu2 %v752_v16 }
  0x27   : > { %307 = vmatpush.bf16.msra.mxu0 %v735_v17 }
  0x28   : > { %386 = vmatpush.bf16.msra.mxu1 %v743_v18 }
  0x29   : > { %478 = vmatpush.bf16.msra.mxu2 %v751_v20 }
  0x2b   : > { %308 = vmatpush.bf16.msra.mxu0 %v734_v21 }
  0x2c   : > { %387 = vmatpush.bf16.msra.mxu1 %v742_v22 }
  0x2d   : > { %479 = vmatpush.bf16.msra.mxu2 %v750_v24 }
  0x2f   : > { %309 = vmatpush.bf16.msra.mxu0 %v733_v25 }
  0x30   : > { %388 = vmatpush.bf16.msra.mxu1 %v741_v26 }
  0x31   : > { %480 = vmatpush.bf16.msra.mxu2 %v749_v29 }
  0x32   : > { %310 = vmatmul.bf16.vlgmr.msra.gmra.mxu0 %v236_v12 }
  0x33   : > { %389 = vmatmul.bf16.vlgmr.msra.gmra.mxu1 %v236_v12 }
  0x34   : > { %481 = vmatmul.bf16.vlgmr.msra.gmra.mxu2 %v423_v30 }
  0xaf   : > { %v311_v31 = vpop.f32.mrf.mxu0 }
  0xb0   : > { %v390_v32 = vpop.f32.mrf.mxu1  ;;  %315 = vst [vmem:[#allocation2] sm:$0xff] %v311_v31 }
  0xb7   : > { %v482_v33 = vpop.f32.mrf.mxu2  ;;  %v316_v34 = vld [vmem:[#allocation2 + $0x1] sm:$0x7f]  ;;  %v313_v35 = vpop.f32.mrf.mxu0 }
  0xb8   : > { %v392_v36 = vpop.f32.mrf.mxu1  ;;  %v394_v37 = vadd.f32 %v390_v32, %v316_v34 }
  0xba   : > { %395 = vst [vmem:[#allocation2 + $0x1] sm:$0x7f] %v394_v37 }
  0xbf   : > { %v484_v38 = vpop.f32.mrf.mxu2 }
  0xc1   : > { %v396_v39 = vld [vmem:[#allocation2] sm:$0x7f] }
  0xc2   : > { %v486_v40 = vadd.f32 %v482_v33, %v396_v39 }
  0xc4   : > { %487 = vst [vmem:[#allocation2] sm:$0x7f] %v486_v40 }
  0xcb   : > { %v488_v42 = vld [vmem:[#allocation2] sm:$0xff] }
  0xcc   : > { %v493_v43 = vadd.f32 %v798_v41, %v488_v42 }
  0xce   : > { %v494_v44 = vmax.f32 %v493_v43, 0.0 }
  0xd0   : > { %v495_v45 = vpack.c.bf16 %v494_v44, %v494_v44 }
  0xd2   : > { %496 = vst [vmem:[%s233_s7] sm:$0xf] %v495_v45 }
  0xd3 PF: > { %s13_s16 = sadd.s32 1, %s837_s16   ;;  %s957_s12 = smov %s829_s14 }
  0xd4   : > { %p10_p7 = scmp.ge.s32.totalorder %s13_s16, 6   ;;  %s958_s13 = smov %s833_s15 }
  0xd5   : > { %s959_s14 = smov %s962_s17  ;;  %s960_s15 = smov %s966_s18 }
  0xd6   :  { %12 = sbr.rel (!%p10_p7) target bundleno = 3 (0x3), region = 70 }

// kernel: vgg_forward.26
= control target key start
LH: loop header
LB: loop body
LE: loop exit
PB: predicated region body
PF: predicated region fallthrough
CT: control target
= control target key end

     0   :  { %s300_s6 = smov 0   ;;  %s321_s0 = inlined_call_operand.vmem [shape: bf16[4,8,4,32], index: 0, kind: input, shape index: {}]   ;;  %s322_s1 = inlined_call_operand.vmem [shape: bf16[4,4,4,16], index: 1, kind: output, shape index: {}]  }
   0x1 LB: > { %s239_s7 = sadd.s32 4294967295, %s287_s6   ;;  %p243_p0 = scmp.ge.s32.totalorder %s287_s6, 1  ;;  %s287_s6 = sphi %s300_s6, %s11_s6  }
   0x2   : > { %p87_p1 = scmp.lt.s32.totalorder %s287_s6, 5 }
   0x4   : > { %p88_p2 = pnand %p243_p0, %p87_p1 }
   0x5   : > { %p107_p3 = scmp.lt.s32.totalorder (!%p88_p2), %s239_s7, 3  ;;  %s289_s12 = smov (!%p88_p2), 112  }
   0x6   : > { %91 = sbr.rel (%p88_p2) target bundleno = 153 (0x99), region = 24 }
   0xb   : > { %s324_s7 = smov (!%p107_p3, %s239_s7), 3  ;;  %vm131_vm0 = vcmask 123904  }
   0xc   : > { %s260_s8 = sshll.u32 %s324_s7, 4  ;;  %s261_s13 = sshll.u32 %s324_s7, 3 }
   0xd   : > { %s111_s11 = scalar_lea.vmem %s321_s0, %s260_s8  ;;  %s116_s16 = scalar_lea.vmem %s322_s1, %s261_s13 }
   0xe   : > { %v117_v0 = vld [vmem:[%s111_s11] sm:$0x3]  ;;  %v248_v1 = vld [vmem:[%s111_s11 + $0x2] sm:$0x3]  ;;  %v249_v2 = vld [vmem:[%s111_s11 + $0x4] sm:$0x3] }
   0xf   : > { %v120_v3 = vunpack.c.l.bf16 %v117_v0  ;;  %v121_v4 = vunpack.c.l.bf16 %v248_v1  ;;  %v250_v5 = vld [vmem:[%s111_s11 + $0x6] sm:$0x3]  ;;  %v137_v6 = vunpack.c.l.bf16 %v249_v2  ;;  %v252_v7 = vld [vmem:[%s111_s11 + $0x8] sm:$0x3]  ;;  %v253_v8 = vld [vmem:[%s111_s11 + $0xa] sm:$0x3] }
  0x10   : > { %v138_v9 = vunpack.c.l.bf16 %v250_v5  ;;  %v154_v10 = vunpack.c.l.bf16 %v252_v7  ;;  %v155_v11 = vunpack.c.l.bf16 %v253_v8  ;;  %v255_v12 = vld [vmem:[%s111_s11 + $0xc] sm:$0x3]  ;;  %v256_v13 = vld [vmem:[%s111_s11 + $0xe] sm:$0x3] }
  0x11   : > { %v122_v14 = vmax.f32 %v120_v3, %v121_v4  ;;  %v171_v15 = vunpack.c.l.bf16 %v255_v12  ;;  %v172_v16 = vunpack.c.l.bf16 %v256_v13 }
  0x12   : > { %v139_v17 = vmax.f32 %v137_v6, %v138_v9  ;;  %v156_v18 = vmax.f32 %v154_v10, %v155_v11 }
  0x13   : > { %v173_v19 = vmax.f32 %v171_v15, %v172_v16 }
  0x14   : > { %v271_v20 = vpack.i.bf16 %v139_v17, %v122_v14 }
  0x15   : > { %v276_v21 = vpack.i.bf16 %v173_v19, %v156_v18 }
  0x16   : > { %272 = vrot.lane.b32.xlu0 %v271_v20, %s289_s12 }
  0x1e   : > { %277 = vrot.lane.b32.xlu0 %v276_v21, %s289_s12 }
  0x88   : > { %v273_v22 = vpop.permute.xlu0 %272 }
  0x89   : > { %v275_v23 = vunpack.i.h.bf16 %v273_v22  ;;  %v274_v24 = vunpack.i.l.bf16 %v273_v22 }
  0x8b   : > { %v146_v25 = vmax.f32 %v139_v17, %v275_v23  ;;  %v129_v26 = vmax.f32 %v122_v14, %v274_v24 }
  0x8d   : > { %v147_v27 = vpack.c.bf16 %v146_v25, %v146_v25  ;;  %v130_v28 = vpack.c.bf16 %v129_v26, %v129_v26 }
  0x8f   : > { %251 = vst.msk [vmem:[%s116_s16 + $0x2] sm:$0x3] %vm131_vm0, %v147_v27 }
  0x90   : > { %132 = vst.msk [vmem:[%s116_s16] sm:$0x3] %vm131_vm0, %v130_v28  ;;  %v278_v29 = vpop.permute.xlu0 %277 }
  0x91   : > { %v280_v30 = vunpack.i.h.bf16 %v278_v29  ;;  %v279_v31 = vunpack.i.l.bf16 %v278_v29 }
  0x93   : > { %v180_v32 = vmax.f32 %v173_v19, %v280_v30  ;;  %v163_v33 = vmax.f32 %v156_v18, %v279_v31 }
  0x95   : > { %v181_v34 = vpack.c.bf16 %v180_v32, %v180_v32  ;;  %v164_v35 = vpack.c.bf16 %v163_v33, %v163_v33 }
  0x97   : > { %257 = vst.msk [vmem:[%s116_s16 + $0x6] sm:$0x3] %vm131_vm0, %v181_v34 }
  0x98   : > { %254 = vst.msk [vmem:[%s116_s16 + $0x4] sm:$0x3] %vm131_vm0, %v164_v35 }
  0x99 PF: > { %s11_s6 = sadd.s32 1, %s287_s6  }
  0x9a   : > { %p8_p4 = scmp.ge.s32.totalorder %s11_s6, 6  }
  0x9c   :  { %10 = sbr.rel (!%p8_p4) target bundleno = 1 (0x1), region = 64 }

// kernel: vgg_forward.27
= control target key start
LH: loop header
LB: loop body
LE: loop exit
PB: predicated region body
PF: predicated region fallthrough
CT: control target
= control target key end

     0   :  { %s695_s12 = smov 0   ;;  %s697_s13 = smov 0   ;;  %s763_s0 = inlined_call_operand.vmem [shape: bf16[4,4,64], index: 0, kind: input, shape index: {}]   ;;  %s764_s1 = inlined_call_operand.vmem [shape: bf16[2,3,64,128], index: 1, kind: input, shape index: {}]   ;;  %s765_s2 = inlined_call_operand.vmem [shape: f32[2,1,128], index: 2, kind: input, shape index: {}]   ;;  %s766_s3 = inlined_call_operand.vmem [shape: bf16[4,4,128], index: 3, kind: output, shape index: {}]  }
   0x1   :  { %s699_s14 = smov 0   ;;  %s701_s15 = smov 0  }
   0x2   :  { %s703_s16 = smov 0  }
   0x3 LB: > { %s22_s17 = sadd.s32 1, %s665_s14  ;;  %s25_s18 = sadd.s32 1, %s669_s15  ;;  %s673_s16 = sphi %s703_s16, %s13_s16   ;;  %s669_s15 = sphi %s701_s15, %s770_s15   ;;  %s665_s14 = sphi %s699_s14, %s769_s14   ;;  %s661_s13 = sphi %s697_s13, %s768_s13   ;;  %s657_s12 = sphi %s695_s12, %s767_s12  }
   0x4   : > { %p23_p0 = scmp.ge.s32.totalorder %s22_s17, 2  ;;  %p506_p1 = scmp.ge.s32.totalorder %s673_s16, 1 }
   0x5   : > { %p178_p2 = scmp.lt.s32.totalorder %s673_s16, 5 }
   0x6   : > { %s772_s17 = smov (%p23_p0, %s22_s17), 0  ;;  %s774_s18 = smov (!%p23_p0, %s25_s18), %s669_s15 }
   0x7   : > { %p179_p3 = pnand %p506_p1, %p178_p2  ;;  %p27_p4 = scmp.ge.s32.totalorder %s774_s18, 2 }
   0x8   : > { %p220_p5 = scmp.lt.s32.totalorder (!%p179_p3), %s661_s13, 1  ;;  %s507_s19 = sshll.u32 (!%p179_p3), %s661_s13, 1 }
   0x9   : > { %s776_s18 = smov (%p27_p4, %s774_s18), 0  ;;  %182 = sbr.rel (%p179_p3) target bundleno = 195 (0xc3), region = 32 }
   0xa   : > { %s213_s20 = sadd.s32 (!%p179_p3), %s657_s12, %s507_s19 }
   0xb   : > { %p214_p6 = scmp.lt.s32.totalorder (!%p179_p3), %s213_s20, 3 }
   0xe   : > { %s778_s13 = smov (!%p220_p5, %s661_s13), 1  ;;  %s780_s20 = smov (!%p214_p6, %s213_s20), 3  ;;  %vm271_vm0 = vcmask 523264  }
   0xf   : > { %s593_s21 = smul.u32 96, %s778_s13  ;;  %s508_s25 = sshll.u32 %s780_s20, 1 }
  0x10   : > { %s217_s28 = scalar_lea.vmem %s763_s0, %s508_s25  ;;  %s227_s4 = scalar_lea.vmem %s765_s2, %s778_s13 }
  0x11   : > { %s224_s24 = scalar_lea.vmem %s764_s1, %s593_s21  ;;  %v237_v6 = vld [vmem:[%s217_s28] sm:$0x3]  ;;  %s233_s7 = scalar_lea.vmem %s766_s3, %s508_s25 }
  0x12   : > { %v584_v0 = vld [vmem:[%s224_s24 + $0x38] sm:$0xff]  ;;  %v583_v3 = vld [vmem:[%s224_s24 + $0x30] sm:$0xff]  ;;  %347 = vst [vmem:[#allocation1] ss:$4 sm:$0xff] %v237_v6  ;;  %v582_v7 = vld [vmem:[%s224_s24 + $0x28] sm:$0xff] }
  0x13   : > { %v588_v1 = vld [vmem:[%s224_s24 + $0x18] sm:$0xff]  ;;  %279 = vmatpush.bf16.msra.mxu0 %v584_v0  ;;  %v587_v4 = vld [vmem:[%s224_s24 + $0x10] sm:$0xff]  ;;  %v586_v8 = vld [vmem:[%s224_s24 + $0x8] sm:$0xff] }
  0x14   : > { %v592_v2 = vld [vmem:[%s224_s24 + $0x58] sm:$0xff]  ;;  %326 = vmatpush.bf16.msra.mxu1 %v588_v1  ;;  %v591_v5 = vld [vmem:[%s224_s24 + $0x50] sm:$0xff]  ;;  %v590_v9 = vld [vmem:[%s224_s24 + $0x48] sm:$0xff] }
  0x15   : > { %386 = vmatpush.bf16.msra.mxu2 %v592_v2  ;;  %v581_v10 = vld [vmem:[%s224_s24 + $0x20] sm:$0xff] }
  0x16   : > { %v585_v11 = vld [vmem:[%s224_s24] sm:$0xff] }
  0x17   : > { %280 = vmatpush.bf16.msra.mxu0 %v583_v3  ;;  %v589_v12 = vld [vmem:[%s224_s24 + $0x40] sm:$0xff] }
  0x18   : > { %327 = vmatpush.bf16.msra.mxu1 %v587_v4  ;;  %v634_v28 = vld [vmem:[%s227_s4] ss:$0 sm:$0xff] }
  0x19   : > { %387 = vmatpush.bf16.msra.mxu2 %v591_v5  ;;  %v348_v13 = vld.sshfl [vmem:[#allocation1] sm:$0xff pattern:$0x73625140] }
  0x1a   : > { %v349_v14 = vshrl.u32 %v348_v13, 16  ;;  %v351_v15 = vshll.u32 %v348_v13, 16 }
  0x1b   : > { %281 = vmatpush.bf16.msra.mxu0 %v582_v7 }
  0x1c   : > { %328 = vmatpush.bf16.msra.mxu1 %v586_v8  ;;  %v353_v16 = vrot.slane %v351_v15, 1 }
  0x1d   : > { %388 = vmatpush.bf16.msra.mxu2 %v590_v9 }
  0x1e   : > { %v354_v17 = vor.u32 %v353_v16, %v349_v14 }
  0x1f   : > { %282 = vmatpush.bf16.msra.mxu0 %v581_v10 }
  0x20   : > { %329 = vmatpush.bf16.msra.mxu1 %v585_v11 }
  0x21   : > { %389 = vmatpush.bf16.msra.mxu2 %v589_v12 }
  0x22   : > { %536 = vmatmul.msk.bf16.vlgmr.msra.gmra.mxu0 %vm271_vm0, %v237_v6 }
  0x23   : > { %553 = vmatmul.msk.bf16.vlgmr.msra.gmra.mxu1 %vm271_vm0, %v237_v6 }
  0x24   : > { %578 = vmatmul.msk.bf16.vlgmr.msra.gmra.mxu2 %vm271_vm0, %v354_v17 }
  0x9f   : > { %v284_v18 = vpop.f32.mrf.mxu0 }
  0xa0   : > { %v331_v19 = vpop.f32.mrf.mxu1  ;;  %288 = vst [vmem:[#allocation2] sm:$0xf] %v284_v18 }
  0xa7   : > { %v391_v20 = vpop.f32.mrf.mxu2  ;;  %v289_v21 = vld [vmem:[#allocation2 + $0x1] sm:$0x7]  ;;  %v286_v22 = vpop.f32.mrf.mxu0 }
  0xa8   : > { %v333_v23 = vpop.f32.mrf.mxu1  ;;  %v335_v24 = vadd.f32 %v331_v19, %v289_v21 }
  0xaa   : > { %336 = vst [vmem:[#allocation2 + $0x1] sm:$0x7] %v335_v24 }
  0xaf   : > { %v393_v25 = vpop.f32.mrf.mxu2 }
  0xb1   : > { %v337_v26 = vld [vmem:[#allocation2] sm:$0x7] }
  0xb2   : > { %v395_v27 = vadd.f32 %v391_v20, %v337_v26 }
  0xb4   : > { %396 = vst [vmem:[#allocation2] sm:$0x7] %v395_v27 }
  0xbb   : > { %v397_v29 = vld [vmem:[#allocation2] sm:$0xf] }
  0xbc   : > { %v402_v30 = vadd.f32 %v634_v28, %v397_v29 }
  0xbe   : > { %v403_v31 = vmax.f32 %v402_v30, 0.0 }
  0xc0   : > { %v404_v32 = vpack.c.bf16 %v403_v31, %v403_v31 }
  0xc2   : > { %405 = vst [vmem:[%s233_s7] sm:$0x3] %v404_v32 }
  0xc3 PF: > { %s13_s16 = sadd.s32 1, %s673_s16   ;;  %s767_s12 = smov %s665_s14 }
  0xc4   : > { %p10_p7 = scmp.ge.s32.totalorder %s13_s16, 6   ;;  %s768_s13 = smov %s669_s15 }
  0xc5   : > { %s769_s14 = smov %s772_s17  ;;  %s770_s15 = smov %s776_s18 }
  0xc6   :  { %12 = sbr.rel (!%p10_p7) target bundleno = 3 (0x3), region = 70 }

// kernel: squeeze.2
= control target key start
LH: loop header
LB: loop body
LE: loop exit
PB: predicated region body
PF: predicated region fallthrough
CT: control target
= control target key end

     0   :  { %vm33_vm0 = vcmask 261120   ;;  %s108_s0 = inlined_call_operand.vmem [shape: bf16[2,2,64], index: 0, kind: input, shape index: {}]   ;;  %s109_s1 = inlined_call_operand.vmem [shape: bf16[2,2,2,32], index: 1, kind: output, shape index: {}]  }
   0x1   :  { %v74_v0 = vld [vmem:[%s108_s0 + $0x1] sm:$0x1]  ;;  %v28_v1 = vld [vmem:[%s108_s0] sm:$0x1]  ;;  %s79_s0 = smov 96  }
   0x2   :  { %v15_v2 = vunpack.c.l.bf16 %v74_v0  ;;  %v29_v3 = vunpack.c.l.bf16 %v28_v1 }
   0x4   :  { %18 = vst [vmem:[#allocation1 + $0x8] sm:$0x3] %v15_v2 }
   0x5   :  { %31 = vst [vmem:[#allocation1] sm:$0x3] %v29_v3 }
   0xb   :  { %v36_v4 = vld [vmem:[#allocation1 + $0x8] sm:$0x3]  }
   0xc   :  { %v40_v5 = vld.sshfl [vmem:[#allocation1] sm:$0xff pattern:$0x99999810]   ;;  %39 = vst.msk [vmem:[#allocation0 + $0x10] ss:$8 sm:$0x3] %vm33_vm0, %v36_v4  }
   0xd   :  { %v32_v6 = vld [vmem:[#allocation1] sm:$0x3]   ;;  %41 = vrot.lane.b32.xlu0 %v40_v5, %s79_s0 }
   0xe   :  { %34 = vst.msk [vmem:[#allocation0] ss:$8 sm:$0x3] %vm33_vm0, %v32_v6  }
  0x7f   :  { %v42_v7 = vpop.permute.xlu0 %41  }
  0x80   :  { %45 = vst.msk [vmem:[#allocation0 + $0x1] ss:$8 sm:$0xf] %vm33_vm0, %v42_v7  }
  0x87   :  { %v48_v8 = vld [vmem:[#allocation0] sm:$0x3]  ;;  %v54_v9 = vld [vmem:[#allocation0 + $0x8] sm:$0x3]  ;;  %v61_v10 = vld [vmem:[#allocation0 + $0x10] sm:$0x3] }
  0x88   :  { %v49_v11 = vpack.c.bf16 0.0, %v48_v8  ;;  %v55_v12 = vpack.c.bf16 0.0, %v54_v9  ;;  %v62_v13 = vpack.c.bf16 0.0, %v61_v10  ;;  %v68_v14 = vld [vmem:[#allocation0 + $0x18] sm:$0x3] }
  0x89   :  { %v69_v15 = vpack.c.bf16 0.0, %v68_v14 }
  0x8a   :  { %52 = vst [vmem:[%s109_s1] sm:$0x1] %v49_v11 }
  0x8b   :  { %75 = vst [vmem:[%s109_s1 + $0x1] sm:$0x1] %v55_v12 }
  0x8c   :  { %76 = vst [vmem:[%s109_s1 + $0x2] sm:$0x1] %v62_v13 }
  0x8d   :  { %77 = vst [vmem:[%s109_s1 + $0x3] sm:$0x1] %v69_v15 }

// kernel: vgg_forward.30
= control target key start
LH: loop header
LB: loop body
LE: loop exit
PB: predicated region body
PF: predicated region fallthrough
CT: control target
= control target key end

     0   :  { %s244_s6 = smov 0   ;;  %s261_s0 = inlined_call_operand.vmem [shape: bf16[4,4,2,64], index: 0, kind: input, shape index: {}]   ;;  %s262_s1 = inlined_call_operand.vmem [shape: bf16[4,2,2,32], index: 1, kind: output, shape index: {}]  }
   0x1 LB: > { %s198_s7 = sadd.s32 4294967295, %s231_s6   ;;  %p202_p0 = scmp.ge.s32.totalorder %s231_s6, 1  ;;  %s231_s6 = sphi %s244_s6, %s11_s6  }
   0x2   : > { %p86_p1 = scmp.lt.s32.totalorder %s231_s6, 5 }
   0x4   : > { %p87_p2 = pnand %p202_p0, %p86_p1 }
   0x5   : > { %p104_p3 = scmp.lt.s32.totalorder (!%p87_p2), %s198_s7, 3  ;;  %s233_s12 = smov (!%p87_p2), 96  }
   0x6   : > { %90 = sbr.rel (%p87_p2) target bundleno = 145 (0x91), region = 24 }
   0xb   : > { %s264_s7 = smov (!%p104_p3, %s198_s7), 3  ;;  %vm126_vm0 = vcmask 253952  }
   0xc   : > { %s203_s8 = sshll.u32 %s264_s7, 2  ;;  %s204_s13 = sshll.u32 %s264_s7, 1 }
   0xd   : > { %s107_s11 = scalar_lea.vmem %s261_s0, %s203_s8  ;;  %s111_s16 = scalar_lea.vmem %s262_s1, %s204_s13 }
   0xe   : > { %v112_v0 = vld [vmem:[%s107_s11] sm:$0x1]  ;;  %v205_v1 = vld [vmem:[%s107_s11 + $0x1] sm:$0x1]  ;;  %v206_v2 = vld [vmem:[%s107_s11 + $0x2] sm:$0x1] }
   0xf   : > { %v115_v3 = vunpack.c.l.bf16 %v112_v0  ;;  %v116_v4 = vunpack.c.l.bf16 %v205_v1  ;;  %v207_v5 = vld [vmem:[%s107_s11 + $0x3] sm:$0x1]  ;;  %v132_v6 = vunpack.c.l.bf16 %v206_v2 }
  0x10   : > { %v133_v7 = vunpack.c.l.bf16 %v207_v5 }
  0x11   : > { %v117_v8 = vmax.f32 %v115_v3, %v116_v4 }
  0x12   : > { %v134_v9 = vmax.f32 %v132_v6, %v133_v7 }
  0x14   : > { %v220_v10 = vpack.i.bf16 %v134_v9, %v117_v8 }
  0x16   : > { %221 = vrot.lane.b32.xlu0 %v220_v10, %s233_s12 }
  0x88   : > { %v222_v11 = vpop.permute.xlu0 %221 }
  0x89   : > { %v224_v12 = vunpack.i.h.bf16 %v222_v11  ;;  %v223_v13 = vunpack.i.l.bf16 %v222_v11 }
  0x8b   : > { %v141_v14 = vmax.f32 %v134_v9, %v224_v12  ;;  %v124_v15 = vmax.f32 %v117_v8, %v223_v13 }
  0x8d   : > { %v142_v16 = vpack.c.bf16 %v141_v14, %v141_v14  ;;  %v125_v17 = vpack.c.bf16 %v124_v15, %v124_v15 }
  0x8f   : > { %208 = vst.msk [vmem:[%s111_s16 + $0x1] sm:$0x1] %vm126_vm0, %v142_v16 }
  0x90   : > { %127 = vst.msk [vmem:[%s111_s16] sm:$0x1] %vm126_vm0, %v125_v17 }
  0x91 PF: > { %s11_s6 = sadd.s32 1, %s231_s6  }
  0x92   : > { %p8_p4 = scmp.ge.s32.totalorder %s11_s6, 6  }
  0x94   :  { %10 = sbr.rel (!%p8_p4) target bundleno = 1 (0x1), region = 58 }

// kernel: vgg_forward.28
= control target key start
LH: loop header
LB: loop body
LE: loop exit
PB: predicated region body
PF: predicated region fallthrough
CT: control target
= control target key end

     0   :  { %s858_s12 = smov 0   ;;  %s860_s13 = smov 0   ;;  %s952_s0 = inlined_call_operand.vmem [shape: bf16[4,4,128], index: 0, kind: input, shape index: {}]   ;;  %s953_s1 = inlined_call_operand.vmem [shape: bf16[2,3,128,128], index: 1, kind: input, shape index: {}]   ;;  %s954_s2 = inlined_call_operand.vmem [shape: f32[2,1,128], index: 2, kind: input, shape index: {}]   ;;  %s955_s3 = inlined_call_operand.vmem [shape: bf16[4,4,128], index: 3, kind: output, shape index: {}]  }
   0x1   :  { %s862_s14 = smov 0   ;;  %s864_s15 = smov 0  }
   0x2   :  { %s866_s16 = smov 0  }
   0x3 LB: > { %s22_s17 = sadd.s32 1, %s828_s14  ;;  %s25_s18 = sadd.s32 1, %s832_s15  ;;  %s836_s16 = sphi %s866_s16, %s13_s16   ;;  %s832_s15 = sphi %s864_s15, %s959_s15   ;;  %s828_s14 = sphi %s862_s14, %s958_s14   ;;  %s824_s13 = sphi %s860_s13, %s957_s13   ;;  %s820_s12 = sphi %s858_s12, %s956_s12  }
   0x4   : > { %p23_p0 = scmp.ge.s32.totalorder %s22_s17, 2  ;;  %p596_p1 = scmp.ge.s32.totalorder %s836_s16, 1 }
   0x5   : > { %p178_p2 = scmp.lt.s32.totalorder %s836_s16, 5 }
   0x6   : > { %s961_s17 = smov (%p23_p0, %s22_s17), 0  ;;  %s963_s18 = smov (!%p23_p0, %s25_s18), %s832_s15 }
   0x7   : > { %p179_p3 = pnand %p596_p1, %p178_p2  ;;  %p27_p4 = scmp.ge.s32.totalorder %s963_s18, 2 }
   0x8   : > { %p220_p5 = scmp.lt.s32.totalorder (!%p179_p3), %s824_s13, 1  ;;  %s597_s19 = sshll.u32 (!%p179_p3), %s824_s13, 1 }
   0x9   : > { %s965_s18 = smov (%p27_p4, %s963_s18), 0  ;;  %182 = sbr.rel (%p179_p3) target bundleno = 211 (0xd3), region = 32 }
   0xa   : > { %s213_s20 = sadd.s32 (!%p179_p3), %s820_s12, %s597_s19 }
   0xb   : > { %p214_p6 = scmp.lt.s32.totalorder (!%p179_p3), %s213_s20, 3 }
   0xe   : > { %s967_s13 = smov (!%p220_p5, %s824_s13), 1  ;;  %s969_s20 = smov (!%p214_p6, %s213_s20), 3 }
   0xf   : > { %s756_s21 = smul.u32 192, %s967_s13  ;;  %s598_s25 = sshll.u32 %s969_s20, 1 }
  0x10   : > { %s217_s28 = scalar_lea.vmem %s952_s0, %s598_s25  ;;  %s227_s4 = scalar_lea.vmem %s954_s2, %s967_s13 }
  0x11   : > { %s896_s24 = scalar_lea.vmem %s953_s1, %s756_s21  ;;  %v236_v9 = vld [vmem:[%s217_s28] sm:$0x3]  ;;  %s233_s7 = scalar_lea.vmem %s955_s3, %s598_s25 }
  0x12   : > { %v739_v0 = vld [vmem:[%s896_s24 + $0x78] sm:$0xff]  ;;  %v738_v3 = vld [vmem:[%s896_s24 + $0x70] sm:$0xff]  ;;  %v737_v6 = vld [vmem:[%s896_s24 + $0x68] sm:$0xff]  ;;  %415 = vst [vmem:[#allocation1] ss:$4 sm:$0xff] %v236_v9 }
  0x13   : > { %v747_v1 = vld [vmem:[%s896_s24 + $0x38] sm:$0xff]  ;;  %302 = vmatpush.bf16.msra.mxu0 %v739_v0  ;;  %v746_v4 = vld [vmem:[%s896_s24 + $0x30] sm:$0xff]  ;;  %v745_v7 = vld [vmem:[%s896_s24 + $0x28] sm:$0xff] }
  0x14   : > { %v755_v2 = vld [vmem:[%s896_s24 + $0xb8] sm:$0xff]  ;;  %381 = vmatpush.bf16.msra.mxu1 %v747_v1  ;;  %v754_v5 = vld [vmem:[%s896_s24 + $0xb0] sm:$0xff]  ;;  %v753_v8 = vld [vmem:[%s896_s24 + $0xa8] sm:$0xff] }
  0x15   : > { %472 = vmatpush.bf16.msra.mxu2 %v755_v2  ;;  %v736_v10 = vld [vmem:[%s896_s24 + $0x60] sm:$0xff]  ;;  %v735_v13 = vld [vmem:[%s896_s24 + $0x58] sm:$0xff]  ;;  %v734_v16 = vld [vmem:[%s896_s24 + $0x50] sm:$0xff] }
  0x16   : > { %v744_v11 = vld [vmem:[%s896_s24 + $0x20] sm:$0xff]  ;;  %v743_v14 = vld [vmem:[%s896_s24 + $0x18] sm:$0xff]  ;;  %v742_v17 = vld [vmem:[%s896_s24 + $0x10] sm:$0xff] }
  0x17   : > { %303 = vmatpush.bf16.msra.mxu0 %v738_v3  ;;  %v752_v12 = vld [vmem:[%s896_s24 + $0xa0] sm:$0xff]  ;;  %v751_v15 = vld [vmem:[%s896_s24 + $0x98] sm:$0xff]  ;;  %v750_v18 = vld [vmem:[%s896_s24 + $0x90] sm:$0xff] }
  0x18   : > { %382 = vmatpush.bf16.msra.mxu1 %v746_v4  ;;  %v733_v20 = vld [vmem:[%s896_s24 + $0x48] sm:$0xff]  ;;  %v732_v24 = vld [vmem:[%s896_s24 + $0x40] sm:$0xff] }
  0x19   : > { %473 = vmatpush.bf16.msra.mxu2 %v754_v5  ;;  %v416_v19 = vld.sshfl [vmem:[#allocation1] sm:$0xff pattern:$0x73625140]  ;;  %v741_v21 = vld [vmem:[%s896_s24 + $0x8] sm:$0xff] }
  0x1a   : > { %v419_v22 = vshll.u32 %v416_v19, 16  ;;  %v749_v23 = vld [vmem:[%s896_s24 + $0x88] sm:$0xff]  ;;  %v740_v25 = vld [vmem:[%s896_s24] sm:$0xff]  ;;  %v417_v26 = vshrl.u32 %v416_v19, 16 }
  0x1b   : > { %304 = vmatpush.bf16.msra.mxu0 %v737_v6  ;;  %v748_v28 = vld [vmem:[%s896_s24 + $0x80] sm:$0xff] }
  0x1c   : > { %383 = vmatpush.bf16.msra.mxu1 %v745_v7  ;;  %v421_v27 = vrot.slane %v419_v22, 1  ;;  %v797_v40 = vld [vmem:[%s227_s4] ss:$0 sm:$0xff] }
  0x1d   : > { %474 = vmatpush.bf16.msra.mxu2 %v753_v8 }
  0x1e   : > { %v422_v29 = vor.u32 %v421_v27, %v417_v26 }
  0x1f   : > { %305 = vmatpush.bf16.msra.mxu0 %v736_v10 }
  0x20   : > { %384 = vmatpush.bf16.msra.mxu1 %v744_v11 }
  0x21   : > { %475 = vmatpush.bf16.msra.mxu2 %v752_v12 }
  0x23   : > { %306 = vmatpush.bf16.msra.mxu0 %v735_v13 }
  0x24   : > { %385 = vmatpush.bf16.msra.mxu1 %v743_v14 }
  0x25   : > { %476 = vmatpush.bf16.msra.mxu2 %v751_v15 }
  0x27   : > { %307 = vmatpush.bf16.msra.mxu0 %v734_v16 }
  0x28   : > { %386 = vmatpush.bf16.msra.mxu1 %v742_v17 }
  0x29   : > { %477 = vmatpush.bf16.msra.mxu2 %v750_v18 }
  0x2b   : > { %308 = vmatpush.bf16.msra.mxu0 %v733_v20 }
  0x2c   : > { %387 = vmatpush.bf16.msra.mxu1 %v741_v21 }
  0x2d   : > { %478 = vmatpush.bf16.msra.mxu2 %v749_v23 }
  0x2f   : > { %309 = vmatpush.bf16.msra.mxu0 %v732_v24 }
  0x30   : > { %388 = vmatpush.bf16.msra.mxu1 %v740_v25 }
  0x31   : > { %479 = vmatpush.bf16.msra.mxu2 %v748_v28 }
  0x32   : > { %310 = vmatmul.bf16.vlgmr.msra.gmra.mxu0 %v236_v9 }
  0x33   : > { %389 = vmatmul.bf16.vlgmr.msra.gmra.mxu1 %v236_v9 }
  0x34   : > { %480 = vmatmul.bf16.vlgmr.msra.gmra.mxu2 %v422_v29 }
  0xaf   : > { %v311_v30 = vpop.f32.mrf.mxu0 }
  0xb0   : > { %v390_v31 = vpop.f32.mrf.mxu1  ;;  %315 = vst [vmem:[#allocation2] sm:$0xf] %v311_v30 }
  0xb7   : > { %v481_v32 = vpop.f32.mrf.mxu2  ;;  %v316_v33 = vld [vmem:[#allocation2 + $0x1] sm:$0x7]  ;;  %v313_v34 = vpop.f32.mrf.mxu0 }
  0xb8   : > { %v392_v35 = vpop.f32.mrf.mxu1  ;;  %v394_v36 = vadd.f32 %v390_v31, %v316_v33 }
  0xba   : > { %395 = vst [vmem:[#allocation2 + $0x1] sm:$0x7] %v394_v36 }
  0xbf   : > { %v483_v37 = vpop.f32.mrf.mxu2 }
  0xc1   : > { %v396_v38 = vld [vmem:[#allocation2] sm:$0x7] }
  0xc2   : > { %v485_v39 = vadd.f32 %v481_v32, %v396_v38 }
  0xc4   : > { %486 = vst [vmem:[#allocation2] sm:$0x7] %v485_v39 }
  0xcb   : > { %v487_v41 = vld [vmem:[#allocation2] sm:$0xf] }
  0xcc   : > { %v492_v42 = vadd.f32 %v797_v40, %v487_v41 }
  0xce   : > { %v493_v43 = vmax.f32 %v492_v42, 0.0 }
  0xd0   : > { %v494_v44 = vpack.c.bf16 %v493_v43, %v493_v43 }
  0xd2   : > { %495 = vst [vmem:[%s233_s7] sm:$0x3] %v494_v44 }
  0xd3 PF: > { %s13_s16 = sadd.s32 1, %s836_s16   ;;  %s956_s12 = smov %s828_s14 }
  0xd4   : > { %p10_p7 = scmp.ge.s32.totalorder %s13_s16, 6   ;;  %s957_s13 = smov %s832_s15 }
  0xd5   : > { %s958_s14 = smov %s961_s17  ;;  %s959_s15 = smov %s965_s18 }
  0xd6   :  { %12 = sbr.rel (!%p10_p7) target bundleno = 3 (0x3), region = 70 }

// kernel: vgg_forward.31
= control target key start
LH: loop header
LB: loop body
LE: loop exit
PB: predicated region body
PF: predicated region fallthrough
CT: control target
= control target key end

     0   :  { %s677_s12 = smov 0   ;;  %s679_s13 = smov 0   ;;  %s742_s0 = inlined_call_operand.vmem [shape: bf16[4,2,64], index: 0, kind: input, shape index: {}]   ;;  %s743_s1 = inlined_call_operand.vmem [shape: bf16[2,3,64,64], index: 1, kind: input, shape index: {}]   ;;  %s744_s2 = inlined_call_operand.vmem [shape: f32[2,1,64], index: 2, kind: input, shape index: {}]   ;;  %s745_s3 = inlined_call_operand.vmem [shape: bf16[4,2,64], index: 3, kind: output, shape index: {}]  }
   0x1   :  { %s681_s14 = smov 0   ;;  %s683_s15 = smov 0  }
   0x2   :  { %s685_s16 = smov 0  }
   0x3 LB: > { %s22_s17 = sadd.s32 1, %s647_s14  ;;  %s25_s18 = sadd.s32 1, %s651_s15  ;;  %s655_s16 = sphi %s685_s16, %s13_s16   ;;  %s651_s15 = sphi %s683_s15, %s749_s15   ;;  %s647_s14 = sphi %s681_s14, %s748_s14   ;;  %s643_s13 = sphi %s679_s13, %s747_s13   ;;  %s639_s12 = sphi %s677_s12, %s746_s12  }
   0x4   : > { %p23_p0 = scmp.ge.s32.totalorder %s22_s17, 2  ;;  %p490_p1 = scmp.ge.s32.totalorder %s655_s16, 1 }
   0x5   : > { %p177_p2 = scmp.lt.s32.totalorder %s655_s16, 5 }
   0x6   : > { %s751_s17 = smov (%p23_p0, %s22_s17), 0  ;;  %s753_s18 = smov (!%p23_p0, %s25_s18), %s651_s15 }
   0x7   : > { %p178_p3 = pnand %p490_p1, %p177_p2  ;;  %p27_p4 = scmp.ge.s32.totalorder %s753_s18, 2 }
   0x8   : > { %p216_p5 = scmp.lt.s32.totalorder (!%p178_p3), %s643_s13, 1  ;;  %s491_s19 = sshll.u32 (!%p178_p3), %s643_s13, 1 }
   0x9   : > { %s755_s18 = smov (%p27_p4, %s753_s18), 0  ;;  %181 = sbr.rel (%p178_p3) target bundleno = 186 (0xba), region = 32 }
   0xa   : > { %s210_s20 = sadd.s32 (!%p178_p3), %s639_s12, %s491_s19 }
   0xb   : > { %p211_p6 = scmp.lt.s32.totalorder (!%p178_p3), %s210_s20, 3 }
   0xe   : > { %s757_s13 = smov (!%p216_p5, %s643_s13), 1  ;;  %s759_s20 = smov (!%p211_p6, %s210_s20), 3  ;;  %vm266_vm0 = vcmask 523264   ;;  %vm283_vm1 = vcmask 517120   ;;  %vm332_vm2 = vcmask 516096  }
   0xf   : > { %s575_s21 = smul.u32 96, %s757_s13  ;;  %s213_s27 = scalar_lea.vmem %s742_s0, %s759_s20 }
  0x10   : > { %v232_v6 = vld [vmem:[%s213_s27] sm:$0x1]  ;;  %s223_s30 = scalar_lea.vmem %s744_s2, %s757_s13  ;;  %s228_s6 = scalar_lea.vmem %s745_s3, %s759_s20 }
  0x11   : > { %s220_s24 = scalar_lea.vmem %s743_s1, %s575_s21  ;;  %344 = vst [vmem:[#allocation1] ss:$9 sm:$0xff] %v232_v6  ;;  %v616_v25 = vld [vmem:[%s223_s30] ss:$0 sm:$0xff] }
  0x12   : > { %v566_v0 = vld [vmem:[%s220_s24 + $0x38] sm:$0xff]  ;;  %v565_v3 = vld [vmem:[%s220_s24 + $0x30] sm:$0xff]  ;;  %v564_v7 = vld [vmem:[%s220_s24 + $0x28] sm:$0xff] }
  0x13   : > { %v570_v1 = vld [vmem:[%s220_s24 + $0x18] sm:$0xff]  ;;  %274 = vmatpush.bf16.msra.mxu0 %v566_v0  ;;  %v569_v4 = vld [vmem:[%s220_s24 + $0x10] sm:$0xff]  ;;  %v568_v8 = vld [vmem:[%s220_s24 + $0x8] sm:$0xff] }
  0x14   : > { %v574_v2 = vld [vmem:[%s220_s24 + $0x58] sm:$0xff]  ;;  %322 = vmatpush.bf16.msra.mxu1 %v570_v1  ;;  %v573_v5 = vld [vmem:[%s220_s24 + $0x50] sm:$0xff]  ;;  %v572_v9 = vld [vmem:[%s220_s24 + $0x48] sm:$0xff] }
  0x15   : > { %379 = vmatpush.bf16.msra.mxu2 %v574_v2  ;;  %v563_v10 = vld [vmem:[%s220_s24 + $0x20] sm:$0xff] }
  0x16   : > { %v567_v11 = vld [vmem:[%s220_s24] sm:$0xff] }
  0x17   : > { %275 = vmatpush.bf16.msra.mxu0 %v565_v3  ;;  %v571_v12 = vld [vmem:[%s220_s24 + $0x40] sm:$0xff] }
  0x18   : > { %323 = vmatpush.bf16.msra.mxu1 %v569_v4  ;;  %v345_v13 = vld [vmem:[#allocation1] sm:$0xff] }
  0x19   : > { %380 = vmatpush.bf16.msra.mxu2 %v573_v5  ;;  %v346_v14 = vshrl.u32 %v345_v13, 16 }
  0x1b   : > { %276 = vmatpush.bf16.msra.mxu0 %v564_v7 }
  0x1c   : > { %324 = vmatpush.bf16.msra.mxu1 %v568_v8 }
  0x1d   : > { %381 = vmatpush.bf16.msra.mxu2 %v572_v9 }
  0x1f   : > { %277 = vmatpush.bf16.msra.mxu0 %v563_v10 }
  0x20   : > { %325 = vmatpush.bf16.msra.mxu1 %v567_v11 }
  0x21   : > { %382 = vmatpush.bf16.msra.mxu2 %v571_v12 }
  0x22   : > { %518 = vmatmul.msk.bf16.vlgmr.msra.gmra.mxu0 %vm266_vm0, %v232_v6 }
  0x23   : > { %535 = vmatmul.msk.bf16.vlgmr.msra.gmra.mxu1 %vm266_vm0, %v232_v6 }
  0x24   : > { %560 = vmatmul.msk.bf16.vlgmr.msra.gmra.mxu2 %vm266_vm0, %v346_v14 }
  0x9f   : > { %v279_v15 = vpop.f32.mrf.mxu0 }
  0xa0   : > { %v327_v16 = vpop.f32.mrf.mxu1  ;;  %284 = vst.msk [vmem:[#allocation2] sm:$0x3] %vm283_vm1, %v279_v15 }
  0xa7   : > { %v384_v17 = vpop.f32.mrf.mxu2  ;;  %v285_v18 = vld [vmem:[#allocation2 + $0x1] sm:$0x1]  ;;  %v334_v19 = vld [vmem:[#allocation2] sm:$0x1]  ;;  %v281_v20 = vpop.f32.mrf.mxu0 }
  0xa8   : > { %v329_v21 = vpop.f32.mrf.mxu1  ;;  %v331_v22 = vadd.f32 %v327_v16, %v285_v18  ;;  %v388_v23 = vadd.f32 %v384_v17, %v334_v19 }
  0xaa   : > { %333 = vst.msk [vmem:[#allocation2 + $0x1] sm:$0x1] %vm332_vm2, %v331_v22 }
  0xab   : > { %389 = vst.msk [vmem:[#allocation2] sm:$0x1] %vm332_vm2, %v388_v23 }
  0xaf   : > { %v386_v24 = vpop.f32.mrf.mxu2 }
  0xb2   : > { %v390_v26 = vld [vmem:[#allocation2] sm:$0x3] }
  0xb3   : > { %v395_v27 = vadd.f32 %v616_v25, %v390_v26 }
  0xb5   : > { %v396_v28 = vmax.f32 %v395_v27, 0.0 }
  0xb7   : > { %v397_v29 = vpack.c.bf16 %v396_v28, %v396_v28 }
  0xb9   : > { %398 = vst.msk [vmem:[%s228_s6] sm:$0x1] %vm332_vm2, %v397_v29 }
  0xba PF: > { %s13_s16 = sadd.s32 1, %s655_s16   ;;  %s746_s12 = smov %s647_s14 }
  0xbb   : > { %p10_p7 = scmp.ge.s32.totalorder %s13_s16, 6   ;;  %s747_s13 = smov %s651_s15 }
  0xbc   : > { %s748_s14 = smov %s751_s17  ;;  %s749_s15 = smov %s755_s18 }
  0xbd   :  { %12 = sbr.rel (!%p10_p7) target bundleno = 3 (0x3), region = 70 }

// kernel: vgg_forward.33
= control target key start
LH: loop header
LB: loop body
LE: loop exit
PB: predicated region body
PF: predicated region fallthrough
CT: control target
= control target key end

     0   :  { %s718_s0 = inlined_call_operand.vmem [shape: bf16[2,256], index: 0, kind: input, shape index: {}]   ;;  %s719_s1 = inlined_call_operand.vmem [shape: bf16[256,128], index: 1, kind: input, shape index: {}]   ;;  %s720_s2 = inlined_call_operand.vmem [shape: f32[1,128], index: 2, kind: input, shape index: {}]   ;;  %s721_s3 = inlined_call_operand.vmem [shape: bf16[128,128], index: 3, kind: input, shape index: {}]   ;;  %s722_s4 = inlined_call_operand.vmem [shape: f32[1,128], index: 4, kind: input, shape index: {}]   ;;  %s723_s5 = inlined_call_operand.vmem [shape: bf16[128,5], index: 5, kind: input, shape index: {}]   ;;  %s724_s6 = inlined_call_operand.vmem [shape: f32[1,5], index: 6, kind: input, shape index: {}]   ;;  %s725_s7 = inlined_call_operand.hbm [shape: f32[2,5], index: 7, kind: output, shape index: {}]  }
   0x1   :  { %v511_v0 = vld [vmem:[%s719_s1 + $0x38] sm:$0xff]  ;;  %v510_v2 = vld [vmem:[%s719_s1 + $0x30] sm:$0xff]  ;;  %v27_v4 = vld [vmem:[%s718_s0] sm:$0x3] }
   0x2   :  { %v519_v1 = vld [vmem:[%s719_s1 + $0x78] sm:$0xff]  ;;  %166 = vmatpush.bf16.msra.mxu0 %v511_v0  ;;  %v518_v3 = vld [vmem:[%s719_s1 + $0x70] sm:$0xff]  ;;  %v509_v6 = vld [vmem:[%s719_s1 + $0x28] sm:$0xff]  ;;  %65 = vst [vmem:[#allocation1] ss:$9 sm:$0xff] %v27_v4 }
   0x3   :  { %179 = vmatpush.bf16.msra.mxu1 %v519_v1  ;;  %v527_v5 = vld [vmem:[%s721_s3 + $0x38] sm:$0xff]  ;;  %v517_v7 = vld [vmem:[%s719_s1 + $0x68] sm:$0xff]  ;;  %v526_v8 = vld [vmem:[%s721_s3 + $0x30] sm:$0xff] }
   0x4   :  { %262 = vmatpush.bf16.msra.mxu2 %v527_v5 }
   0x6   :  { %167 = vmatpush.bf16.msra.mxu0 %v510_v2 }
   0x7   :  { %180 = vmatpush.bf16.msra.mxu1 %v518_v3 }
   0x8   :  { %12 = vsyncpa [#allocation3], 0  ;;  %v508_v9 = vld [vmem:[%s719_s1 + $0x20] sm:$0xff]  ;;  %263 = vmatpush.bf16.msra.mxu2 %v526_v8  ;;  %v525_v11 = vld [vmem:[%s721_s3 + $0x28] sm:$0xff]  ;;  %s566_s21 = smov [#allocation2]   ;;  %vm358_vm0 = vcmask 33792  }
   0x9   :  { %v516_v10 = vld [vmem:[%s719_s1 + $0x60] sm:$0xff]  ;;  %v507_v12 = vld [vmem:[%s719_s1 + $0x18] sm:$0xff]  ;;  %v506_v15 = vld [vmem:[%s719_s1 + $0x10] sm:$0xff]  ;;  %s365_s22 = sshll.u32 %s566_s21, 4  ;;  %s366_s22 = int_to_ptr.vmem [resolvable:$true] %s365_s22 }
   0xa   :  { %168 = vmatpush.bf16.msra.mxu0 %v509_v6  ;;  %v515_v13 = vld [vmem:[%s719_s1 + $0x58] sm:$0xff]  ;;  %v524_v14 = vld [vmem:[%s721_s3 + $0x20] sm:$0xff]  ;;  %v514_v16 = vld [vmem:[%s719_s1 + $0x50] sm:$0xff] }
   0xb   :  { %181 = vmatpush.bf16.msra.mxu1 %v517_v7  ;;  %v523_v17 = vld [vmem:[%s721_s3 + $0x18] sm:$0xff]  ;;  %v505_v18 = vld [vmem:[%s719_s1 + $0x8] sm:$0xff]  ;;  %v522_v20 = vld [vmem:[%s721_s3 + $0x10] sm:$0xff] }
   0xc   :  { %264 = vmatpush.bf16.msra.mxu2 %v525_v11  ;;  %v513_v19 = vld [vmem:[%s719_s1 + $0x48] sm:$0xff]  ;;  %v504_v21 = vld [vmem:[%s719_s1] sm:$0xff]  ;;  %v535_v27 = vld [vmem:[%s723_s5 + $0x38] sm:$0xff] }
   0xd   :  { %v512_v22 = vld [vmem:[%s719_s1 + $0x40] sm:$0xff]  ;;  %v67_v24 = vld [vmem:[#allocation1 + $0x9] sm:$0xff]  ;;  %345 = vmatpush.bf16.msra.mxu3 %v535_v27  ;;  %v531_v31 = vld [vmem:[%s723_s5 + $0x18] sm:$0xff] }
   0xe   :  { %169 = vmatpush.bf16.msra.mxu0 %v508_v9  ;;  %v66_v23 = vld [vmem:[#allocation1] sm:$0xff]  ;;  %v521_v25 = vld [vmem:[%s721_s3 + $0x8] sm:$0xff]  ;;  %v534_v28 = vld [vmem:[%s723_s5 + $0x30] sm:$0xff] }
   0xf   :  { %182 = vmatpush.bf16.msra.mxu1 %v516_v10  ;;  %v520_v26 = vld [vmem:[%s721_s3] sm:$0xff]  ;;  %v533_v29 = vld [vmem:[%s723_s5 + $0x28] sm:$0xff]  ;;  %v530_v32 = vld [vmem:[%s723_s5 + $0x10] sm:$0xff] }
  0x10   :  { %265 = vmatpush.bf16.msra.mxu2 %v524_v14  ;;  %v532_v30 = vld [vmem:[%s723_s5 + $0x20] sm:$0xff]  ;;  %v529_v42 = vld [vmem:[%s723_s5 + $0x8] sm:$0xff] }
  0x11   :  { %346 = vmatpush.bf16.msra.mxu3 %v534_v28  ;;  %v537_v33 = vld [vmem:[%s720_s2] ss:$0 sm:$0xff] }
  0x12   :  { %170 = vmatpush.bf16.msra.mxu0 %v507_v12  ;;  %v528_v43 = vld [vmem:[%s723_s5] sm:$0xff]  ;;  %s367_s5 = sshll.u32 %s725_s7, 4  ;;  %s368_s5 = int_to_ptr.hbm [resolvable:$true] %s367_s5 }
  0x13   :  { %183 = vmatpush.bf16.msra.mxu1 %v515_v13  ;;  %v538_v44 = vld [vmem:[%s722_s4] ss:$0 sm:$0xff] }
  0x14   :  { %266 = vmatpush.bf16.msra.mxu2 %v523_v17  ;;  %v539_v50 = vld [vmem:[%s724_s6] ss:$0 sm:$0xff] }
  0x15   :  { %347 = vmatpush.bf16.msra.mxu3 %v533_v29 }
  0x16   :  { %171 = vmatpush.bf16.msra.mxu0 %v506_v15 }
  0x17   :  { %184 = vmatpush.bf16.msra.mxu1 %v514_v16 }
  0x18   :  { %267 = vmatpush.bf16.msra.mxu2 %v522_v20 }
  0x19   :  { %348 = vmatpush.bf16.msra.mxu3 %v532_v30 }
  0x1a   :  { %172 = vmatpush.bf16.msra.mxu0 %v505_v18 }
  0x1b   :  { %185 = vmatpush.bf16.msra.mxu1 %v513_v19 }
  0x1c   :  { %268 = vmatpush.bf16.msra.mxu2 %v521_v25 }
  0x1d   :  { %349 = vmatpush.bf16.msra.mxu3 %v531_v31 }
  0x1e   :  { %173 = vmatpush.bf16.msra.mxu0 %v504_v21 }
  0x1f   :  { %186 = vmatpush.bf16.msra.mxu1 %v512_v22 }
  0x20   :  { %269 = vmatpush.bf16.msra.mxu2 %v520_v26 }
  0x21   :  { %174 = vmatmul.bf16.vlgmr.msra.gmra.mxu0 %v66_v23  ;;  %350 = vmatpush.bf16.msra.mxu3 %v530_v32 }
  0x22   :  { %187 = vmatmul.bf16.vlgmr.msra.gmra.mxu1 %v67_v24 }
  0x25   :  { %351 = vmatpush.bf16.msra.mxu3 %v529_v42 }
  0x29   :  { %352 = vmatpush.bf16.msra.mxu3 %v528_v43 }
  0x9e   :  { %v175_v34 = vpop.f32.mrf.mxu0 }
  0x9f   :  { %v188_v35 = vpop.f32.mrf.mxu1  ;;  %v176_v36 = vadd.f32 %v537_v33, %v175_v34 }
  0xa1   :  { %v189_v37 = vadd.f32 %v188_v35, %v176_v36 }
  0xa3   :  { %v192_v38 = vmax.f32 %v189_v37, 0.0 }
  0xa5   :  { %v193_v39 = vpack.c.bf16 %v192_v38, %v192_v38 }
  0xa6   :  { %v177_v40 = vpop.f32.mrf.mxu0 }
  0xa7   :  { %v190_v41 = vpop.f32.mrf.mxu1  ;;  %270 = vmatmul.bf16.vlgmr.msra.gmra.mxu2 %v193_v39 }
 0x12a   :  { %v271_v45 = vpop.f32.mrf.mxu2 }
 0x12b   :  { %v272_v46 = vadd.f32 %v538_v44, %v271_v45 }
 0x12d   :  { %v275_v47 = vmax.f32 %v272_v46, 0.0 }
 0x12f   :  { %v276_v48 = vpack.c.bf16 %v275_v47, %v275_v47 }
 0x131   :  { %353 = vmatmul.bf16.vlgmr.msra.gmra.mxu3 %v276_v48 }
 0x132   :  { %v273_v49 = vpop.f32.mrf.mxu2 }
 0x1b4   :  { %v354_v51 = vpop.f32.mrf.mxu3 }
 0x1b5   :  { %v355_v52 = vadd.f32 %v539_v50, %v354_v51 }
 0x1b7   :  { %359 = vst.msk [vmem:[#allocation2] sm:$0x3] %vm358_vm0, %v355_v52 }
 0x1b8   :  { %370 = dma.vmem_to_hbm [thread:$0]  %s366_s22, 32, %s368_s5, [#allocation3]  }
 0x1bc   :  { %v356_v53 = vpop.f32.mrf.mxu3 }
 0x1bd   :  { %564 = dma.done.wait [#allocation3], 32  }
 0x1be   :  { %565 = vsyncadd [#allocation3], 4294967264 }
 0x1bf   :  { %375 = vsyncpa [#allocation3], 1 }

</bundles_post_ra>
